<compile_context>
chip_gen: v6e
topology: v6e:2x2x1
jax: 0.10.0
libtpu: 0.0.40
codegen_flags: <defaults>
</compile_context>

<pallas_src>
import numpy as np

import jax
import jax.numpy as jnp
from jax.experimental import pallas as pl
from jax.experimental.pallas import tpu as pltpu


TB = 128  # batch tile: images live on the 128-wide lane axis


# ---------------------------------------------------------------------------
# Fused kernel
# ---------------------------------------------------------------------------
#
# VMEM layouts (all flat (sublanes, TB) f32, batch on lanes):
#   x    : (28*32, TB)        row ih at sublane ih*32, cols 28..31 zero-padded
#   p1   : (13*13*16, TB)     pool1 out, (ih, iw, ci<16) -> ih*208 + iw*16 + ci
#   p2   : (5*5*24, TB)       pool2 out, (ih, iw, ci<24) -> ih*120 + iw*24 + ci
#   act  : (144, TB)          conv3 out, (oh, ow, c<16)  -> oh*48 + ow*16 + c
#
# Lowered-conv weight matrices (built in prepare_params):
#   t1 : (416, 96)   rows = (parity p, pooled col s, ch c) = p*208 + s*16 + c
#   t2 : (240, 832)  rows = p*120 + s*24 + c
#   t3 : (48, 360)   rows = ow*16 + c
# so   dot(tN, input_row_slab)  ==  one full conv output row, with even /
# odd output columns in separate row blocks (=> W-pool is a single max).

def _fused_kernel(x_ref, t1_ref, b1r_ref, t2_ref, b2r_ref, t3_ref, b3r_ref,
                  w1p_ref, b1f_ref, w2f_ref, b2f_ref,
                  o_ref, p1_ref, p2_ref, act_ref):
    f32 = jnp.float32

    # ---- conv1 (1->10, 3x3) + ReLU + 2x2 pool -> p1 -----------------------
    def conv1_row(oh):                                  # one conv output row
        start = pl.multiple_of(oh * 32, 32)
        slab = x_ref[pl.ds(start, 96), :]                               # (96, TB)
        res = jnp.dot(t1_ref[...], slab, preferred_element_type=f32)   # (416, TB)
        return jnp.maximum(res[0:208, :], res[208:416, :])             # W-pool

    def c1_body(r, carry):
        m = jnp.maximum(conv1_row(2 * r), conv1_row(2 * r + 1))        # H-pool
        out = jnp.maximum(m + b1r_ref[...], 0.0)                       # bias+ReLU
        p1_ref[pl.ds(pl.multiple_of(r * 208, 16), 208), :] = out
        return carry

    jax.lax.fori_loop(0, 13, c1_body, 0)

    # ---- conv2 (10->20, 4x4) + ReLU + 2x2 pool -> p2 -----------------------
    def conv2_row(oh):
        start = pl.multiple_of(oh * 208, 16)
        slab = p1_ref[pl.ds(start, 832), :]                             # (832, TB)
        res = jnp.dot(t2_ref[...], slab, preferred_element_type=f32)   # (240, TB)
        return jnp.maximum(res[0:120, :], res[120:240, :])             # W-pool

    def c2_body(r, carry):
        m = jnp.maximum(conv2_row(2 * r), conv2_row(2 * r + 1))        # H-pool
        out = jnp.maximum(m + b2r_ref[...], 0.0)
        p2_ref[pl.ds(pl.multiple_of(r * 120, 8), 120), :] = out
        return carry

    jax.lax.fori_loop(0, 5, c2_body, 0)

    # ---- conv3 (20->10, 3x3) + ReLU -> act (flattened, fc1-ready) ----------
    for oh in range(3):                                  # static unroll (3 rows)
        slab = p2_ref[pl.ds(oh * 120, 360), :]                          # (360, TB)
        res = jnp.dot(t3_ref[...], slab, preferred_element_type=f32)   # (48, TB)
        act_ref[pl.ds(oh * 48, 48), :] = jnp.maximum(res + b3r_ref[...], 0.0)

    # ---- fc1 + fc2 on the MXU, lane-dense (features, TB) -------------------
    h1 = jnp.dot(w1p_ref[...], act_ref[...], preferred_element_type=f32)
    h1 = jnp.maximum(h1 + b1f_ref[...], 0.0)                           # (40, TB)
    h2 = jnp.dot(w2f_ref[...], h1, preferred_element_type=f32)
    o_ref[...] = jnp.maximum(h2 + b2f_ref[...], 0.0)                   # (20, TB)


# ---------------------------------------------------------------------------
# Parameters (deterministic, PyTorch-default-style uniform init)
# ---------------------------------------------------------------------------

def init_params(key):
    ks = jax.random.split(key, 10)

    def u(k, shape, fan_in):
        bound = 1.0 / jnp.sqrt(jnp.float32(fan_in))
        return jax.random.uniform(k, shape, jnp.float32, -bound, bound)

    return {
        "conv1_w": u(ks[0], (10, 1, 3, 3), 1 * 3 * 3),
        "conv1_b": u(ks[1], (10,), 1 * 3 * 3),
        "conv2_w": u(ks[2], (20, 10, 4, 4), 10 * 4 * 4),
        "conv2_b": u(ks[3], (20,), 10 * 4 * 4),
        "conv3_w": u(ks[4], (10, 20, 3, 3), 20 * 3 * 3),
        "conv3_b": u(ks[5], (10,), 20 * 3 * 3),
        "fcn1_w": u(ks[6], (40, 90), 90),
        "fcn1_b": u(ks[7], (40,), 90),
        "fcn2_w": u(ks[8], (20, 40), 40),
        "fcn2_b": u(ks[9], (20,), 40),
    }


def prepare_params(params):
    """One-time host-side repack into lowered-conv (Toeplitz) matrices."""
    c1w = np.asarray(params["conv1_w"], np.float32)   # (10, 1, 3, 3)
    c1b = np.asarray(params["conv1_b"], np.float32)
    c2w = np.asarray(params["conv2_w"], np.float32)   # (20, 10, 4, 4)
    c2b = np.asarray(params["conv2_b"], np.float32)
    c3w = np.asarray(params["conv3_w"], np.float32)   # (10, 20, 3, 3)
    c3b = np.asarray(params["conv3_b"], np.float32)
    f1w = np.asarray(params["fcn1_w"], np.float32)    # (40, 90)
    f1b = np.asarray(params["fcn1_b"], np.float32)
    f2w = np.asarray(params["fcn2_w"], np.float32)    # (20, 40)
    f2b = np.asarray(params["fcn2_b"], np.float32)

    # conv1: (416, 96); x slab column index k = kh*32 + iw (absolute column).
    t1 = np.zeros((416, 96), np.float32)
    b1r = np.zeros((208, 1), np.float32)
    for p in range(2):
        for s in range(13):
            ow = 2 * s + p
            for c in range(10):
                row = p * 208 + s * 16 + c
                for kh in range(3):
                    for kw in range(3):
                        t1[row, kh * 32 + ow + kw] = c1w[c, 0, kh, kw]
    for s in range(13):
        for c in range(10):
            b1r[s * 16 + c, 0] = c1b[c]

    # conv2: (240, 832); p1 slab column index k = kh*208 + iw*16 + ci.
    t2 = np.zeros((240, 832), np.float32)
    b2r = np.zeros((120, 1), np.float32)
    for p in range(2):
        for s in range(5):
            ow = 2 * s + p
            for c in range(20):
                row = p * 120 + s * 24 + c
                for ci in range(10):
                    for kh in range(4):
                        for kw in range(4):
                            t2[row, kh * 208 + (ow + kw) * 16 + ci] = \
                                c2w[c, ci, kh, kw]
    for s in range(5):
        for c in range(20):
            b2r[s * 24 + c, 0] = c2b[c]

    # conv3: (48, 360); p2 slab column index k = kh*120 + iw*24 + ci.
    t3 = np.zeros((48, 360), np.float32)
    b3r = np.zeros((48, 1), np.float32)
    for ow in range(3):
        for c in range(10):
            row = ow * 16 + c
            b3r[row, 0] = c3b[c]
            for ci in range(20):
                for kh in range(3):
                    for kw in range(3):
                        t3[row, kh * 120 + (ow + kw) * 24 + ci] = \
                            c3w[c, ci, kh, kw]

    # fc1 weights permuted to the kernel's flatten order (oh, ow, c<16).
    w1p = np.zeros((40, 144), np.float32)
    for c in range(10):
        for oh in range(3):
            for ow in range(3):
                w1p[:, oh * 48 + ow * 16 + c] = f1w[:, c * 9 + oh * 3 + ow]

    return {
        "t1": jnp.asarray(t1), "b1r": jnp.asarray(b1r),
        "t2": jnp.asarray(t2), "b2r": jnp.asarray(b2r),
        "t3": jnp.asarray(t3), "b3r": jnp.asarray(b3r),
        "w1p": jnp.asarray(w1p), "b1f": jnp.asarray(f1b.reshape(40, 1)),
        "w2f": jnp.asarray(f2w), "b2f": jnp.asarray(f2b.reshape(20, 1)),
    }


# ---------------------------------------------------------------------------
# Forward pass (mirrors TripleMNISTFocusEmbedder.forward)
# ---------------------------------------------------------------------------

@jax.jit
def triple_mnist_focus_embedder(prepped, x):
    n = x.shape[0]
    npad = ((n + TB - 1) // TB) * TB

    # NCHW -> (H, W, N), pad W 28->32 and N -> npad, flatten rows.
    # (Layout plumbing kept in XLA; the conv/fc math is all in the kernel.)
    xt = jnp.transpose(x.reshape(n, 28, 28), (1, 2, 0))      # (28, 28, n)
    xt = jnp.pad(xt, ((0, 0), (0, 4), (0, npad - n)))        # (28, 32, npad)
    xflat = xt.reshape(28 * 32, npad)                        # (896, npad)

    full = lambda shape: pl.BlockSpec(shape, lambda i: tuple(0 for _ in shape))

    out = pl.pallas_call(
        _fused_kernel,
        out_shape=jax.ShapeDtypeStruct((20, npad), jnp.float32),
        grid=(npad // TB,),
        in_specs=[
            pl.BlockSpec((896, TB), lambda i: (0, i)),        # x tile
            full((416, 96)),  full((208, 1)),                 # conv1
            full((240, 832)), full((120, 1)),                 # conv2
            full((48, 360)),  full((48, 1)),                  # conv3
            full((40, 144)),  full((40, 1)),                  # fc1
            full((20, 40)),   full((20, 1)),                  # fc2
        ],
        out_specs=pl.BlockSpec((20, TB), lambda i: (0, i)),   # lane-dense out
        scratch_shapes=[
            pltpu.VMEM((13 * 13 * 16, TB), jnp.float32),      # p1
            pltpu.VMEM((5 * 5 * 24, TB), jnp.float32),        # p2
            pltpu.VMEM((144, TB), jnp.float32),               # act (fc1 input)
        ],
        compiler_params=pltpu.CompilerParams(
            dimension_semantics=("parallel",),
            vmem_limit_bytes=32 * 1024 * 1024,
        ),
    )(xflat,
      prepped["t1"], prepped["b1r"],
      prepped["t2"], prepped["b2r"],
      prepped["t3"], prepped["b3r"],
      prepped["w1p"], prepped["b1f"],
      prepped["w2f"], prepped["b2f"])

    return out[:, :n].T                                       # (N, 20)


# ---------------------------------------------------------------------------
# Pure-JAX reference (PyTorch semantics) for a correctness check
# ---------------------------------------------------------------------------

def _reference_forward(params, x):
    def conv(x, w, b):
        y = jax.lax.conv_general_dilated(
            x, w, (1, 1), "VALID",
            dimension_numbers=("NCHW", "OIHW", "NCHW"))
        return jax.nn.relu(y + b[None, :, None, None])

    def pool(x):
        return jax.lax.reduce_window(x, -jnp.inf, jax.lax.max,
                                     (1, 1, 2, 2), (1, 1, 2, 2), "VALID")

    x = pool(conv(x, params["conv1_w"], params["conv1_b"]))
    x = pool(conv(x, params["conv2_w"], params["conv2_b"]))
    x = conv(x, params["conv3_w"], params["conv3_b"])
    x = x.reshape(-1, 90)
    x = jax.nn.relu(x @ params["fcn1_w"].T + params["fcn1_b"])
    x = jax.nn.relu(x @ params["fcn2_w"].T + params["fcn2_b"])
    return x


if __name__ == "__main__":
    key = jax.random.PRNGKey(0)
    k_params, k_x = jax.random.split(key)
    params = init_params(k_params)
    prepped = prepare_params(params)

    x = jax.random.uniform(k_x, (2, 1, 28, 28), jnp.float32)   # batch=2
    out = triple_mnist_focus_embedder(prepped, x)
    out = jax.block_until_ready(out)
    assert out.shape == (2, 20) and out.dtype == jnp.float32

    # MXU matmuls round operands to bf16 per pass, so ~1e-3-level deviations
    # from the exact-f32 reference are expected; real layout bugs show up as
    # O(0.1) errors, which this still catches.
    ref = _reference_forward(params, x)
    assert jnp.allclose(out, ref, atol=2e-2, rtol=2e-2), \
        float(jnp.max(jnp.abs(out - ref)))
    print("KERNEL_OK")
</pallas_src>

<mosaic_0001>
module attributes {stable_mosaic.version = 11 : i64} {
  func.func @_fused_kernel(%arg0: i32, %arg1: memref<896x128xf32, #tpu.memory_space<vmem>>, %arg2: memref<416x96xf32, #tpu.memory_space<vmem>>, %arg3: memref<208x1xf32, #tpu.memory_space<vmem>>, %arg4: memref<240x832xf32, #tpu.memory_space<vmem>>, %arg5: memref<120x1xf32, #tpu.memory_space<vmem>>, %arg6: memref<48x360xf32, #tpu.memory_space<vmem>>, %arg7: memref<48x1xf32, #tpu.memory_space<vmem>>, %arg8: memref<40x144xf32, #tpu.memory_space<vmem>>, %arg9: memref<40x1xf32, #tpu.memory_space<vmem>>, %arg10: memref<20x40xf32, #tpu.memory_space<vmem>>, %arg11: memref<20x1xf32, #tpu.memory_space<vmem>>, %arg12: memref<20x128xf32, #tpu.memory_space<vmem>>, %arg13: memref<2704x128xf32, #tpu.memory_space<vmem>>, %arg14: memref<600x128xf32, #tpu.memory_space<vmem>>, %arg15: memref<144x128xf32, #tpu.memory_space<vmem>>) attributes {dimension_semantics = [#tpu.dimension_semantics<parallel>], iteration_bounds = array<i64: 1>, scalar_prefetch = 0 : i64, scratch_operands = 3 : i64, tpu.core_type = #tpu.core_type<tc>, window_params = [{transform_indices = @transform_0, window_bounds = array<i64: 896, 128>}, {pipeline_mode = #tpu.pipeline_mode<synchronous>, transform_indices = @transform_1, window_bounds = array<i64: 416, 96>}, {pipeline_mode = #tpu.pipeline_mode<synchronous>, transform_indices = @transform_2, window_bounds = array<i64: 208, 1>}, {pipeline_mode = #tpu.pipeline_mode<synchronous>, transform_indices = @transform_3, window_bounds = array<i64: 240, 832>}, {pipeline_mode = #tpu.pipeline_mode<synchronous>, transform_indices = @transform_4, window_bounds = array<i64: 120, 1>}, {pipeline_mode = #tpu.pipeline_mode<synchronous>, transform_indices = @transform_5, window_bounds = array<i64: 48, 360>}, {pipeline_mode = #tpu.pipeline_mode<synchronous>, transform_indices = @transform_6, window_bounds = array<i64: 48, 1>}, {pipeline_mode = #tpu.pipeline_mode<synchronous>, transform_indices = @transform_7, window_bounds = array<i64: 40, 144>}, {pipeline_mode = #tpu.pipeline_mode<synchronous>, transform_indices = @transform_8, window_bounds = array<i64: 40, 1>}, {pipeline_mode = #tpu.pipeline_mode<synchronous>, transform_indices = @transform_9, window_bounds = array<i64: 20, 40>}, {pipeline_mode = #tpu.pipeline_mode<synchronous>, transform_indices = @transform_10, window_bounds = array<i64: 20, 1>}, {transform_indices = @transform_11, window_bounds = array<i64: 20, 128>}]} {
    %c0_i32 = arith.constant 0 : i32
    %c13_i32 = arith.constant 13 : i32
    %0 = arith.addi %c0_i32, %c13_i32 : i32
    %c1_i32 = arith.constant 1 : i32
    scf.for %arg16 = %c0_i32 to %0 step %c1_i32  : i32 {
      %c2_i32 = arith.constant 2 : i32
      %45 = arith.muli %c2_i32, %arg16 : i32
      %c32_i32 = arith.constant 32 : i32
      %46 = arith.muli %45, %c32_i32 : i32
      %47 = tpu.assume_multiple %46, 32 : i32
      %48 = arith.index_cast %47 : i32 to index
      %c0_44 = arith.constant 0 : index
      %49 = vector.load %arg1[%48, %c0_44] : memref<896x128xf32, #tpu.memory_space<vmem>>, vector<96x128xf32>
      %c0_45 = arith.constant 0 : index
      %c0_46 = arith.constant 0 : index
      %50 = vector.load %arg2[%c0_45, %c0_46] : memref<416x96xf32, #tpu.memory_space<vmem>>, vector<416x96xf32>
      %cst_47 = arith.constant dense<0.000000e+00> : vector<416x128xf32>
      %51 = tpu.matmul %50, %49, %cst_47 {dimension_numbers = #tpu.dot_dimension_numbers<[1], [0], [0], [1], [0, 0, 1, 1], [], []>} : vector<416x96xf32>, vector<96x128xf32>, vector<416x128xf32> -> vector<416x128xf32>
      %52 = vector.extract_strided_slice %51 {offsets = [0, 0], sizes = [208, 128], strides = [1, 1]} : vector<416x128xf32> to vector<208x128xf32>
      %53 = vector.extract_strided_slice %51 {offsets = [208, 0], sizes = [208, 128], strides = [1, 1]} : vector<416x128xf32> to vector<208x128xf32>
      %54 = arith.maximumf %52, %53 : vector<208x128xf32>
      %c2_i32_48 = arith.constant 2 : i32
      %55 = arith.muli %c2_i32_48, %arg16 : i32
      %c1_i32_49 = arith.constant 1 : i32
      %56 = arith.addi %55, %c1_i32_49 : i32
      %c32_i32_50 = arith.constant 32 : i32
      %57 = arith.muli %56, %c32_i32_50 : i32
      %58 = tpu.assume_multiple %57, 32 : i32
      %59 = arith.index_cast %58 : i32 to index
      %c0_51 = arith.constant 0 : index
      %60 = vector.load %arg1[%59, %c0_51] : memref<896x128xf32, #tpu.memory_space<vmem>>, vector<96x128xf32>
      %c0_52 = arith.constant 0 : index
      %c0_53 = arith.constant 0 : index
      %61 = vector.load %arg2[%c0_52, %c0_53] : memref<416x96xf32, #tpu.memory_space<vmem>>, vector<416x96xf32>
      %cst_54 = arith.constant dense<0.000000e+00> : vector<416x128xf32>
      %62 = tpu.matmul %61, %60, %cst_54 {dimension_numbers = #tpu.dot_dimension_numbers<[1], [0], [0], [1], [0, 0, 1, 1], [], []>} : vector<416x96xf32>, vector<96x128xf32>, vector<416x128xf32> -> vector<416x128xf32>
      %63 = vector.extract_strided_slice %62 {offsets = [0, 0], sizes = [208, 128], strides = [1, 1]} : vector<416x128xf32> to vector<208x128xf32>
      %64 = vector.extract_strided_slice %62 {offsets = [208, 0], sizes = [208, 128], strides = [1, 1]} : vector<416x128xf32> to vector<208x128xf32>
      %65 = arith.maximumf %63, %64 : vector<208x128xf32>
      %66 = arith.maximumf %54, %65 : vector<208x128xf32>
      %c0_55 = arith.constant 0 : index
      %c0_56 = arith.constant 0 : index
      %67 = vector.load %arg3[%c0_55, %c0_56] : memref<208x1xf32, #tpu.memory_space<vmem>>, vector<208x1xf32>
      %68 = vector.broadcast %67 : vector<208x1xf32> to vector<208x128xf32>
      %69 = arith.addf %66, %68 : vector<208x128xf32>
      %cst_57 = arith.constant 0.000000e+00 : f32
      %70 = vector.broadcast %cst_57 : f32 to vector<208x128xf32>
      %71 = arith.maximumf %69, %70 : vector<208x128xf32>
      %c208_i32 = arith.constant 208 : i32
      %72 = arith.muli %arg16, %c208_i32 : i32
      %73 = tpu.assume_multiple %72, 16 : i32
      %74 = arith.index_cast %73 : i32 to index
      %c0_58 = arith.constant 0 : index
      %75 = vector.load %arg13[%74, %c0_58] : memref<2704x128xf32, #tpu.memory_space<vmem>>, vector<208x128xf32>
      tpu.vector_store %arg13[%74, %c0_58], %71 {strides = array<i32>} : memref<2704x128xf32, #tpu.memory_space<vmem>>, vector<208x128xf32>,
    }
    %c13_i32_0 = arith.constant 13 : i32
    %c0_i32_1 = arith.constant 0 : i32
    %c5_i32 = arith.constant 5 : i32
    %1 = arith.addi %c0_i32_1, %c5_i32 : i32
    %c1_i32_2 = arith.constant 1 : i32
    scf.for %arg16 = %c0_i32_1 to %1 step %c1_i32_2  : i32 {
      %c2_i32 = arith.constant 2 : i32
      %45 = arith.muli %c2_i32, %arg16 : i32
      %c208_i32 = arith.constant 208 : i32
      %46 = arith.muli %45, %c208_i32 : i32
      %47 = tpu.assume_multiple %46, 16 : i32
      %48 = arith.index_cast %47 : i32 to index
      %c0_44 = arith.constant 0 : index
      %49 = vector.load %arg13[%48, %c0_44] : memref<2704x128xf32, #tpu.memory_space<vmem>>, vector<832x128xf32>
      %c0_45 = arith.constant 0 : index
      %c0_46 = arith.constant 0 : index
      %50 = vector.load %arg4[%c0_45, %c0_46] : memref<240x832xf32, #tpu.memory_space<vmem>>, vector<240x832xf32>
      %cst_47 = arith.constant dense<0.000000e+00> : vector<240x128xf32>
      %51 = tpu.matmul %50, %49, %cst_47 {dimension_numbers = #tpu.dot_dimension_numbers<[1], [0], [0], [1], [0, 0, 1, 1], [], []>} : vector<240x832xf32>, vector<832x128xf32>, vector<240x128xf32> -> vector<240x128xf32>
      %52 = vector.extract_strided_slice %51 {offsets = [0, 0], sizes = [120, 128], strides = [1, 1]} : vector<240x128xf32> to vector<120x128xf32>
      %53 = vector.extract_strided_slice %51 {offsets = [120, 0], sizes = [120, 128], strides = [1, 1]} : vector<240x128xf32> to vector<120x128xf32>
      %54 = arith.maximumf %52, %53 : vector<120x128xf32>
      %c2_i32_48 = arith.constant 2 : i32
      %55 = arith.muli %c2_i32_48, %arg16 : i32
      %c1_i32_49 = arith.constant 1 : i32
      %56 = arith.addi %55, %c1_i32_49 : i32
      %c208_i32_50 = arith.constant 208 : i32
      %57 = arith.muli %56, %c208_i32_50 : i32
      %58 = tpu.assume_multiple %57, 16 : i32
      %59 = arith.index_cast %58 : i32 to index
      %c0_51 = arith.constant 0 : index
      %60 = vector.load %arg13[%59, %c0_51] : memref<2704x128xf32, #tpu.memory_space<vmem>>, vector<832x128xf32>
      %c0_52 = arith.constant 0 : index
      %c0_53 = arith.constant 0 : index
      %61 = vector.load %arg4[%c0_52, %c0_53] : memref<240x832xf32, #tpu.memory_space<vmem>>, vector<240x832xf32>
      %cst_54 = arith.constant dense<0.000000e+00> : vector<240x128xf32>
      %62 = tpu.matmul %61, %60, %cst_54 {dimension_numbers = #tpu.dot_dimension_numbers<[1], [0], [0], [1], [0, 0, 1, 1], [], []>} : vector<240x832xf32>, vector<832x128xf32>, vector<240x128xf32> -> vector<240x128xf32>
      %63 = vector.extract_strided_slice %62 {offsets = [0, 0], sizes = [120, 128], strides = [1, 1]} : vector<240x128xf32> to vector<120x128xf32>
      %64 = vector.extract_strided_slice %62 {offsets = [120, 0], sizes = [120, 128], strides = [1, 1]} : vector<240x128xf32> to vector<120x128xf32>
      %65 = arith.maximumf %63, %64 : vector<120x128xf32>
      %66 = arith.maximumf %54, %65 : vector<120x128xf32>
      %c0_55 = arith.constant 0 : index
      %c0_56 = arith.constant 0 : index
      %67 = vector.load %arg5[%c0_55, %c0_56] : memref<120x1xf32, #tpu.memory_space<vmem>>, vector<120x1xf32>
      %68 = vector.broadcast %67 : vector<120x1xf32> to vector<120x128xf32>
      %69 = arith.addf %66, %68 : vector<120x128xf32>
      %cst_57 = arith.constant 0.000000e+00 : f32
      %70 = vector.broadcast %cst_57 : f32 to vector<120x128xf32>
      %71 = arith.maximumf %69, %70 : vector<120x128xf32>
      %c120_i32 = arith.constant 120 : i32
      %72 = arith.muli %arg16, %c120_i32 : i32
      %73 = tpu.assume_multiple %72, 8 : i32
      %74 = arith.index_cast %73 : i32 to index
      %c0_58 = arith.constant 0 : index
      %75 = vector.load %arg14[%74, %c0_58] : memref<600x128xf32, #tpu.memory_space<vmem>>, vector<120x128xf32>
      tpu.vector_store %arg14[%74, %c0_58], %71 {strides = array<i32>} : memref<600x128xf32, #tpu.memory_space<vmem>>, vector<120x128xf32>,
    }
    %c5_i32_3 = arith.constant 5 : i32
    %c0 = arith.constant 0 : index
    %c0_4 = arith.constant 0 : index
    %2 = vector.load %arg14[%c0, %c0_4] : memref<600x128xf32, #tpu.memory_space<vmem>>, vector<360x128xf32>
    %c0_5 = arith.constant 0 : index
    %c0_6 = arith.constant 0 : index
    %3 = vector.load %arg6[%c0_5, %c0_6] : memref<48x360xf32, #tpu.memory_space<vmem>>, vector<48x360xf32>
    %cst = arith.constant dense<0.000000e+00> : vector<48x128xf32>
    %4 = tpu.matmul %3, %2, %cst {dimension_numbers = #tpu.dot_dimension_numbers<[1], [0], [0], [1], [0, 0, 1, 1], [], []>} : vector<48x360xf32>, vector<360x128xf32>, vector<48x128xf32> -> vector<48x128xf32>
    %c0_7 = arith.constant 0 : index
    %c0_8 = arith.constant 0 : index
    %5 = vector.load %arg7[%c0_7, %c0_8] : memref<48x1xf32, #tpu.memory_space<vmem>>, vector<48x1xf32>
    %6 = vector.broadcast %5 : vector<48x1xf32> to vector<48x128xf32>
    %7 = arith.addf %4, %6 : vector<48x128xf32>
    %cst_9 = arith.constant 0.000000e+00 : f32
    %8 = vector.broadcast %cst_9 : f32 to vector<48x128xf32>
    %9 = arith.maximumf %7, %8 : vector<48x128xf32>
    %c0_10 = arith.constant 0 : index
    %c0_11 = arith.constant 0 : index
    %10 = vector.load %arg15[%c0_10, %c0_11] : memref<144x128xf32, #tpu.memory_space<vmem>>, vector<48x128xf32>
    tpu.vector_store %arg15[%c0_10, %c0_11], %9 {strides = array<i32>} : memref<144x128xf32, #tpu.memory_space<vmem>>, vector<48x128xf32>,
    %c120 = arith.constant 120 : index
    %c0_12 = arith.constant 0 : index
    %11 = vector.load %arg14[%c120, %c0_12] : memref<600x128xf32, #tpu.memory_space<vmem>>, vector<360x128xf32>
    %c0_13 = arith.constant 0 : index
    %c0_14 = arith.constant 0 : index
    %12 = vector.load %arg6[%c0_13, %c0_14] : memref<48x360xf32, #tpu.memory_space<vmem>>, vector<48x360xf32>
    %cst_15 = arith.constant dense<0.000000e+00> : vector<48x128xf32>
    %13 = tpu.matmul %12, %11, %cst_15 {dimension_numbers = #tpu.dot_dimension_numbers<[1], [0], [0], [1], [0, 0, 1, 1], [], []>} : vector<48x360xf32>, vector<360x128xf32>, vector<48x128xf32> -> vector<48x128xf32>
    %c0_16 = arith.constant 0 : index
    %c0_17 = arith.constant 0 : index
    %14 = vector.load %arg7[%c0_16, %c0_17] : memref<48x1xf32, #tpu.memory_space<vmem>>, vector<48x1xf32>
    %15 = vector.broadcast %14 : vector<48x1xf32> to vector<48x128xf32>
    %16 = arith.addf %13, %15 : vector<48x128xf32>
    %cst_18 = arith.constant 0.000000e+00 : f32
    %17 = vector.broadcast %cst_18 : f32 to vector<48x128xf32>
    %18 = arith.maximumf %16, %17 : vector<48x128xf32>
    %c48 = arith.constant 48 : index
    %c0_19 = arith.constant 0 : index
    %19 = vector.load %arg15[%c48, %c0_19] : memref<144x128xf32, #tpu.memory_space<vmem>>, vector<48x128xf32>
    tpu.vector_store %arg15[%c48, %c0_19], %18 {strides = array<i32>} : memref<144x128xf32, #tpu.memory_space<vmem>>, vector<48x128xf32>,
    %c240 = arith.constant 240 : index
    %c0_20 = arith.constant 0 : index
    %20 = vector.load %arg14[%c240, %c0_20] : memref<600x128xf32, #tpu.memory_space<vmem>>, vector<360x128xf32>
    %c0_21 = arith.constant 0 : index
    %c0_22 = arith.constant 0 : index
    %21 = vector.load %arg6[%c0_21, %c0_22] : memref<48x360xf32, #tpu.memory_space<vmem>>, vector<48x360xf32>
    %cst_23 = arith.constant dense<0.000000e+00> : vector<48x128xf32>
    %22 = tpu.matmul %21, %20, %cst_23 {dimension_numbers = #tpu.dot_dimension_numbers<[1], [0], [0], [1], [0, 0, 1, 1], [], []>} : vector<48x360xf32>, vector<360x128xf32>, vector<48x128xf32> -> vector<48x128xf32>
    %c0_24 = arith.constant 0 : index
    %c0_25 = arith.constant 0 : index
    %23 = vector.load %arg7[%c0_24, %c0_25] : memref<48x1xf32, #tpu.memory_space<vmem>>, vector<48x1xf32>
    %24 = vector.broadcast %23 : vector<48x1xf32> to vector<48x128xf32>
    %25 = arith.addf %22, %24 : vector<48x128xf32>
    %cst_26 = arith.constant 0.000000e+00 : f32
    %26 = vector.broadcast %cst_26 : f32 to vector<48x128xf32>
    %27 = arith.maximumf %25, %26 : vector<48x128xf32>
    %c96 = arith.constant 96 : index
    %c0_27 = arith.constant 0 : index
    %28 = vector.load %arg15[%c96, %c0_27] : memref<144x128xf32, #tpu.memory_space<vmem>>, vector<48x128xf32>
    tpu.vector_store %arg15[%c96, %c0_27], %27 {strides = array<i32>} : memref<144x128xf32, #tpu.memory_space<vmem>>, vector<48x128xf32>,
    %c0_28 = arith.constant 0 : index
    %c0_29 = arith.constant 0 : index
    %29 = vector.load %arg8[%c0_28, %c0_29] : memref<40x144xf32, #tpu.memory_space<vmem>>, vector<40x144xf32>
    %c0_30 = arith.constant 0 : index
    %c0_31 = arith.constant 0 : index
    %30 = vector.load %arg15[%c0_30, %c0_31] : memref<144x128xf32, #tpu.memory_space<vmem>>, vector<144x128xf32>
    %cst_32 = arith.constant dense<0.000000e+00> : vector<40x128xf32>
    %31 = tpu.matmul %29, %30, %cst_32 {dimension_numbers = #tpu.dot_dimension_numbers<[1], [0], [0], [1], [0, 0, 1, 1], [], []>} : vector<40x144xf32>, vector<144x128xf32>, vector<40x128xf32> -> vector<40x128xf32>
    %c0_33 = arith.constant 0 : index
    %c0_34 = arith.constant 0 : index
    %32 = vector.load %arg9[%c0_33, %c0_34] : memref<40x1xf32, #tpu.memory_space<vmem>>, vector<40x1xf32>
    %33 = vector.broadcast %32 : vector<40x1xf32> to vector<40x128xf32>
    %34 = arith.addf %31, %33 : vector<40x128xf32>
    %cst_35 = arith.constant 0.000000e+00 : f32
    %35 = vector.broadcast %cst_35 : f32 to vector<40x128xf32>
    %36 = arith.maximumf %34, %35 : vector<40x128xf32>
    %c0_36 = arith.constant 0 : index
    %c0_37 = arith.constant 0 : index
    %37 = vector.load %arg10[%c0_36, %c0_37] : memref<20x40xf32, #tpu.memory_space<vmem>>, vector<20x40xf32>
    %cst_38 = arith.constant dense<0.000000e+00> : vector<20x128xf32>
    %38 = tpu.matmul %37, %36, %cst_38 {dimension_numbers = #tpu.dot_dimension_numbers<[1], [0], [0], [1], [0, 0, 1, 1], [], []>} : vector<20x40xf32>, vector<40x128xf32>, vector<20x128xf32> -> vector<20x128xf32>
    %c0_39 = arith.constant 0 : index
    %c0_40 = arith.constant 0 : index
    %39 = vector.load %arg11[%c0_39, %c0_40] : memref<20x1xf32, #tpu.memory_space<vmem>>, vector<20x1xf32>
    %40 = vector.broadcast %39 : vector<20x1xf32> to vector<20x128xf32>
    %41 = arith.addf %38, %40 : vector<20x128xf32>
    %cst_41 = arith.constant 0.000000e+00 : f32
    %42 = vector.broadcast %cst_41 : f32 to vector<20x128xf32>
    %43 = arith.maximumf %41, %42 : vector<20x128xf32>
    %c0_42 = arith.constant 0 : index
    %c0_43 = arith.constant 0 : index
    %44 = vector.load %arg12[%c0_42, %c0_43] : memref<20x128xf32, #tpu.memory_space<vmem>>, vector<20x128xf32>
    tpu.vector_store %arg12[%c0_42, %c0_43], %43 {strides = array<i32>} : memref<20x128xf32, #tpu.memory_space<vmem>>, vector<20x128xf32>,
    return
  }
  func.func @transform_0(%arg0: i32) -> (i32, i32) {
    %c0_i32 = arith.constant 0 : i32
    %c0_i32_0 = arith.constant 0 : i32
    return %c0_i32, %arg0 : i32, i32
  }
  func.func @transform_1(%arg0: i32) -> (i32, i32) {
    %c0_i32 = arith.constant 0 : i32
    %c0_i32_0 = arith.constant 0 : i32
    %c0_i32_1 = arith.constant 0 : i32
    return %c0_i32, %c0_i32_0 : i32, i32
  }
  func.func @transform_2(%arg0: i32) -> (i32, i32) {
    %c0_i32 = arith.constant 0 : i32
    %c0_i32_0 = arith.constant 0 : i32
    %c0_i32_1 = arith.constant 0 : i32
    return %c0_i32, %c0_i32_0 : i32, i32
  }
  func.func @transform_3(%arg0: i32) -> (i32, i32) {
    %c0_i32 = arith.constant 0 : i32
    %c0_i32_0 = arith.constant 0 : i32
    %c0_i32_1 = arith.constant 0 : i32
    return %c0_i32, %c0_i32_0 : i32, i32
  }
  func.func @transform_4(%arg0: i32) -> (i32, i32) {
    %c0_i32 = arith.constant 0 : i32
    %c0_i32_0 = arith.constant 0 : i32
    %c0_i32_1 = arith.constant 0 : i32
    return %c0_i32, %c0_i32_0 : i32, i32
  }
  func.func @transform_5(%arg0: i32) -> (i32, i32) {
    %c0_i32 = arith.constant 0 : i32
    %c0_i32_0 = arith.constant 0 : i32
    %c0_i32_1 = arith.constant 0 : i32
    return %c0_i32, %c0_i32_0 : i32, i32
  }
  func.func @transform_6(%arg0: i32) -> (i32, i32) {
    %c0_i32 = arith.constant 0 : i32
    %c0_i32_0 = arith.constant 0 : i32
    %c0_i32_1 = arith.constant 0 : i32
    return %c0_i32, %c0_i32_0 : i32, i32
  }
  func.func @transform_7(%arg0: i32) -> (i32, i32) {
    %c0_i32 = arith.constant 0 : i32
    %c0_i32_0 = arith.constant 0 : i32
    %c0_i32_1 = arith.constant 0 : i32
    return %c0_i32, %c0_i32_0 : i32, i32
  }
  func.func @transform_8(%arg0: i32) -> (i32, i32) {
    %c0_i32 = arith.constant 0 : i32
    %c0_i32_0 = arith.constant 0 : i32
    %c0_i32_1 = arith.constant 0 : i32
    return %c0_i32, %c0_i32_0 : i32, i32
  }
  func.func @transform_9(%arg0: i32) -> (i32, i32) {
    %c0_i32 = arith.constant 0 : i32
    %c0_i32_0 = arith.constant 0 : i32
    %c0_i32_1 = arith.constant 0 : i32
    return %c0_i32, %c0_i32_0 : i32, i32
  }
  func.func @transform_10(%arg0: i32) -> (i32, i32) {
    %c0_i32 = arith.constant 0 : i32
    %c0_i32_0 = arith.constant 0 : i32
    %c0_i32_1 = arith.constant 0 : i32
    return %c0_i32, %c0_i32_0 : i32, i32
  }
  func.func @transform_11(%arg0: i32) -> (i32, i32) {
    %c0_i32 = arith.constant 0 : i32
    %c0_i32_0 = arith.constant 0 : i32
    return %c0_i32, %arg0 : i32, i32
  }
}

</mosaic_0001>

<bundles_post_ra>
// kernel: triple_mnist_focus_embedder.1
= control target key start
LH: loop header
LB: loop body
LE: loop exit
PB: predicated region body
PF: predicated region fallthrough
CT: control target
= control target key end

     0   :  { %s6447_s17 = smov 0   ;;  %s10042_s0 = inlined_call_operand.vmem [shape: f32[896,128], index: 0, kind: input, shape index: {}]   ;;  %s10043_s1 = inlined_call_operand.vmem [shape: f32[416,96], index: 1, kind: input, shape index: {}]   ;;  %s10044_s2 = inlined_call_operand.vmem [shape: f32[208,1], index: 2, kind: input, shape index: {}]   ;;  %s10045_s3 = inlined_call_operand.vmem [shape: f32[240,832], index: 3, kind: input, shape index: {}]   ;;  %s10046_s4 = inlined_call_operand.vmem [shape: f32[120,1], index: 4, kind: input, shape index: {}]   ;;  %s10047_s5 = inlined_call_operand.vmem [shape: f32[48,360], index: 5, kind: input, shape index: {}]   ;;  %s10048_s6 = inlined_call_operand.vmem [shape: f32[48,1], index: 6, kind: input, shape index: {}]   ;;  %s10049_s7 = inlined_call_operand.vmem [shape: f32[40,144], index: 7, kind: input, shape index: {}]   ;;  %s10050_s8 = inlined_call_operand.vmem [shape: f32[40,1], index: 8, kind: input, shape index: {}]   ;;  %s10051_s9 = inlined_call_operand.vmem [shape: f32[20,40], index: 9, kind: input, shape index: {}]   ;;  %s10052_s10 = inlined_call_operand.vmem [shape: f32[20,1], index: 10, kind: input, shape index: {}]   ;;  %s10053_s11 = inlined_call_operand.vmem [shape: f32[20,128], index: 11, kind: output, shape index: {}]  }
   0x1 LB: > { %v58_v0 = vld [vmem:[%s10043_s1] sm:$0xff]  ;;  %vm110_vm0 = vcmask 785408   ;;  %s4944_s20 = sshll.u32 %s6375_s17, 6  ;;  %v6381_v1 = vmov 0   ;;  %v59_v18 = vld [vmem:[%s10043_s1 + $0x8] sm:$0xff]  ;;  %v60_v19 = vld [vmem:[%s10043_s1 + $0x10] sm:$0xff]  ;;  %s6375_s17 = sphi %s6447_s17, %s43_s17  }
   0x2   : > { %5699 = vmatprep.mubr.msk.f32.mxu0 %vm110_vm0, %v58_v0  ;;  %5801 = vmatprep.mubr.msk.f32.mxu1 %vm110_vm0, %v58_v0  ;;  %s6461_s23 = scalar_lea.vmem %s10042_s0, %s4944_s20  ;;  %v1013_v20 = vld [vmem:[%s10044_s2 + $0x10] sm:$0xff]  ;;  %v1011_v21 = vld [vmem:[%s10044_s2] sm:$0xff]  ;;  %v61_v22 = vld [vmem:[%s10043_s1 + $0x18] sm:$0xff]  ;;  %s1219_s15 = smul.u32 208, %s6375_s17 }
   0x3   : > { %6148 = vset.pattern.permute.xlu1 %v6381_v1  ;;  %6147 = vset.pattern.permute.xlu0 %v6381_v1  ;;  %v57_v2 = vld [vmem:[%s6461_s23 + $0x58] sm:$0xff]  ;;  %v56_v4 = vld [vmem:[%s6461_s23 + $0x50] sm:$0xff]  ;;  %v55_v6 = vld [vmem:[%s6461_s23 + $0x48] sm:$0xff]  ;;  %s43_s17 = sadd.s32 1, %s6375_s17  }
   0x4   : > { %v5010_v3 = vld [vmem:[%s6461_s23 + $0x78] sm:$0xff]  ;;  %5675 = vmatprep.subr.mxu0 %v57_v2  ;;  %v5009_v5 = vld [vmem:[%s6461_s23 + $0x70] sm:$0xff]  ;;  %v5008_v7 = vld [vmem:[%s6461_s23 + $0x68] sm:$0xff]  ;;  %1049 = vperm.xlu1 %6148, %v1013_v20   ;;  %s6939_s16 = scalar_lea.vmem [#allocation2], %s1219_s15  ;;  %p40_p0 = scmp.ge.s32.totalorder %s43_s17, 13  }
   0x5   : > { %5777 = vmatprep.subr.mxu1 %v5010_v3  ;;  %5676 = vmatpush3.msra.mxu0 %v57_v2  ;;  %v54_v8 = vld [vmem:[%s6461_s23 + $0x40] sm:$0xff]  ;;  %v53_v10 = vld [vmem:[%s6461_s23 + $0x38] sm:$0xff]  ;;  %v52_v11 = vld [vmem:[%s6461_s23 + $0x30] sm:$0xff]  ;;  %s7027_s18 = smov (%p40_p0), 0  }
   0x6   : > { %5778 = vmatpush3.msra.mxu1 %v5010_v3  ;;  %5677 = vmatprep.subr.mxu0 %v56_v4  ;;  %v5007_v9 = vld [vmem:[%s6461_s23 + $0x60] sm:$0xff]  ;;  %v51_v12 = vld [vmem:[%s6461_s23 + $0x28] sm:$0xff]  ;;  %v49_v14 = vld [vmem:[%s6461_s23 + $0x18] sm:$0xff] }
   0x7   : > { %5779 = vmatprep.subr.mxu1 %v5009_v5  ;;  %5678 = vmatpush3.msra.mxu0 %v56_v4  ;;  %v50_v13 = vld [vmem:[%s6461_s23 + $0x20] sm:$0xff]  ;;  %v48_v15 = vld [vmem:[%s6461_s23 + $0x10] sm:$0xff]  ;;  %v47_v16 = vld [vmem:[%s6461_s23 + $0x8] sm:$0xff] }
   0x8   : > { %5780 = vmatpush3.msra.mxu1 %v5009_v5  ;;  %5679 = vmatprep.subr.mxu0 %v55_v6  ;;  %v46_v17 = vld [vmem:[%s6461_s23] sm:$0xff]  ;;  %v1014_v24 = vld [vmem:[%s10044_s2 + $0x18] sm:$0xff]  ;;  %v1012_v25 = vld [vmem:[%s10044_s2 + $0x8] sm:$0xff] }
   0x9   : > { %5781 = vmatprep.subr.mxu1 %v5008_v7  ;;  %5680 = vmatpush3.msra.mxu0 %v55_v6  ;;  %v62_v23 = vld [vmem:[%s10043_s1 + $0x20] sm:$0xff]  ;;  %v63_v26 = vld [vmem:[%s10043_s1 + $0x28] sm:$0xff]  ;;  %v64_v27 = vld [vmem:[%s10043_s1 + $0x30] sm:$0xff] }
   0xa   : > { %5782 = vmatpush3.msra.mxu1 %v5008_v7  ;;  %5681 = vmatprep.subr.mxu0 %v54_v8  ;;  %v1016_v28 = vld [vmem:[%s10044_s2 + $0x28] sm:$0xff]  ;;  %v1015_v29 = vld [vmem:[%s10044_s2 + $0x20] sm:$0xff]  ;;  %v65_v30 = vld [vmem:[%s10043_s1 + $0x38] sm:$0xff] }
   0xb   : > { %5783 = vmatprep.subr.mxu1 %v5007_v9  ;;  %5682 = vmatpush3.msra.mxu0 %v54_v8  ;;  %v66_v31 = vld [vmem:[%s10043_s1 + $0x40] sm:$0xff]  ;;  %v1018_v32 = vld [vmem:[%s10044_s2 + $0x38] sm:$0xff]  ;;  %v1017_v33 = vld [vmem:[%s10044_s2 + $0x30] sm:$0xff] }
   0xc   : > { %5784 = vmatpush3.msra.mxu1 %v5007_v9  ;;  %5683 = vmatprep.subr.mxu0 %v53_v10  ;;  %v67_v34 = vld [vmem:[%s10043_s1 + $0x48] sm:$0xff]  ;;  %v68_v35 = vld [vmem:[%s10043_s1 + $0x50] sm:$0xff]  ;;  %v1019_v37 = vld [vmem:[%s10044_s2 + $0x40] sm:$0xff] }
   0xd   : > { %5785 = vmatprep.subr.mxu1 %v57_v2  ;;  %5684 = vmatpush3.msra.mxu0 %v53_v10  ;;  %v1020_v36 = vld [vmem:[%s10044_s2 + $0x48] sm:$0xff]  ;;  %v69_v38 = vld [vmem:[%s10043_s1 + $0x58] sm:$0xff]  ;;  %v70_v39 = vld [vmem:[%s10043_s1 + $0x60] sm:$0xff] }
   0xe   : > { %5786 = vmatpush3.msra.mxu1 %v57_v2  ;;  %5685 = vmatprep.subr.mxu0 %v52_v11  ;;  %v1022_v40 = vld [vmem:[%s10044_s2 + $0x58] sm:$0xff]  ;;  %v1021_v41 = vld [vmem:[%s10044_s2 + $0x50] sm:$0xff]  ;;  %v71_v42 = vld [vmem:[%s10043_s1 + $0x68] sm:$0xff] }
   0xf   : > { %5787 = vmatprep.subr.mxu1 %v56_v4  ;;  %5686 = vmatpush3.msra.mxu0 %v52_v11  ;;  %v72_v43 = vld [vmem:[%s10043_s1 + $0x70] sm:$0xff]  ;;  %v1024_v44 = vld [vmem:[%s10044_s2 + $0x68] sm:$0xff]  ;;  %v1023_v45 = vld [vmem:[%s10044_s2 + $0x60] sm:$0xff] }
  0x10   : > { %5788 = vmatpush3.msra.mxu1 %v56_v4  ;;  %5687 = vmatprep.subr.mxu0 %v51_v12  ;;  %v73_v46 = vld [vmem:[%s10043_s1 + $0x78] sm:$0xff]  ;;  %v74_v47 = vld [vmem:[%s10043_s1 + $0x80] sm:$0xff]  ;;  %v1025_v49 = vld [vmem:[%s10044_s2 + $0x70] sm:$0xff] }
  0x11   : > { %5789 = vmatprep.subr.mxu1 %v55_v6  ;;  %5688 = vmatpush3.msra.mxu0 %v51_v12  ;;  %v1026_v48 = vld [vmem:[%s10044_s2 + $0x78] sm:$0xff]  ;;  %v75_v50 = vld [vmem:[%s10043_s1 + $0x88] sm:$0xff]  ;;  %v76_v51 = vld [vmem:[%s10043_s1 + $0x90] sm:$0xff] }
  0x12   : > { %5790 = vmatpush3.msra.mxu1 %v55_v6  ;;  %5689 = vmatprep.subr.mxu0 %v50_v13  ;;  %v1028_v52 = vld [vmem:[%s10044_s2 + $0x88] sm:$0xff]  ;;  %v1027_v53 = vld [vmem:[%s10044_s2 + $0x80] sm:$0xff]  ;;  %v77_v54 = vld [vmem:[%s10043_s1 + $0x98] sm:$0xff] }
  0x13   : > { %5791 = vmatprep.subr.mxu1 %v54_v8  ;;  %5690 = vmatpush3.msra.mxu0 %v50_v13  ;;  %v78_v55 = vld [vmem:[%s10043_s1 + $0xa0] sm:$0xff]  ;;  %v1030_v56 = vld [vmem:[%s10044_s2 + $0x98] sm:$0xff]  ;;  %v1029_v57 = vld [vmem:[%s10044_s2 + $0x90] sm:$0xff] }
  0x14   : > { %5792 = vmatpush3.msra.mxu1 %v54_v8  ;;  %5691 = vmatprep.subr.mxu0 %v49_v14  ;;  %v79_v58 = vld [vmem:[%s10043_s1 + $0xa8] sm:$0xff]  ;;  %v80_v59 = vld [vmem:[%s10043_s1 + $0xb0] sm:$0xff]  ;;  %v1031_v61 = vld [vmem:[%s10044_s2 + $0xa0] sm:$0xff] }
  0x15   : > { %5793 = vmatprep.subr.mxu1 %v53_v10  ;;  %5692 = vmatpush3.msra.mxu0 %v49_v14  ;;  %v1032_v60 = vld [vmem:[%s10044_s2 + $0xa8] sm:$0xff]  ;;  %v81_v62 = vld [vmem:[%s10043_s1 + $0xb8] sm:$0xff]  ;;  %v82_v63 = vld [vmem:[%s10043_s1 + $0xc0] sm:$0xff] }
  0x16   : > { %5794 = vmatpush3.msra.mxu1 %v53_v10  ;;  %5693 = vmatprep.subr.mxu0 %v48_v15  ;;  %v1034_v0 = vld [vmem:[%s10044_s2 + $0xb8] sm:$0xff]  ;;  %v1033_v1 = vld [vmem:[%s10044_s2 + $0xb0] sm:$0xff]  ;;  %v83_v2 = vld [vmem:[%s10043_s1 + $0xc8] sm:$0xff] }
  0x17   : > { %5795 = vmatprep.subr.mxu1 %v52_v11  ;;  %5694 = vmatpush3.msra.mxu0 %v48_v15  ;;  %v84_v3 = vld [vmem:[%s10043_s1 + $0xd0] sm:$0xff]  ;;  %v1036_v4 = vld [vmem:[%s10044_s2 + $0xc8] sm:$0xff]  ;;  %v1035_v5 = vld [vmem:[%s10044_s2 + $0xc0] sm:$0xff] }
  0x18   : > { %5796 = vmatpush3.msra.mxu1 %v52_v11  ;;  %5695 = vmatprep.subr.mxu0 %v47_v16  ;;  %v85_v6 = vld [vmem:[%s10043_s1 + $0xd8] sm:$0xff]  ;;  %v86_v7 = vld [vmem:[%s10043_s1 + $0xe0] sm:$0xff]  ;;  %v87_v8 = vld [vmem:[%s10043_s1 + $0xe8] sm:$0xff] }
  0x19   : > { %5797 = vmatprep.subr.mxu1 %v51_v12  ;;  %5696 = vmatpush3.msra.mxu0 %v47_v16  ;;  %v88_v9 = vld [vmem:[%s10043_s1 + $0xf0] sm:$0xff]  ;;  %v89_v10 = vld [vmem:[%s10043_s1 + $0xf8] sm:$0xff]  ;;  %v90_v11 = vld [vmem:[%s10043_s1 + $0x100] sm:$0xff] }
  0x1a   : > { %5798 = vmatpush3.msra.mxu1 %v51_v12  ;;  %5697 = vmatprep.subr.mxu0 %v46_v17  ;;  %v91_v12 = vld [vmem:[%s10043_s1 + $0x108] sm:$0xff]  ;;  %v93_v14 = vld [vmem:[%s10043_s1 + $0x118] sm:$0xff]  ;;  %v94_v15 = vld [vmem:[%s10043_s1 + $0x120] sm:$0xff] }
  0x1b   : > { %5799 = vmatprep.subr.mxu1 %v50_v13  ;;  %5698 = vmatpush3.msra.mxu0 %v46_v17  ;;  %v95_v16 = vld [vmem:[%s10043_s1 + $0x128] sm:$0xff]  ;;  %v96_v17 = vld [vmem:[%s10043_s1 + $0x130] sm:$0xff] }
  0x1c   : > { %5800 = vmatpush3.msra.mxu1 %v50_v13  ;;  %5700 = vmatmul.mubr.msk.f32.vlgmr.msra.gmra.mxu0 %vm110_vm0, %v59_v18  ;;  %v92_v13 = vld [vmem:[%s10043_s1 + $0x110] sm:$0xff]  ;;  %v99_v20 = vld [vmem:[%s10043_s1 + $0x148] sm:$0xff] }
  0x1d   : > { %5802 = vmatmul.mubr.msk.f32.vlgmr.msra.gmra.mxu1 %vm110_vm0, %v59_v18  ;;  %5702 = vmatprep.mubr.msk.f32.mxu0 %vm110_vm0, %v60_v19  ;;  %v97_v18 = vld [vmem:[%s10043_s1 + $0x138] sm:$0xff] }
  0x1e   : > { %5804 = vmatprep.mubr.msk.f32.mxu1 %vm110_vm0, %v60_v19  ;;  %1039 = vperm.xlu0 %6147, %v1011_v21   ;;  %v98_v19 = vld [vmem:[%s10043_s1 + $0x140] sm:$0xff]  ;;  %v100_v21 = vld [vmem:[%s10043_s1 + $0x150] sm:$0xff] }
  0x1f   : > { %1054 = vperm.xlu1 %6148, %v1014_v24   ;;  %v103_v24 = vld [vmem:[%s10043_s1 + $0x168] sm:$0xff] }
  0x20   : > { %5703 = vmatmul.mubr.msk.f32.gmra.mxu0 %vm110_vm0, %v61_v22 }
  0x21   : > { %5805 = vmatmul.mubr.msk.f32.gmra.mxu1 %vm110_vm0, %v61_v22  ;;  %5705 = vmatprep.mubr.msk.f32.mxu0 %vm110_vm0, %v62_v23  ;;  %v101_v22 = vld [vmem:[%s10043_s1 + $0x158] sm:$0xff] }
  0x22   : > { %5807 = vmatprep.mubr.msk.f32.mxu1 %vm110_vm0, %v62_v23  ;;  %1044 = vperm.xlu0 %6147, %v1012_v25   ;;  %v102_v23 = vld [vmem:[%s10043_s1 + $0x160] sm:$0xff]  ;;  %v104_v25 = vld [vmem:[%s10043_s1 + $0x170] sm:$0xff] }
  0x23   : > { %1064 = vperm.xlu1 %6148, %v1016_v28   ;;  %v107_v28 = vld [vmem:[%s10043_s1 + $0x188] sm:$0xff] }
  0x24   : > { %5706 = vmatmul.mubr.msk.f32.gmra.mxu0 %vm110_vm0, %v63_v26 }
  0x25   : > { %5808 = vmatmul.mubr.msk.f32.gmra.mxu1 %vm110_vm0, %v63_v26  ;;  %5708 = vmatprep.mubr.msk.f32.mxu0 %vm110_vm0, %v64_v27  ;;  %v105_v26 = vld [vmem:[%s10043_s1 + $0x178] sm:$0xff] }
  0x26   : > { %5810 = vmatprep.mubr.msk.f32.mxu1 %vm110_vm0, %v64_v27  ;;  %1059 = vperm.xlu0 %6147, %v1015_v29   ;;  %v106_v27 = vld [vmem:[%s10043_s1 + $0x180] sm:$0xff]  ;;  %v108_v29 = vld [vmem:[%s10043_s1 + $0x190] sm:$0xff] }
  0x27   : > { %1074 = vperm.xlu1 %6148, %v1018_v32  }
  0x28   : > { %5709 = vmatmul.mubr.msk.f32.gmra.mxu0 %vm110_vm0, %v65_v30 }
  0x29   : > { %5811 = vmatmul.mubr.msk.f32.gmra.mxu1 %vm110_vm0, %v65_v30  ;;  %5711 = vmatprep.mubr.msk.f32.mxu0 %vm110_vm0, %v66_v31  ;;  %v109_v30 = vld [vmem:[%s10043_s1 + $0x198] sm:$0xff] }
  0x2a   : > { %5813 = vmatprep.mubr.msk.f32.mxu1 %vm110_vm0, %v66_v31  ;;  %1069 = vperm.xlu0 %6147, %v1017_v33  }
  0x2b   : > { %1084 = vperm.xlu1 %6148, %v1020_v36  }
  0x2c   : > { %5712 = vmatmul.mubr.msk.f32.gmra.mxu0 %vm110_vm0, %v67_v34 }
  0x2d   : > { %5814 = vmatmul.mubr.msk.f32.gmra.mxu1 %vm110_vm0, %v67_v34  ;;  %5714 = vmatprep.mubr.msk.f32.mxu0 %vm110_vm0, %v68_v35 }
  0x2e   : > { %5816 = vmatprep.mubr.msk.f32.mxu1 %vm110_vm0, %v68_v35  ;;  %1079 = vperm.xlu0 %6147, %v1019_v37  }
  0x2f   : > { %1094 = vperm.xlu1 %6148, %v1022_v40  }
  0x30   : > { %5715 = vmatmul.mubr.msk.f32.gmra.mxu0 %vm110_vm0, %v69_v38 }
  0x31   : > { %5817 = vmatmul.mubr.msk.f32.gmra.mxu1 %vm110_vm0, %v69_v38  ;;  %5717 = vmatprep.mubr.msk.f32.mxu0 %vm110_vm0, %v70_v39 }
  0x32   : > { %5819 = vmatprep.mubr.msk.f32.mxu1 %vm110_vm0, %v70_v39  ;;  %1089 = vperm.xlu0 %6147, %v1021_v41  }
  0x33   : > { %1104 = vperm.xlu1 %6148, %v1024_v44  }
  0x34   : > { %5718 = vmatmul.mubr.msk.f32.gmra.mxu0 %vm110_vm0, %v71_v42 }
  0x35   : > { %5820 = vmatmul.mubr.msk.f32.gmra.mxu1 %vm110_vm0, %v71_v42  ;;  %5720 = vmatprep.mubr.msk.f32.mxu0 %vm110_vm0, %v72_v43 }
  0x36   : > { %5822 = vmatprep.mubr.msk.f32.mxu1 %vm110_vm0, %v72_v43  ;;  %1099 = vperm.xlu0 %6147, %v1023_v45  }
  0x37   : > { %1114 = vperm.xlu1 %6148, %v1026_v48  }
  0x38   : > { %5721 = vmatmul.mubr.msk.f32.gmra.mxu0 %vm110_vm0, %v73_v46 }
  0x39   : > { %5823 = vmatmul.mubr.msk.f32.gmra.mxu1 %vm110_vm0, %v73_v46  ;;  %5723 = vmatprep.mubr.msk.f32.mxu0 %vm110_vm0, %v74_v47 }
  0x3a   : > { %5825 = vmatprep.mubr.msk.f32.mxu1 %vm110_vm0, %v74_v47  ;;  %1109 = vperm.xlu0 %6147, %v1025_v49  }
  0x3b   : > { %1124 = vperm.xlu1 %6148, %v1028_v52  }
  0x3c   : > { %5724 = vmatmul.mubr.msk.f32.gmra.mxu0 %vm110_vm0, %v75_v50 }
  0x3d   : > { %5826 = vmatmul.mubr.msk.f32.gmra.mxu1 %vm110_vm0, %v75_v50  ;;  %5726 = vmatprep.mubr.msk.f32.mxu0 %vm110_vm0, %v76_v51 }
  0x3e   : > { %5828 = vmatprep.mubr.msk.f32.mxu1 %vm110_vm0, %v76_v51  ;;  %1119 = vperm.xlu0 %6147, %v1027_v53  }
  0x3f   : > { %1134 = vperm.xlu1 %6148, %v1030_v56  }
  0x40   : > { %5727 = vmatmul.mubr.msk.f32.gmra.mxu0 %vm110_vm0, %v77_v54 }
  0x41   : > { %5829 = vmatmul.mubr.msk.f32.gmra.mxu1 %vm110_vm0, %v77_v54  ;;  %5729 = vmatprep.mubr.msk.f32.mxu0 %vm110_vm0, %v78_v55 }
  0x42   : > { %5831 = vmatprep.mubr.msk.f32.mxu1 %vm110_vm0, %v78_v55  ;;  %1129 = vperm.xlu0 %6147, %v1029_v57  }
  0x43   : > { %1144 = vperm.xlu1 %6148, %v1032_v60  }
  0x44   : > { %5730 = vmatmul.mubr.msk.f32.gmra.mxu0 %vm110_vm0, %v79_v58 }
  0x45   : > { %5832 = vmatmul.mubr.msk.f32.gmra.mxu1 %vm110_vm0, %v79_v58  ;;  %5732 = vmatprep.mubr.msk.f32.mxu0 %vm110_vm0, %v80_v59 }
  0x46   : > { %5834 = vmatprep.mubr.msk.f32.mxu1 %vm110_vm0, %v80_v59  ;;  %1139 = vperm.xlu0 %6147, %v1031_v61  }
  0x47   : > { %1154 = vperm.xlu1 %6148, %v1034_v0  }
  0x48   : > { %5733 = vmatmul.mubr.msk.f32.gmra.mxu0 %vm110_vm0, %v81_v62 }
  0x49   : > { %5835 = vmatmul.mubr.msk.f32.gmra.mxu1 %vm110_vm0, %v81_v62  ;;  %5735 = vmatprep.mubr.msk.f32.mxu0 %vm110_vm0, %v82_v63 }
  0x4a   : > { %5837 = vmatprep.mubr.msk.f32.mxu1 %vm110_vm0, %v82_v63  ;;  %1149 = vperm.xlu0 %6147, %v1033_v1  }
  0x4b   : > { %1164 = vperm.xlu1 %6148, %v1036_v4  }
  0x4c   : > { %5736 = vmatmul.mubr.msk.f32.gmra.mxu0 %vm110_vm0, %v83_v2 }
  0x4d   : > { %5838 = vmatmul.mubr.msk.f32.gmra.mxu1 %vm110_vm0, %v83_v2  ;;  %5738 = vmatprep.mubr.msk.f32.mxu0 %vm110_vm0, %v84_v3 }
  0x4e   : > { %5840 = vmatprep.mubr.msk.f32.mxu1 %vm110_vm0, %v84_v3  ;;  %1159 = vperm.xlu0 %6147, %v1035_v5  }
  0x50   : > { %5739 = vmatmul.mubr.msk.f32.gmra.mxu0 %vm110_vm0, %v85_v6 }
  0x51   : > { %5841 = vmatmul.mubr.msk.f32.gmra.mxu1 %vm110_vm0, %v85_v6  ;;  %5741 = vmatprep.mubr.msk.f32.mxu0 %vm110_vm0, %v86_v7 }
  0x52   : > { %5843 = vmatprep.mubr.msk.f32.mxu1 %vm110_vm0, %v86_v7 }
  0x54   : > { %5742 = vmatmul.mubr.msk.f32.gmra.mxu0 %vm110_vm0, %v87_v8 }
  0x55   : > { %5844 = vmatmul.mubr.msk.f32.gmra.mxu1 %vm110_vm0, %v87_v8  ;;  %5744 = vmatprep.mubr.msk.f32.mxu0 %vm110_vm0, %v88_v9 }
  0x56   : > { %5846 = vmatprep.mubr.msk.f32.mxu1 %vm110_vm0, %v88_v9 }
  0x58   : > { %5745 = vmatmul.mubr.msk.f32.gmra.mxu0 %vm110_vm0, %v89_v10 }
  0x59   : > { %5847 = vmatmul.mubr.msk.f32.gmra.mxu1 %vm110_vm0, %v89_v10  ;;  %5747 = vmatprep.mubr.msk.f32.mxu0 %vm110_vm0, %v90_v11 }
  0x5a   : > { %5849 = vmatprep.mubr.msk.f32.mxu1 %vm110_vm0, %v90_v11 }
  0x5c   : > { %5748 = vmatmul.mubr.msk.f32.gmra.mxu0 %vm110_vm0, %v91_v12 }
  0x5d   : > { %5850 = vmatmul.mubr.msk.f32.gmra.mxu1 %vm110_vm0, %v91_v12  ;;  %5750 = vmatprep.mubr.msk.f32.mxu0 %vm110_vm0, %v92_v13 }
  0x5e   : > { %5852 = vmatprep.mubr.msk.f32.mxu1 %vm110_vm0, %v92_v13 }
  0x60   : > { %5751 = vmatmul.mubr.msk.f32.gmra.mxu0 %vm110_vm0, %v93_v14 }
  0x61   : > { %5853 = vmatmul.mubr.msk.f32.gmra.mxu1 %vm110_vm0, %v93_v14  ;;  %5753 = vmatprep.mubr.msk.f32.mxu0 %vm110_vm0, %v94_v15 }
  0x62   : > { %5855 = vmatprep.mubr.msk.f32.mxu1 %vm110_vm0, %v94_v15 }
  0x64   : > { %5754 = vmatmul.mubr.msk.f32.gmra.mxu0 %vm110_vm0, %v95_v16 }
  0x65   : > { %5856 = vmatmul.mubr.msk.f32.gmra.mxu1 %vm110_vm0, %v95_v16  ;;  %5756 = vmatprep.mubr.msk.f32.mxu0 %vm110_vm0, %v96_v17 }
  0x66   : > { %5858 = vmatprep.mubr.msk.f32.mxu1 %vm110_vm0, %v96_v17 }
  0x68   : > { %5757 = vmatmul.mubr.msk.f32.gmra.mxu0 %vm110_vm0, %v97_v18 }
  0x69   : > { %5859 = vmatmul.mubr.msk.f32.gmra.mxu1 %vm110_vm0, %v97_v18  ;;  %5759 = vmatprep.mubr.msk.f32.mxu0 %vm110_vm0, %v98_v19 }
  0x6a   : > { %5861 = vmatprep.mubr.msk.f32.mxu1 %vm110_vm0, %v98_v19 }
  0x6c   : > { %5760 = vmatmul.mubr.msk.f32.gmra.mxu0 %vm110_vm0, %v99_v20 }
  0x6d   : > { %5862 = vmatmul.mubr.msk.f32.gmra.mxu1 %vm110_vm0, %v99_v20  ;;  %5762 = vmatprep.mubr.msk.f32.mxu0 %vm110_vm0, %v100_v21 }
  0x6e   : > { %5864 = vmatprep.mubr.msk.f32.mxu1 %vm110_vm0, %v100_v21 }
  0x70   : > { %5763 = vmatmul.mubr.msk.f32.gmra.mxu0 %vm110_vm0, %v101_v22 }
  0x71   : > { %5865 = vmatmul.mubr.msk.f32.gmra.mxu1 %vm110_vm0, %v101_v22  ;;  %5765 = vmatprep.mubr.msk.f32.mxu0 %vm110_vm0, %v102_v23 }
  0x72   : > { %5867 = vmatprep.mubr.msk.f32.mxu1 %vm110_vm0, %v102_v23 }
  0x74   : > { %5766 = vmatmul.mubr.msk.f32.gmra.mxu0 %vm110_vm0, %v103_v24 }
  0x75   : > { %5868 = vmatmul.mubr.msk.f32.gmra.mxu1 %vm110_vm0, %v103_v24  ;;  %5768 = vmatprep.mubr.msk.f32.mxu0 %vm110_vm0, %v104_v25 }
  0x76   : > { %5870 = vmatprep.mubr.msk.f32.mxu1 %vm110_vm0, %v104_v25 }
  0x78   : > { %5769 = vmatmul.mubr.msk.f32.gmra.mxu0 %vm110_vm0, %v105_v26 }
  0x79   : > { %5871 = vmatmul.mubr.msk.f32.gmra.mxu1 %vm110_vm0, %v105_v26  ;;  %5771 = vmatprep.mubr.msk.f32.mxu0 %vm110_vm0, %v106_v27 }
  0x7a   : > { %5873 = vmatprep.mubr.msk.f32.mxu1 %vm110_vm0, %v106_v27 }
  0x7c   : > { %5772 = vmatmul.mubr.msk.f32.gmra.mxu0 %vm110_vm0, %v107_v28 }
  0x7d   : > { %5874 = vmatmul.mubr.msk.f32.gmra.mxu1 %vm110_vm0, %v107_v28  ;;  %5774 = vmatprep.mubr.msk.f32.mxu0 %vm110_vm0, %v108_v29 }
  0x7e   : > { %5876 = vmatprep.mubr.msk.f32.mxu1 %vm110_vm0, %v108_v29 }
  0x7f   : > { %v6876_v63 = vpop.permute.xlu1 %1049 }
  0x80   : > { %5775 = vmatmul.mubr.msk.f32.gmra.mxu0 %vm110_vm0, %v109_v30 }
  0x81   : > { %5877 = vmatmul.mubr.msk.f32.gmra.mxu1 %vm110_vm0, %v109_v30 }
  0x99   : > { %v1040_v2 = vpop.permute.xlu0 %1039 }
  0x9a   : > { %v1055_v7 = vpop.permute.xlu1 %1054 }
  0x9d   : > { %v1045_v10 = vpop.permute.xlu0 %1044 }
  0x9e   : > { %v1065_v15 = vpop.permute.xlu1 %1064 }
  0xa1   : > { %v6906_v18 = vpop.permute.xlu0 %1059 }
  0xa2   : > { %v6916_v23 = vpop.permute.xlu1 %1074 }
  0xa5   : > { %v6922_v26 = vpop.permute.xlu0 %1069 }
  0xdc   : > { %v6812_v31 = vpop.f32.mrf.mxu0 }
  0xdd   : > { %v6814_v32 = vpop.f32.mrf.mxu1 }
  0xde   : > { %v6816_v33 = vpop.f32.mrf.mxu0 }
  0xdf   : > { %v6818_v34 = vpop.f32.mrf.mxu1 }
  0xe0   : > { %v6820_v35 = vpop.f32.mrf.mxu0 }
  0xe1   : > { %v6822_v36 = vpop.f32.mrf.mxu1 }
  0xe2   : > { %v6824_v37 = vpop.f32.mrf.mxu0 }
  0xe3   : > { %v6826_v38 = vpop.f32.mrf.mxu1 }
  0xe4   : > { %v6828_v39 = vpop.f32.mrf.mxu0 }
  0xe5   : > { %v6830_v40 = vpop.f32.mrf.mxu1 }
  0xe6   : > { %v6832_v41 = vpop.f32.mrf.mxu0 }
  0xe7   : > { %v6834_v42 = vpop.f32.mrf.mxu1 }
  0xe8   : > { %v6836_v43 = vpop.f32.mrf.mxu0 }
  0xe9   : > { %v6838_v44 = vpop.f32.mrf.mxu1 }
  0xea   : > { %v6840_v45 = vpop.f32.mrf.mxu0 }
  0xeb   : > { %v6842_v46 = vpop.f32.mrf.mxu1 }
  0xec   : > { %v6844_v47 = vpop.f32.mrf.mxu0 }
  0xed   : > { %v6846_v48 = vpop.f32.mrf.mxu1 }
  0xee   : > { %v6848_v49 = vpop.f32.mrf.mxu0 }
  0xef   : > { %v6850_v50 = vpop.f32.mrf.mxu1 }
  0xf0   : > { %v6852_v51 = vpop.f32.mrf.mxu0 }
  0xf1   : > { %v6854_v52 = vpop.f32.mrf.mxu1 }
  0xf2   : > { %v6856_v53 = vpop.f32.mrf.mxu0 }
  0xf3   : > { %v6858_v54 = vpop.f32.mrf.mxu1 }
  0xf4   : > { %v6860_v55 = vpop.f32.mrf.mxu0 }
  0xf5   : > { %v6862_v56 = vpop.f32.mrf.mxu1 }
  0xf6   : > { %v6864_v57 = vpop.f32.mrf.mxu0 }
  0xf7   : > { %v6866_v58 = vpop.f32.mrf.mxu1 }
  0xf8   : > { %v6868_v59 = vpop.f32.mrf.mxu0 }
  0xf9   : > { %v6870_v60 = vpop.f32.mrf.mxu1 }
  0xfa   : > { %v6872_v61 = vpop.f32.mrf.mxu0 }
  0xfb   : > { %v6874_v62 = vpop.f32.mrf.mxu1 }
  0xfc   : > { %v6878_v0 = vpop.f32.mrf.mxu0 }
  0xfd   : > { %v6880_v1 = vpop.f32.mrf.mxu1 }
  0xfe   : > { %v6882_v3 = vpop.f32.mrf.mxu0 }
  0xff   : > { %v6884_v4 = vpop.f32.mrf.mxu1 }
 0x100   : > { %v6886_v5 = vpop.f32.mrf.mxu0 }
 0x101   : > { %v6888_v6 = vpop.f32.mrf.mxu1 }
 0x102   : > { %v6890_v8 = vpop.f32.mrf.mxu0 }
 0x103   : > { %10073 = vst [vmem:[#allocation5_spill] sm:$0xff] %v6890_v8  ;;  %v6892_v9 = vpop.f32.mrf.mxu1 }
 0x104   : > { %10074 = vst [vmem:[#allocation6_spill] sm:$0xff] %v6892_v9  ;;  %v6894_v11 = vpop.f32.mrf.mxu0 }
 0x105   : > { %10075 = vst [vmem:[#allocation7_spill] sm:$0xff] %v6894_v11  ;;  %v6896_v12 = vpop.f32.mrf.mxu1 }
 0x106   : > { %10076 = vst [vmem:[#allocation8_spill] sm:$0xff] %v6896_v12  ;;  %v6898_v13 = vpop.f32.mrf.mxu0 }
 0x107   : > { %10077 = vst [vmem:[#allocation9_spill] sm:$0xff] %v6898_v13  ;;  %v6900_v14 = vpop.f32.mrf.mxu1 }
 0x108   : > { %10078 = vst [vmem:[#allocation10_spill] sm:$0xff] %v6900_v14  ;;  %v6902_v16 = vpop.f32.mrf.mxu0  ;;  %v6931_v14 = vpop.permute.xlu0 %1079 }
 0x109   : > { %10079 = vst [vmem:[#allocation11_spill] sm:$0xff] %v6902_v16  ;;  %v6904_v17 = vpop.f32.mrf.mxu1 }
 0x10a   : > { %10080 = vst [vmem:[#allocation12_spill] sm:$0xff] %v6904_v17  ;;  %v6908_v19 = vpop.f32.mrf.mxu0 }
 0x10b   : > { %10081 = vst [vmem:[#allocation13_spill] sm:$0xff] %v6908_v19  ;;  %v6910_v20 = vpop.f32.mrf.mxu1 }
 0x10c   : > { %10082 = vst [vmem:[#allocation14_spill] sm:$0xff] %v6910_v20  ;;  %v6912_v21 = vpop.f32.mrf.mxu0 }
 0x10d   : > { %10083 = vst [vmem:[#allocation15_spill] sm:$0xff] %v6912_v21  ;;  %v6914_v22 = vpop.f32.mrf.mxu1  ;;  %v6927_v21 = vpop.permute.xlu1 %1084 }
 0x10e   : > { %10084 = vst [vmem:[#allocation16_spill] sm:$0xff] %v6914_v22  ;;  %v6918_v24 = vpop.f32.mrf.mxu0 }
 0x10f   : > { %10085 = vst [vmem:[#allocation17_spill] sm:$0xff] %v6918_v24  ;;  %v6920_v25 = vpop.f32.mrf.mxu1 }
 0x110   : > { %10086 = vst [vmem:[#allocation18_spill] sm:$0xff] %v6920_v25  ;;  %v5740_v27 = vpop.f32.mrf.mxu0 }
 0x111   : > { %v5842_v28 = vpop.f32.mrf.mxu1  ;;  %v593_v29 = vmax.f32 %v6812_v31, %v5740_v27 }
 0x112   : > { %v960_v30 = vmax.f32 %v6814_v32, %v5842_v28  ;;  %v463_v20 = vpop.f32.mrf.mxu0 }
 0x113   : > { %v830_v19 = vpop.f32.mrf.mxu1  ;;  %v592_v17 = vmax.f32 %v6816_v33, %v463_v20  ;;  %v6937_v20 = vpop.permute.xlu1 %1094 }
 0x114   : > { %v986_v22 = vmax.f32 %v593_v29, %v960_v30  ;;  %v959_v24 = vmax.f32 %v6818_v34, %v830_v19  ;;  %v5743_v16 = vpop.f32.mrf.mxu0 }
 0x115   : > { %v5845_v25 = vpop.f32.mrf.mxu1  ;;  %v595_v31 = vmax.f32 %v6820_v35, %v5743_v16 }
 0x116   : > { %v1168_v13 = vadd.f32 %v1045_v10, %v986_v22  ;;  %v985_v12 = vmax.f32 %v592_v17, %v959_v24  ;;  %v962_v32 = vmax.f32 %v6822_v36, %v5845_v25  ;;  %v473_v27 = vpop.f32.mrf.mxu0 }
 0x117   : > { %v840_v28 = vpop.f32.mrf.mxu1  ;;  %v594_v29 = vmax.f32 %v6824_v37, %v473_v27  ;;  %v6953_v27 = vpop.permute.xlu1 %1104 }
 0x118   : > { %v1194_v11 = vmax.f32 %v1168_v13, 0.0  ;;  %v1167_v9 = vadd.f32 %v1040_v2, %v985_v12  ;;  %v988_v8 = vmax.f32 %v595_v31, %v962_v32  ;;  %v961_v33 = vmax.f32 %v6826_v38, %v840_v28  ;;  %v5746_v34 = vpop.f32.mrf.mxu0  ;;  %v6944_v38 = vpop.permute.xlu0 %1089 }
 0x119   : > { %v5848_v19 = vpop.f32.mrf.mxu1  ;;  %v597_v10 = vmax.f32 %v6828_v39, %v5746_v34 }
 0x11a   : > { %1222 = vst [vmem:[%s6939_s16 + $0x8] sm:$0xff] %v1194_v11  ;;  %v1193_v35 = vmax.f32 %v1167_v9, 0.0  ;;  %v1170_v36 = vadd.f32 %v1055_v7, %v988_v8  ;;  %v964_v2 = vmax.f32 %v6830_v40, %v5848_v19  ;;  %v987_v12 = vmax.f32 %v594_v29, %v961_v33  ;;  %v483_v37 = vpop.f32.mrf.mxu0 }
 0x11b   : > { %v850_v13 = vpop.f32.mrf.mxu1  ;;  %v596_v22 = vmax.f32 %v6832_v41, %v483_v37 }
 0x11c   : > { %1221 = vst [vmem:[%s6939_s16] sm:$0xff] %v1193_v35  ;;  %v1196_v16 = vmax.f32 %v1170_v36, 0.0  ;;  %v990_v17 = vmax.f32 %v597_v10, %v964_v2  ;;  %v963_v24 = vmax.f32 %v6834_v42, %v850_v13  ;;  %v1169_v9 = vadd.f32 %v6876_v63, %v987_v12  ;;  %v5749_v7 = vpop.f32.mrf.mxu0 }
 0x11d   : > { %v5851_v8 = vpop.f32.mrf.mxu1  ;;  %v599_v11 = vmax.f32 %v6836_v43, %v5749_v7  ;;  %v1100_v43 = vpop.permute.xlu0 %1099 }
 0x11e   : > { %1224 = vst [vmem:[%s6939_s16 + $0x18] sm:$0xff] %v1196_v16  ;;  %v1172_v39 = vadd.f32 %v1065_v15, %v990_v17  ;;  %v989_v40 = vmax.f32 %v596_v22, %v963_v24  ;;  %v966_v25 = vmax.f32 %v6838_v44, %v5851_v8  ;;  %v1195_v30 = vmax.f32 %v1169_v9, 0.0  ;;  %v493_v31 = vpop.f32.mrf.mxu0 }
 0x11f   : > { %v860_v32 = vpop.f32.mrf.mxu1  ;;  %v598_v28 = vmax.f32 %v6840_v45, %v493_v31 }
 0x120   : > { %v1198_v41 = vmax.f32 %v1172_v39, 0.0  ;;  %v1171_v42 = vadd.f32 %v6906_v18, %v989_v40  ;;  %v992_v63 = vmax.f32 %v599_v11, %v966_v25  ;;  %1223 = vst [vmem:[%s6939_s16 + $0x10] sm:$0xff] %v1195_v30  ;;  %v965_v15 = vmax.f32 %v6842_v46, %v860_v32  ;;  %v5752_v29 = vpop.f32.mrf.mxu0 }
 0x121   : > { %v5854_v33 = vpop.f32.mrf.mxu1  ;;  %v601_v19 = vmax.f32 %v6844_v47, %v5752_v29  ;;  %v1110_v7 = vpop.permute.xlu0 %1109 }
 0x122   : > { %1226 = vst [vmem:[%s6939_s16 + $0x28] sm:$0xff] %v1198_v41  ;;  %v1197_v44 = vmax.f32 %v1171_v42, 0.0  ;;  %v1174_v34 = vadd.f32 %v6916_v23, %v992_v63  ;;  %v968_v35 = vmax.f32 %v6846_v48, %v5854_v33  ;;  %v991_v18 = vmax.f32 %v598_v28, %v965_v15  ;;  %v503_v36 = vpop.f32.mrf.mxu0  ;;  %v1115_v23 = vpop.permute.xlu1 %1114 }
 0x123   : > { %v870_v10 = vpop.f32.mrf.mxu1  ;;  %v600_v46 = vmax.f32 %v6848_v49, %v503_v36 }
 0x124   : > { %1225 = vst [vmem:[%s6939_s16 + $0x20] sm:$0xff] %v1197_v44  ;;  %v1200_v45 = vmax.f32 %v1174_v34, 0.0  ;;  %v994_v2 = vmax.f32 %v601_v19, %v968_v35  ;;  %v967_v12 = vmax.f32 %v6850_v50, %v870_v10  ;;  %v1173_v37 = vadd.f32 %v6922_v26, %v991_v18  ;;  %v5755_v13 = vpop.f32.mrf.mxu0 }
 0x125   : > { %v5857_v16 = vpop.f32.mrf.mxu1  ;;  %v603_v17 = vmax.f32 %v6852_v51, %v5755_v13  ;;  %v1120_v29 = vpop.permute.xlu0 %1119 }
 0x126   : > { %1228 = vst [vmem:[%s6939_s16 + $0x38] sm:$0xff] %v1200_v45  ;;  %v1176_v47 = vadd.f32 %v6927_v21, %v994_v2  ;;  %v993_v48 = vmax.f32 %v600_v46, %v967_v12  ;;  %v970_v22 = vmax.f32 %v6854_v52, %v5857_v16  ;;  %v1199_v24 = vmax.f32 %v1173_v37, 0.0  ;;  %v513_v9 = vpop.f32.mrf.mxu0  ;;  %v1125_v41 = vpop.permute.xlu1 %1124 }
 0x127   : > { %v880_v49 = vpop.f32.mrf.mxu1  ;;  %v602_v39 = vmax.f32 %v6856_v53, %v513_v9 }
 0x128   : > { %v1202_v50 = vmax.f32 %v1176_v47, 0.0  ;;  %v1175_v26 = vadd.f32 %v6931_v14, %v993_v48  ;;  %v996_v8 = vmax.f32 %v603_v17, %v970_v22  ;;  %1227 = vst [vmem:[%s6939_s16 + $0x30] sm:$0xff] %v1199_v24  ;;  %v969_v21 = vmax.f32 %v6858_v54, %v880_v49  ;;  %v5758_v40 = vpop.f32.mrf.mxu0 }
 0x129   : > { %v5860_v11 = vpop.f32.mrf.mxu1  ;;  %v605_v25 = vmax.f32 %v6860_v55, %v5758_v40  ;;  %v1130_v13 = vpop.permute.xlu0 %1129 }
 0x12a   : > { %1230 = vst [vmem:[%s6939_s16 + $0x48] sm:$0xff] %v1202_v50  ;;  %v1201_v51 = vmax.f32 %v1175_v26, 0.0  ;;  %v1178_v52 = vadd.f32 %v6937_v20, %v996_v8  ;;  %v972_v30 = vmax.f32 %v6862_v56, %v5860_v11  ;;  %v995_v31 = vmax.f32 %v602_v39, %v969_v21  ;;  %v523_v14 = vpop.f32.mrf.mxu0  ;;  %v1135_v45 = vpop.permute.xlu1 %1134  ;;  %v10088_v21 = vld [vmem:[#allocation6_spill] sm:$0xff] }
 0x12b   : > { %v890_v32 = vpop.f32.mrf.mxu1  ;;  %v604_v54 = vmax.f32 %v6864_v57, %v523_v14 }
 0x12c   : > { %1229 = vst [vmem:[%s6939_s16 + $0x40] sm:$0xff] %v1201_v51  ;;  %v1204_v53 = vmax.f32 %v1178_v52, 0.0  ;;  %v998_v42 = vmax.f32 %v605_v25, %v972_v30  ;;  %v971_v63 = vmax.f32 %v6866_v58, %v890_v32  ;;  %v1177_v28 = vadd.f32 %v6944_v38, %v995_v31  ;;  %v5761_v20 = vpop.f32.mrf.mxu0  ;;  %v10089_v25 = vld [vmem:[#allocation7_spill] sm:$0xff]  ;;  %v10090_v31 = vld [vmem:[#allocation8_spill] sm:$0xff] }
 0x12d   : > { %v5863_v15 = vpop.f32.mrf.mxu1  ;;  %v607_v33 = vmax.f32 %v6868_v59, %v5761_v20  ;;  %v1140_v52 = vpop.permute.xlu0 %1139  ;;  %v10092_v20 = vld [vmem:[#allocation10_spill] sm:$0xff] }
 0x12e   : > { %1232 = vst [vmem:[%s6939_s16 + $0x58] sm:$0xff] %v1204_v53  ;;  %v1180_v55 = vadd.f32 %v6953_v27, %v998_v42  ;;  %v997_v56 = vmax.f32 %v604_v54, %v971_v63  ;;  %v974_v44 = vmax.f32 %v6870_v60, %v5863_v15  ;;  %v1203_v34 = vmax.f32 %v1177_v28, 0.0  ;;  %v533_v19 = vpop.f32.mrf.mxu0  ;;  %v1145_v26 = vpop.permute.xlu1 %1144  ;;  %v10091_v63 = vld [vmem:[#allocation9_spill] sm:$0xff] }
 0x12f   : > { %v900_v57 = vpop.f32.mrf.mxu1  ;;  %v606_v38 = vmax.f32 %v6872_v61, %v533_v19  ;;  %v10093_v19 = vld [vmem:[#allocation11_spill] sm:$0xff] }
 0x130   : > { %v1206_v35 = vmax.f32 %v1180_v55, 0.0  ;;  %v1179_v58 = vadd.f32 %v1100_v43, %v997_v56  ;;  %v1000_v18 = vmax.f32 %v607_v33, %v974_v44  ;;  %1231 = vst [vmem:[%s6939_s16 + $0x50] sm:$0xff] %v1203_v34  ;;  %v973_v36 = vmax.f32 %v6874_v62, %v900_v57  ;;  %v5764_v10 = vpop.f32.mrf.mxu0 }
 0x131   : > { %v5866_v27 = vpop.f32.mrf.mxu1  ;;  %v609_v60 = vmax.f32 %v6878_v0, %v5764_v10  ;;  %v1150_v10 = vpop.permute.xlu0 %1149 }
 0x132   : > { %1234 = vst [vmem:[%s6939_s16 + $0x68] sm:$0xff] %v1206_v35  ;;  %v1205_v2 = vmax.f32 %v1179_v58, 0.0  ;;  %v1182_v59 = vadd.f32 %v1115_v23, %v1000_v18  ;;  %v976_v46 = vmax.f32 %v6880_v1, %v5866_v27  ;;  %v999_v12 = vmax.f32 %v606_v38, %v973_v36  ;;  %v543_v43 = vpop.f32.mrf.mxu0  ;;  %v1155_v33 = vpop.permute.xlu1 %1154  ;;  %v10094_v35 = vld [vmem:[#allocation12_spill] sm:$0xff] }
 0x133   : > { %v910_v37 = vpop.f32.mrf.mxu1  ;;  %v608_v62 = vmax.f32 %v6882_v3, %v543_v43 }
 0x134   : > { %1233 = vst [vmem:[%s6939_s16 + $0x60] sm:$0xff] %v1205_v2  ;;  %v1208_v61 = vmax.f32 %v1182_v59, 0.0  ;;  %v1002_v16 = vmax.f32 %v609_v60, %v976_v46  ;;  %v975_v47 = vmax.f32 %v6884_v4, %v910_v37  ;;  %v1181_v48 = vadd.f32 %v1110_v7, %v999_v12  ;;  %v5767_v17 = vpop.f32.mrf.mxu0  ;;  %v10087_v7 = vld [vmem:[#allocation5_spill] sm:$0xff]  ;;  %v10096_v46 = vld [vmem:[#allocation14_spill] sm:$0xff] }
 0x135   : > { %v5869_v22 = vpop.f32.mrf.mxu1  ;;  %v611_v1 = vmax.f32 %v6886_v5, %v5767_v17  ;;  %v10095_v59 = vld [vmem:[#allocation13_spill] sm:$0xff] }
 0x136   : > { %1236 = vst [vmem:[%s6939_s16 + $0x78] sm:$0xff] %v1208_v61  ;;  %v1184_v23 = vadd.f32 %v1125_v41, %v1002_v16  ;;  %v1001_v0 = vmax.f32 %v608_v62, %v975_v47  ;;  %v978_v24 = vmax.f32 %v6888_v6, %v5869_v22  ;;  %v1207_v9 = vmax.f32 %v1181_v48, 0.0  ;;  %v553_v49 = vpop.f32.mrf.mxu0  ;;  %v10097_v16 = vld [vmem:[#allocation15_spill] sm:$0xff]  ;;  %v10098_v47 = vld [vmem:[#allocation16_spill] sm:$0xff] }
 0x137   : > { %v920_v50 = vpop.f32.mrf.mxu1  ;;  %v610_v39 = vmax.f32 %v10087_v7, %v553_v49  ;;  %v10100_v49 = vld [vmem:[#allocation18_spill] sm:$0xff]  ;;  %v1160_v7 = vpop.permute.xlu0 %1159 }
 0x138   : > { %v1210_v8 = vmax.f32 %v1184_v23, 0.0  ;;  %v1183_v3 = vadd.f32 %v1120_v29, %v1001_v0  ;;  %v1004_v4 = vmax.f32 %v611_v1, %v978_v24  ;;  %1235 = vst [vmem:[%s6939_s16 + $0x70] sm:$0xff] %v1207_v9  ;;  %v977_v40 = vmax.f32 %v10088_v21, %v920_v50  ;;  %v5770_v11 = vpop.f32.mrf.mxu0  ;;  %v10099_v24 = vld [vmem:[#allocation17_spill] sm:$0xff] }
 0x139   : > { %v5872_v51 = vpop.f32.mrf.mxu1  ;;  %v613_v30 = vmax.f32 %v10089_v25, %v5770_v11 }
 0x13a   : > { %1238 = vst [vmem:[%s6939_s16 + $0x88] sm:$0xff] %v1210_v8  ;;  %v1209_v5 = vmax.f32 %v1183_v3, 0.0  ;;  %v1186_v6 = vadd.f32 %v1135_v45, %v1004_v4  ;;  %v980_v14 = vmax.f32 %v10090_v31, %v5872_v51  ;;  %v1003_v32 = vmax.f32 %v610_v39, %v977_v40  ;;  %v563_v41 = vpop.f32.mrf.mxu0 }
 0x13b   : > { %v930_v53 = vpop.f32.mrf.mxu1  ;;  %v612_v28 = vmax.f32 %v10091_v63, %v563_v41 }
 0x13c   : > { %1237 = vst [vmem:[%s6939_s16 + $0x80] sm:$0xff] %v1209_v5  ;;  %v1212_v42 = vmax.f32 %v1186_v6, 0.0  ;;  %v1006_v54 = vmax.f32 %v613_v30, %v980_v14  ;;  %v979_v15 = vmax.f32 %v10092_v20, %v930_v53  ;;  %v1185_v29 = vadd.f32 %v1130_v13, %v1003_v32  ;;  %v5773_v55 = vpop.f32.mrf.mxu0 }
 0x13d   : > { %v5875_v56 = vpop.f32.mrf.mxu1  ;;  %v615_v57 = vmax.f32 %v10093_v19, %v5773_v55 }
 0x13e   : > { %1240 = vst [vmem:[%s6939_s16 + $0x98] sm:$0xff] %v1212_v42  ;;  %v1188_v44 = vadd.f32 %v1145_v26, %v1006_v54  ;;  %v1005_v34 = vmax.f32 %v612_v28, %v979_v15  ;;  %v982_v58 = vmax.f32 %v10094_v35, %v5875_v56  ;;  %v1211_v18 = vmax.f32 %v1185_v29, 0.0  ;;  %v573_v38 = vpop.f32.mrf.mxu0  ;;  %v1165_v26 = vpop.permute.xlu1 %1164 }
 0x13f   : > { %v940_v36 = vpop.f32.mrf.mxu1  ;;  %v614_v60 = vmax.f32 %v10095_v59, %v573_v38 }
 0x140   : > { %v1214_v27 = vmax.f32 %v1188_v44, 0.0  ;;  %v1187_v45 = vadd.f32 %v1140_v52, %v1005_v34  ;;  %v1008_v2 = vmax.f32 %v615_v57, %v982_v58  ;;  %1239 = vst [vmem:[%s6939_s16 + $0x90] sm:$0xff] %v1211_v18  ;;  %v981_v12 = vmax.f32 %v10096_v46, %v940_v36  ;;  %v5776_v43 = vpop.f32.mrf.mxu0 }
 0x141   : > { %v5878_v37 = vpop.f32.mrf.mxu1  ;;  %v617_v62 = vmax.f32 %v10097_v16, %v5776_v43 }
 0x142   : > { %1242 = vst [vmem:[%s6939_s16 + $0xa8] sm:$0xff] %v1214_v27  ;;  %v1213_v13 = vmax.f32 %v1187_v45, 0.0  ;;  %v1190_v61 = vadd.f32 %v1155_v33, %v1008_v2  ;;  %v984_v48 = vmax.f32 %v10098_v47, %v5878_v37  ;;  %v1007_v17 = vmax.f32 %v614_v60, %v981_v12  ;;  %v583_v22 = vpop.f32.mrf.mxu0 }
 0x143   : > { %v950_v23 = vpop.f32.mrf.mxu1  ;;  %v616_v9 = vmax.f32 %v10099_v24, %v583_v22 }
 0x144   : > { %1241 = vst [vmem:[%s6939_s16 + $0xa0] sm:$0xff] %v1213_v13  ;;  %v1216_v0 = vmax.f32 %v1190_v61, 0.0  ;;  %v1010_v1 = vmax.f32 %v617_v62, %v984_v48  ;;  %v983_v50 = vmax.f32 %v10100_v49, %v950_v23  ;;  %v1189_v8 = vadd.f32 %v1150_v10, %v1007_v17 }
 0x146   : > { %1244 = vst [vmem:[%s6939_s16 + $0xb8] sm:$0xff] %v1216_v0  ;;  %v1192_v3 = vadd.f32 %v1165_v26, %v1010_v1  ;;  %v1009_v4 = vmax.f32 %v616_v9, %v983_v50  ;;  %v1215_v39 = vmax.f32 %v1189_v8, 0.0 }
 0x148   : > { %v1218_v21 = vmax.f32 %v1192_v3, 0.0  ;;  %v1191_v40 = vadd.f32 %v1160_v7, %v1009_v4  ;;  %1243 = vst [vmem:[%s6939_s16 + $0xb0] sm:$0xff] %v1215_v39  ;;  %42 = sbr.rel (!%p40_p0) target bundleno = 1 (0x1), region = 84 }
 0x14a   : > { %1246 = vst [vmem:[%s6939_s16 + $0xc8] sm:$0xff] %v1218_v21  ;;  %v1217_v11 = vmax.f32 %v1191_v40, 0.0 }
 0x14c   : > { %1245 = vst [vmem:[%s6939_s16 + $0xc0] sm:$0xff] %v1217_v11 }
 0x14d LB: > { %v1360_v51 = vld [vmem:[%s10045_s3 + $0x8] sm:$0xff]  ;;  %v1362_v52 = vld [vmem:[%s10045_s3 + $0x18] sm:$0xff]  ;;  %v6382_v5 = vmov 0.0   ;;  %s1253_s0 = smul.u32 416, %s6379_s18  ;;  %vm1569_vm1 = vcmask 523264   ;;  %s6379_s18 = sphi %s7027_s18, %s1252_s18  }
 0x14e   : > { %1660 = vmatprep.subr.mxu0 %v6382_v5  ;;  %1875 = vmatprep.subr.mxu1 %v6382_v5  ;;  %s3653_s14 = smul.u32 120, %s6379_s18  ;;  %s1252_s18 = sadd.s32 1, %s6379_s18  }
 0x14f   : > { %1724 = vmatprep.mubr.f32.mxu0 %v1360_v51  ;;  %1939 = vmatprep.mubr.f32.mxu1 %v1362_v52  ;;  %s7041_s1 = scalar_lea.vmem [#allocation2], %s1253_s0  ;;  %p1249_p1 = scmp.ge.s32.totalorder %s1252_s18, 5  }
 0x150   : > { %s9335_s15 = scalar_lea.vmem [#allocation3], %s3653_s14  ;;  %vm3769_vm2 = vcmask (%p1249_p1), 850944   ;;  %vm4686_vm3 = vcmask (%p1249_p1), 130048   ;;  %vm6386_vm4 = vmmov (%p1249_p1), 0   ;;  %vm4818_vm5 = vcmask (%p1249_p1), 326656  }
 0x153   : > { %v1270_v6 = vld [vmem:[%s7041_s1 + $0x78] sm:$0xff]  ;;  %v1269_v30 = vld [vmem:[%s7041_s1 + $0x70] sm:$0xff]  ;;  %v1268_v14 = vld [vmem:[%s7041_s1 + $0x68] sm:$0xff] }
 0x154   : > { %v1302_v25 = vld [vmem:[%s7041_s1 + $0x178] sm:$0xff]  ;;  %1661 = vmatpush1.msra.mxu0 %v1270_v6  ;;  %v1301_v31 = vld [vmem:[%s7041_s1 + $0x170] sm:$0xff]  ;;  %v1300_v32 = vld [vmem:[%s7041_s1 + $0x168] sm:$0xff] }
 0x155   : > { %1876 = vmatpush1.msra.mxu1 %v1302_v25  ;;  %1662 = vmatprep.subr.mxu0 %v6382_v5  ;;  %v1267_v41 = vld [vmem:[%s7041_s1 + $0x60] sm:$0xff]  ;;  %v1266_v42 = vld [vmem:[%s7041_s1 + $0x58] sm:$0xff]  ;;  %v1265_v63 = vld [vmem:[%s7041_s1 + $0x50] sm:$0xff] }
 0x156   : > { %1877 = vmatprep.subr.mxu1 %v6382_v5  ;;  %1663 = vmatpush1.msra.mxu0 %v1269_v30  ;;  %v1299_v53 = vld [vmem:[%s7041_s1 + $0x160] sm:$0xff]  ;;  %v1298_v54 = vld [vmem:[%s7041_s1 + $0x158] sm:$0xff]  ;;  %v1297_v28 = vld [vmem:[%s7041_s1 + $0x150] sm:$0xff] }
 0x157   : > { %1878 = vmatpush1.msra.mxu1 %v1301_v31  ;;  %1664 = vmatprep.subr.mxu0 %v6382_v5  ;;  %v1264_v20 = vld [vmem:[%s7041_s1 + $0x48] sm:$0xff]  ;;  %v1263_v29 = vld [vmem:[%s7041_s1 + $0x40] sm:$0xff]  ;;  %v1262_v56 = vld [vmem:[%s7041_s1 + $0x38] sm:$0xff] }
 0x158   : > { %1879 = vmatprep.subr.mxu1 %v6382_v5  ;;  %1665 = vmatpush1.msra.mxu0 %v1268_v14  ;;  %v1296_v15 = vld [vmem:[%s7041_s1 + $0x148] sm:$0xff]  ;;  %v1295_v55 = vld [vmem:[%s7041_s1 + $0x140] sm:$0xff]  ;;  %v1294_v33 = vld [vmem:[%s7041_s1 + $0x138] sm:$0xff] }
 0x159   : > { %1880 = vmatpush1.msra.mxu1 %v1300_v32  ;;  %1666 = vmatprep.subr.mxu0 %v6382_v5  ;;  %v1261_v44 = vld [vmem:[%s7041_s1 + $0x30] sm:$0xff]  ;;  %v1260_v19 = vld [vmem:[%s7041_s1 + $0x28] sm:$0xff]  ;;  %v1259_v35 = vld [vmem:[%s7041_s1 + $0x20] sm:$0xff] }
 0x15a   : > { %1881 = vmatprep.subr.mxu1 %v6382_v5  ;;  %1667 = vmatpush1.msra.mxu0 %v1267_v41  ;;  %v1293_v34 = vld [vmem:[%s7041_s1 + $0x130] sm:$0xff]  ;;  %v1292_v57 = vld [vmem:[%s7041_s1 + $0x128] sm:$0xff]  ;;  %v1291_v58 = vld [vmem:[%s7041_s1 + $0x120] sm:$0xff] }
 0x15b   : > { %1882 = vmatpush1.msra.mxu1 %v1299_v53  ;;  %1668 = vmatprep.subr.mxu0 %v6382_v5  ;;  %v1258_v18 = vld [vmem:[%s7041_s1 + $0x18] sm:$0xff]  ;;  %v1257_v36 = vld [vmem:[%s7041_s1 + $0x10] sm:$0xff]  ;;  %v1256_v27 = vld [vmem:[%s7041_s1 + $0x8] sm:$0xff] }
 0x15c   : > { %1883 = vmatprep.subr.mxu1 %v6382_v5  ;;  %1669 = vmatpush1.msra.mxu0 %v1266_v42  ;;  %v1290_v38 = vld [vmem:[%s7041_s1 + $0x118] sm:$0xff]  ;;  %v1289_v10 = vld [vmem:[%s7041_s1 + $0x110] sm:$0xff]  ;;  %v1288_v45 = vld [vmem:[%s7041_s1 + $0x108] sm:$0xff] }
 0x15d   : > { %1884 = vmatpush1.msra.mxu1 %v1298_v54  ;;  %1670 = vmatprep.subr.mxu0 %v6382_v5  ;;  %v1255_v2 = vld [vmem:[%s7041_s1] sm:$0xff]  ;;  %v1286_v60 = vld [vmem:[%s7041_s1 + $0xf8] sm:$0xff]  ;;  %v1285_v12 = vld [vmem:[%s7041_s1 + $0xf0] sm:$0xff] }
 0x15e   : > { %1885 = vmatprep.subr.mxu1 %v6382_v5  ;;  %1671 = vmatpush1.msra.mxu0 %v1265_v63  ;;  %v1287_v59 = vld [vmem:[%s7041_s1 + $0x100] sm:$0xff]  ;;  %v1318_v46 = vld [vmem:[%s7041_s1 + $0x1f8] sm:$0xff]  ;;  %v1317_v43 = vld [vmem:[%s7041_s1 + $0x1f0] sm:$0xff] }
 0x15f   : > { %1886 = vmatpush1.msra.mxu1 %v1297_v28  ;;  %1672 = vmatprep.subr.mxu0 %v6382_v5  ;;  %v1284_v37 = vld [vmem:[%s7041_s1 + $0xe8] sm:$0xff]  ;;  %v1283_v61 = vld [vmem:[%s7041_s1 + $0xe0] sm:$0xff]  ;;  %v1282_v62 = vld [vmem:[%s7041_s1 + $0xd8] sm:$0xff] }
 0x160   : > { %1887 = vmatprep.subr.mxu1 %v6382_v5  ;;  %1673 = vmatpush1.msra.mxu0 %v1264_v20  ;;  %v1316_v13 = vld [vmem:[%s7041_s1 + $0x1e8] sm:$0xff]  ;;  %v1315_v16 = vld [vmem:[%s7041_s1 + $0x1e0] sm:$0xff]  ;;  %v1314_v47 = vld [vmem:[%s7041_s1 + $0x1d8] sm:$0xff] }
 0x161   : > { %1888 = vmatpush1.msra.mxu1 %v1296_v15  ;;  %1674 = vmatprep.subr.mxu0 %v6382_v5  ;;  %v1281_v48 = vld [vmem:[%s7041_s1 + $0xd0] sm:$0xff]  ;;  %v1280_v22 = vld [vmem:[%s7041_s1 + $0xc8] sm:$0xff]  ;;  %v1279_v0 = vld [vmem:[%s7041_s1 + $0xc0] sm:$0xff] }
 0x162   : > { %1889 = vmatprep.subr.mxu1 %v6382_v5  ;;  %1675 = vmatpush1.msra.mxu0 %v1263_v29  ;;  %v1313_v17 = vld [vmem:[%s7041_s1 + $0x1d0] sm:$0xff]  ;;  %v1312_v23 = vld [vmem:[%s7041_s1 + $0x1c8] sm:$0xff]  ;;  %v1311_v1 = vld [vmem:[%s7041_s1 + $0x1c0] sm:$0xff] }
 0x163   : > { %1890 = vmatpush1.msra.mxu1 %v1295_v55  ;;  %1676 = vmatprep.subr.mxu0 %v6382_v5  ;;  %v1278_v24 = vld [vmem:[%s7041_s1 + $0xb8] sm:$0xff]  ;;  %v1277_v49 = vld [vmem:[%s7041_s1 + $0xb0] sm:$0xff]  ;;  %v1276_v26 = vld [vmem:[%s7041_s1 + $0xa8] sm:$0xff] }
 0x164   : > { %1891 = vmatprep.subr.mxu1 %v6382_v5  ;;  %1677 = vmatpush1.msra.mxu0 %v1262_v56  ;;  %v1310_v9 = vld [vmem:[%s7041_s1 + $0x1b8] sm:$0xff]  ;;  %v1309_v50 = vld [vmem:[%s7041_s1 + $0x1b0] sm:$0xff]  ;;  %v1308_v8 = vld [vmem:[%s7041_s1 + $0x1a8] sm:$0xff] }
 0x165   : > { %1892 = vmatpush1.msra.mxu1 %v1294_v33  ;;  %1678 = vmatprep.subr.mxu0 %v6382_v5  ;;  %v1275_v3 = vld [vmem:[%s7041_s1 + $0xa0] sm:$0xff]  ;;  %v1274_v7 = vld [vmem:[%s7041_s1 + $0x98] sm:$0xff]  ;;  %v1273_v21 = vld [vmem:[%s7041_s1 + $0x90] sm:$0xff] }
 0x166   : > { %1893 = vmatprep.subr.mxu1 %v6382_v5  ;;  %1679 = vmatpush1.msra.mxu0 %v1261_v44  ;;  %v1307_v4 = vld [vmem:[%s7041_s1 + $0x1a0] sm:$0xff]  ;;  %v1306_v39 = vld [vmem:[%s7041_s1 + $0x198] sm:$0xff]  ;;  %v1305_v40 = vld [vmem:[%s7041_s1 + $0x190] sm:$0xff] }
 0x167   : > { %1894 = vmatpush1.msra.mxu1 %v1293_v34  ;;  %1680 = vmatprep.subr.mxu0 %v6382_v5  ;;  %v1272_v11 = vld [vmem:[%s7041_s1 + $0x88] sm:$0xff]  ;;  %v1271_v52 = vld [vmem:[%s7041_s1 + $0x80] sm:$0xff]  ;;  %v1361_v30 = vld [vmem:[%s10045_s3 + $0x10] sm:$0xff] }
 0x168   : > { %1895 = vmatprep.subr.mxu1 %v6382_v5  ;;  %1681 = vmatpush1.msra.mxu0 %v1260_v19  ;;  %v1304_v51 = vld [vmem:[%s7041_s1 + $0x188] sm:$0xff]  ;;  %v1303_v6 = vld [vmem:[%s7041_s1 + $0x180] sm:$0xff]  ;;  %v1358_v31 = vld [vmem:[%s7041_s1 + $0x338] sm:$0xff] }
 0x169   : > { %1896 = vmatpush1.msra.mxu1 %v1292_v57  ;;  %1682 = vmatprep.subr.mxu0 %v6382_v5  ;;  %v1359_v25 = vld [vmem:[%s10045_s3] sm:$0xff]  ;;  %v1369_v32 = vld [vmem:[%s10045_s3 + $0x50] sm:$0xff]  ;;  %v1366_v53 = vld [vmem:[%s10045_s3 + $0x38] sm:$0xff] }
 0x16a   : > { %1897 = vmatprep.subr.mxu1 %v6382_v5  ;;  %1683 = vmatpush1.msra.mxu0 %v1259_v35  ;;  %v1367_v14 = vld [vmem:[%s10045_s3 + $0x40] sm:$0xff]  ;;  %v1357_v41 = vld [vmem:[%s7041_s1 + $0x330] sm:$0xff]  ;;  %v1368_v42 = vld [vmem:[%s10045_s3 + $0x48] sm:$0xff] }
 0x16b   : > { %1898 = vmatpush1.msra.mxu1 %v1291_v58  ;;  %1684 = vmatprep.subr.mxu0 %v6382_v5  ;;  %v1334_v54 = vld [vmem:[%s7041_s1 + $0x278] sm:$0xff]  ;;  %v1376_v28 = vld [vmem:[%s10045_s3 + $0x88] sm:$0xff]  ;;  %v1333_v20 = vld [vmem:[%s7041_s1 + $0x270] sm:$0xff] }
 0x16c   : > { %1899 = vmatprep.subr.mxu1 %v6382_v5  ;;  %1685 = vmatpush1.msra.mxu0 %v1258_v18  ;;  %v1374_v63 = vld [vmem:[%s10045_s3 + $0x78] sm:$0xff]  ;;  %v1373_v15 = vld [vmem:[%s10045_s3 + $0x70] sm:$0xff]  ;;  %v1375_v29 = vld [vmem:[%s10045_s3 + $0x80] sm:$0xff] }
 0x16d   : > { %1900 = vmatpush1.msra.mxu1 %v1290_v38  ;;  %1686 = vmatprep.subr.mxu0 %v6382_v5  ;;  %v1381_v55 = vld [vmem:[%s10045_s3 + $0xb0] sm:$0xff]  ;;  %v1383_v56 = vld [vmem:[%s10045_s3 + $0xc0] sm:$0xff]  ;;  %v1356_v33 = vld [vmem:[%s7041_s1 + $0x328] sm:$0xff] }
 0x16e   : > { %1901 = vmatprep.subr.mxu1 %v6382_v5  ;;  %1687 = vmatpush1.msra.mxu0 %v1257_v36  ;;  %v1332_v44 = vld [vmem:[%s7041_s1 + $0x268] sm:$0xff]  ;;  %v1382_v19 = vld [vmem:[%s10045_s3 + $0xb8] sm:$0xff]  ;;  %v1355_v58 = vld [vmem:[%s7041_s1 + $0x320] sm:$0xff] }
 0x16f   : > { %1902 = vmatpush1.msra.mxu1 %v1289_v10  ;;  %1688 = vmatprep.subr.mxu0 %v6382_v5  ;;  %v1380_v34 = vld [vmem:[%s10045_s3 + $0xa8] sm:$0xff]  ;;  %v1390_v35 = vld [vmem:[%s10045_s3 + $0xf8] sm:$0xff]  ;;  %v1331_v18 = vld [vmem:[%s7041_s1 + $0x260] sm:$0xff] }
 0x170   : > { %1903 = vmatprep.subr.mxu1 %v6382_v5  ;;  %1689 = vmatpush1.msra.mxu0 %v1256_v27  ;;  %v1388_v57 = vld [vmem:[%s10045_s3 + $0xe8] sm:$0xff]  ;;  %v1387_v38 = vld [vmem:[%s10045_s3 + $0xe0] sm:$0xff]  ;;  %v1389_v36 = vld [vmem:[%s10045_s3 + $0xf0] sm:$0xff] }
 0x171   : > { %1904 = vmatpush1.msra.mxu1 %v1288_v45  ;;  %1690 = vmatprep.subr.mxu0 %v6382_v5  ;;  %v1395_v10 = vld [vmem:[%s10045_s3 + $0x120] sm:$0xff]  ;;  %v1397_v27 = vld [vmem:[%s10045_s3 + $0x130] sm:$0xff]  ;;  %v1330_v45 = vld [vmem:[%s7041_s1 + $0x258] sm:$0xff] }
 0x172   : > { %1905 = vmatprep.subr.mxu1 %v6382_v5  ;;  %1691 = vmatpush1.msra.mxu0 %v1255_v2  ;;  %v1354_v2 = vld [vmem:[%s7041_s1 + $0x318] sm:$0xff] }
 0x173   : > { %1906 = vmatpush1.msra.mxu1 %v1287_v59  ;;  %1692 = vmatprep.subr.mxu0 %v6382_v5  ;;  %v1394_v59 = vld [vmem:[%s10045_s3 + $0x118] sm:$0xff] }
 0x174   : > { %1907 = vmatprep.subr.mxu1 %v6382_v5  ;;  %1693 = vmatpush2.msra.mxu0 %v1286_v60  ;;  %v1396_v60 = vld [vmem:[%s10045_s3 + $0x128] sm:$0xff] }
 0x175   : > { %1908 = vmatpush2.msra.mxu1 %v1318_v46  ;;  %1694 = vmatprep.subr.mxu0 %v6382_v5  ;;  %v1402_v46 = vld [vmem:[%s10045_s3 + $0x158] sm:$0xff] }
 0x176   : > { %1909 = vmatprep.subr.mxu1 %v6382_v5  ;;  %1695 = vmatpush2.msra.mxu0 %v1285_v12  ;;  %v1404_v12 = vld [vmem:[%s10045_s3 + $0x168] sm:$0xff] }
 0x177   : > { %1910 = vmatpush2.msra.mxu1 %v1317_v43  ;;  %1696 = vmatprep.subr.mxu0 %v6382_v5  ;;  %v1329_v43 = vld [vmem:[%s7041_s1 + $0x250] sm:$0xff] }
 0x178   : > { %1911 = vmatprep.subr.mxu1 %v6382_v5  ;;  %1697 = vmatpush2.msra.mxu0 %v1284_v37  ;;  %v1353_v37 = vld [vmem:[%s7041_s1 + $0x310] sm:$0xff] }
 0x179   : > { %1912 = vmatpush2.msra.mxu1 %v1316_v13  ;;  %1698 = vmatprep.subr.mxu0 %v6382_v5  ;;  %v1401_v13 = vld [vmem:[%s10045_s3 + $0x150] sm:$0xff] }
 0x17a   : > { %1913 = vmatprep.subr.mxu1 %v6382_v5  ;;  %1699 = vmatpush2.msra.mxu0 %v1283_v61  ;;  %v1403_v61 = vld [vmem:[%s10045_s3 + $0x160] sm:$0xff] }
 0x17b   : > { %1914 = vmatpush2.msra.mxu1 %v1315_v16  ;;  %1700 = vmatprep.subr.mxu0 %v6382_v5  ;;  %v1409_v16 = vld [vmem:[%s10045_s3 + $0x190] sm:$0xff] }
 0x17c   : > { %1915 = vmatprep.subr.mxu1 %v6382_v5  ;;  %1701 = vmatpush2.msra.mxu0 %v1282_v62  ;;  %v1411_v62 = vld [vmem:[%s10045_s3 + $0x1a0] sm:$0xff] }
 0x17d   : > { %1916 = vmatpush2.msra.mxu1 %v1314_v47  ;;  %1702 = vmatprep.subr.mxu0 %v6382_v5  ;;  %v7273_v47 = vld [vmem:[%s7041_s1 + $0x248] sm:$0xff] }
 0x17e   : > { %1917 = vmatprep.subr.mxu1 %v6382_v5  ;;  %1703 = vmatpush2.msra.mxu0 %v1281_v48  ;;  %v1352_v48 = vld [vmem:[%s7041_s1 + $0x308] sm:$0xff] }
 0x17f   : > { %1918 = vmatpush2.msra.mxu1 %v1313_v17  ;;  %1704 = vmatprep.subr.mxu0 %v6382_v5  ;;  %v1408_v17 = vld [vmem:[%s10045_s3 + $0x188] sm:$0xff] }
 0x180   : > { %1919 = vmatprep.subr.mxu1 %v6382_v5  ;;  %1705 = vmatpush2.msra.mxu0 %v1280_v22  ;;  %v1410_v22 = vld [vmem:[%s10045_s3 + $0x198] sm:$0xff] }
 0x181   : > { %1920 = vmatpush2.msra.mxu1 %v1312_v23  ;;  %1706 = vmatprep.subr.mxu0 %v6382_v5  ;;  %v1416_v23 = vld [vmem:[%s10045_s3 + $0x1c8] sm:$0xff] }
 0x182   : > { %1921 = vmatprep.subr.mxu1 %v6382_v5  ;;  %1707 = vmatpush2.msra.mxu0 %v1279_v0  ;;  %v1418_v0 = vld [vmem:[%s10045_s3 + $0x1d8] sm:$0xff] }
 0x183   : > { %1922 = vmatpush2.msra.mxu1 %v1311_v1  ;;  %1708 = vmatprep.subr.mxu0 %v6382_v5  ;;  %v7291_v1 = vld [vmem:[%s7041_s1 + $0x240] sm:$0xff] }
 0x184   : > { %1923 = vmatprep.subr.mxu1 %v6382_v5  ;;  %1709 = vmatpush2.msra.mxu0 %v1278_v24  ;;  %v1351_v24 = vld [vmem:[%s7041_s1 + $0x300] sm:$0xff] }
 0x185   : > { %1924 = vmatpush2.msra.mxu1 %v1310_v9  ;;  %1710 = vmatprep.subr.mxu0 %v6382_v5  ;;  %v1415_v9 = vld [vmem:[%s10045_s3 + $0x1c0] sm:$0xff] }
 0x186   : > { %1925 = vmatprep.subr.mxu1 %v6382_v5  ;;  %1711 = vmatpush2.msra.mxu0 %v1277_v49  ;;  %v1417_v49 = vld [vmem:[%s10045_s3 + $0x1d0] sm:$0xff] }
 0x187   : > { %1926 = vmatpush2.msra.mxu1 %v1309_v50  ;;  %1712 = vmatprep.subr.mxu0 %v6382_v5  ;;  %v7302_v50 = vld [vmem:[%s7041_s1 + $0x238] sm:$0xff] }
 0x188   : > { %1927 = vmatprep.subr.mxu1 %v6382_v5  ;;  %1713 = vmatpush2.msra.mxu0 %v1276_v26  ;;  %v1423_v26 = vld [vmem:[%s10045_s3 + $0x200] sm:$0xff] }
 0x189   : > { %1928 = vmatpush2.msra.mxu1 %v1308_v8  ;;  %1714 = vmatprep.subr.mxu0 %v6382_v5  ;;  %v1425_v8 = vld [vmem:[%s10045_s3 + $0x210] sm:$0xff] }
 0x18a   : > { %1929 = vmatprep.subr.mxu1 %v6382_v5  ;;  %1715 = vmatpush2.msra.mxu0 %v1275_v3  ;;  %v7312_v3 = vld [vmem:[%s7041_s1 + $0x230] sm:$0xff] }
 0x18b   : > { %1930 = vmatpush2.msra.mxu1 %v1307_v4  ;;  %1716 = vmatprep.subr.mxu0 %v6382_v5  ;;  %v1422_v4 = vld [vmem:[%s10045_s3 + $0x1f8] sm:$0xff] }
 0x18c   : > { %1931 = vmatprep.subr.mxu1 %v6382_v5  ;;  %1717 = vmatpush2.msra.mxu0 %v1274_v7  ;;  %v1424_v7 = vld [vmem:[%s10045_s3 + $0x208] sm:$0xff] }
 0x18d   : > { %1932 = vmatpush2.msra.mxu1 %v1306_v39  ;;  %1718 = vmatprep.subr.mxu0 %v6382_v5  ;;  %v1430_v39 = vld [vmem:[%s10045_s3 + $0x238] sm:$0xff] }
 0x18e   : > { %1933 = vmatprep.subr.mxu1 %v6382_v5  ;;  %1719 = vmatpush2.msra.mxu0 %v1273_v21  ;;  %v1432_v21 = vld [vmem:[%s10045_s3 + $0x248] sm:$0xff] }
 0x18f   : > { %1934 = vmatpush2.msra.mxu1 %v1305_v40  ;;  %1720 = vmatprep.subr.mxu0 %v6382_v5  ;;  %v7330_v40 = vld [vmem:[%s7041_s1 + $0x228] sm:$0xff] }
 0x190   : > { %1935 = vmatprep.subr.mxu1 %v6382_v5  ;;  %1721 = vmatpush2.msra.mxu0 %v1272_v11  ;;  %v1429_v11 = vld [vmem:[%s10045_s3 + $0x230] sm:$0xff] }
 0x191   : > { %1936 = vmatpush2.msra.mxu1 %v1304_v51  ;;  %1722 = vmatprep.subr.mxu0 %v6382_v5  ;;  %v1431_v51 = vld [vmem:[%s10045_s3 + $0x240] sm:$0xff] }
 0x192   : > { %1937 = vmatprep.subr.mxu1 %v6382_v5  ;;  %1723 = vmatpush2.msra.mxu0 %v1271_v52  ;;  %v1437_v52 = vld [vmem:[%s10045_s3 + $0x270] sm:$0xff] }
 0x193   : > { %1938 = vmatpush2.msra.mxu1 %v1303_v6  ;;  %1725 = vmatmul.mubr.f32.vlgmr.msra.gmra.mxu0 %v1359_v25  ;;  %v1439_v6 = vld [vmem:[%s10045_s3 + $0x280] sm:$0xff] }
 0x194   : > { %1940 = vmatmul.mubr.f32.vlgmr.msra.gmra.mxu1 %v1361_v30  ;;  %5879 = vmatprep.subr.mxu1 %v1358_v31  ;;  %v7348_v25 = vld [vmem:[%s7041_s1 + $0x220] sm:$0xff]  ;;  %v1436_v30 = vld [vmem:[%s10045_s3 + $0x268] sm:$0xff] }
 0x195   : > { %1729 = vmatprep.mubr.f32.mxu0 %v1367_v14  ;;  %5880 = vmatpush3.msra.mxu1 %v1358_v31  ;;  %v1438_v31 = vld [vmem:[%s10045_s3 + $0x278] sm:$0xff]  ;;  %v1444_v14 = vld [vmem:[%s10045_s3 + $0x2a8] sm:$0xff] }
 0x196   : > { %1944 = vmatprep.mubr.f32.mxu1 %v1369_v32  ;;  %2090 = vmatprep.subr.mxu0 %v6382_v5  ;;  %v1446_v32 = vld [vmem:[%s10045_s3 + $0x2b8] sm:$0xff] }
 0x197   : > { %5881 = vmatprep.subr.mxu1 %v1357_v41  ;;  %1730 = vmatmul.mubr.f32.gmra.mxu0 %v1366_v53  ;;  %v1443_v53 = vld [vmem:[%s10045_s3 + $0x2a0] sm:$0xff] }
 0x198   : > { %1945 = vmatmul.mubr.f32.gmra.mxu1 %v1368_v42  ;;  %2091 = vmatpush1.msra.mxu0 %v1334_v54  ;;  %v1445_v42 = vld [vmem:[%s10045_s3 + $0x2b0] sm:$0xff]  ;;  %v1451_v54 = vld [vmem:[%s10045_s3 + $0x2e0] sm:$0xff] }
 0x199   : > { %1734 = vmatprep.mubr.f32.mxu0 %v1374_v63  ;;  %1949 = vmatprep.mubr.f32.mxu1 %v1376_v28  ;;  %v1453_v63 = vld [vmem:[%s10045_s3 + $0x2f0] sm:$0xff] }
 0x19a   : > { %2092 = vmatprep.subr.mxu0 %v6382_v5  ;;  %5882 = vmatpush3.msra.mxu1 %v1357_v41  ;;  %v7365_v41 = vld [vmem:[%s7041_s1 + $0x218] sm:$0xff]  ;;  %v7382_v28 = vld [vmem:[%s7041_s1 + $0x210] sm:$0xff] }
 0x19b   : > { %2093 = vmatpush1.msra.mxu0 %v1333_v20  ;;  %5883 = vmatprep.subr.mxu1 %v1356_v33  ;;  %v1450_v20 = vld [vmem:[%s10045_s3 + $0x2d8] sm:$0xff] }
 0x19c   : > { %1735 = vmatmul.mubr.f32.gmra.mxu0 %v1373_v15  ;;  %1950 = vmatmul.mubr.f32.gmra.mxu1 %v1375_v29  ;;  %v1452_v15 = vld [vmem:[%s10045_s3 + $0x2e8] sm:$0xff]  ;;  %v1458_v29 = vld [vmem:[%s10045_s3 + $0x318] sm:$0xff] }
 0x19d   : > { %1739 = vmatprep.mubr.f32.mxu0 %v1381_v55  ;;  %1954 = vmatprep.mubr.f32.mxu1 %v1383_v56  ;;  %v1460_v55 = vld [vmem:[%s10045_s3 + $0x328] sm:$0xff] }
 0x19e   : > { %2094 = vmatprep.subr.mxu0 %v6382_v5  ;;  %5884 = vmatpush3.msra.mxu1 %v1356_v33  ;;  %v7399_v56 = vld [vmem:[%s7041_s1 + $0x208] sm:$0xff]  ;;  %v1457_v33 = vld [vmem:[%s10045_s3 + $0x310] sm:$0xff] }
 0x19f   : > { %2095 = vmatpush1.msra.mxu0 %v1332_v44  ;;  %5885 = vmatprep.subr.mxu1 %v1355_v58  ;;  %v1459_v44 = vld [vmem:[%s10045_s3 + $0x320] sm:$0xff] }
 0x1a0   : > { %1740 = vmatmul.mubr.f32.gmra.mxu0 %v1380_v34  ;;  %1955 = vmatmul.mubr.f32.gmra.mxu1 %v1382_v19  ;;  %v1465_v34 = vld [vmem:[%s10045_s3 + $0x350] sm:$0xff]  ;;  %v1467_v19 = vld [vmem:[%s10045_s3 + $0x360] sm:$0xff] }
 0x1a1   : > { %1744 = vmatprep.mubr.f32.mxu0 %v1388_v57  ;;  %1959 = vmatprep.mubr.f32.mxu1 %v1390_v35  ;;  %v7416_v57 = vld [vmem:[%s7041_s1 + $0x200] sm:$0xff]  ;;  %v1464_v35 = vld [vmem:[%s10045_s3 + $0x348] sm:$0xff] }
 0x1a2   : > { %2096 = vmatprep.subr.mxu0 %v6382_v5  ;;  %5886 = vmatpush3.msra.mxu1 %v1355_v58  ;;  %v1466_v58 = vld [vmem:[%s10045_s3 + $0x358] sm:$0xff] }
 0x1a3   : > { %2097 = vmatpush1.msra.mxu0 %v1331_v18  ;;  %5887 = vmatprep.subr.mxu1 %v1354_v2  ;;  %v1472_v18 = vld [vmem:[%s10045_s3 + $0x388] sm:$0xff] }
 0x1a4   : > { %1745 = vmatmul.mubr.f32.gmra.mxu0 %v1387_v38  ;;  %1960 = vmatmul.mubr.f32.gmra.mxu1 %v1389_v36  ;;  %v1474_v38 = vld [vmem:[%s10045_s3 + $0x398] sm:$0xff] }
 0x1a5   : > { %2098 = vmatprep.subr.mxu0 %v6382_v5  ;;  %1749 = vmatprep.mubr.f32.mxu0 %v1395_v10  ;;  %v1350_v36 = vld [vmem:[%s7041_s1 + $0x2f8] sm:$0xff]  ;;  %v1471_v10 = vld [vmem:[%s10045_s3 + $0x380] sm:$0xff] }
 0x1a6   : > { %1964 = vmatprep.mubr.f32.mxu1 %v1397_v27  ;;  %2099 = vmatpush1.msra.mxu0 %v1330_v45  ;;  %v1473_v27 = vld [vmem:[%s10045_s3 + $0x390] sm:$0xff]  ;;  %v1479_v45 = vld [vmem:[%s10045_s3 + $0x3c0] sm:$0xff] }
 0x1a7   : > { %2100 = vmatprep.subr.mxu0 %v6382_v5  ;;  %5888 = vmatpush3.msra.mxu1 %v1354_v2  ;;  %v1481_v2 = vld [vmem:[%s10045_s3 + $0x3d0] sm:$0xff] }
 0x1a8   : > { %1750 = vmatmul.mubr.f32.gmra.mxu0 %v1394_v59  ;;  %1965 = vmatmul.mubr.f32.gmra.mxu1 %v1396_v60  ;;  %v1349_v59 = vld [vmem:[%s7041_s1 + $0x2f0] sm:$0xff]  ;;  %v1478_v60 = vld [vmem:[%s10045_s3 + $0x3b8] sm:$0xff] }
 0x1a9   : > { %1754 = vmatprep.mubr.f32.mxu0 %v1402_v46  ;;  %1969 = vmatprep.mubr.f32.mxu1 %v1404_v12  ;;  %v1480_v46 = vld [vmem:[%s10045_s3 + $0x3c8] sm:$0xff]  ;;  %v1486_v12 = vld [vmem:[%s10045_s3 + $0x3f8] sm:$0xff] }
 0x1aa   : > { %2101 = vmatpush1.msra.mxu0 %v1329_v43  ;;  %5889 = vmatprep.subr.mxu1 %v1353_v37  ;;  %v1488_v43 = vld [vmem:[%s10045_s3 + $0x408] sm:$0xff] }
 0x1ab   : > { %2102 = vmatprep.subr.mxu0 %v6382_v5  ;;  %5890 = vmatpush3.msra.mxu1 %v1353_v37  ;;  %v1348_v37 = vld [vmem:[%s7041_s1 + $0x2e8] sm:$0xff] }
 0x1ac   : > { %1755 = vmatmul.mubr.f32.gmra.mxu0 %v1401_v13  ;;  %1970 = vmatmul.mubr.f32.gmra.mxu1 %v1403_v61  ;;  %v1485_v13 = vld [vmem:[%s10045_s3 + $0x3f0] sm:$0xff]  ;;  %v1487_v61 = vld [vmem:[%s10045_s3 + $0x400] sm:$0xff] }
 0x1ad   : > { %1759 = vmatprep.mubr.f32.mxu0 %v1409_v16  ;;  %1974 = vmatprep.mubr.f32.mxu1 %v1411_v62  ;;  %v1493_v16 = vld [vmem:[%s10045_s3 + $0x430] sm:$0xff]  ;;  %v1495_v62 = vld [vmem:[%s10045_s3 + $0x440] sm:$0xff] }
 0x1ae   : > { %2103 = vmatpush1.msra.mxu0 %v7273_v47  ;;  %5891 = vmatprep.subr.mxu1 %v1352_v48 }
 0x1af   : > { %2104 = vmatprep.subr.mxu0 %v6382_v5  ;;  %5892 = vmatpush3.msra.mxu1 %v1352_v48  ;;  %v1347_v48 = vld [vmem:[%s7041_s1 + $0x2e0] sm:$0xff] }
 0x1b0   : > { %1760 = vmatmul.mubr.f32.gmra.mxu0 %v1408_v17  ;;  %1975 = vmatmul.mubr.f32.gmra.mxu1 %v1410_v22  ;;  %v1492_v17 = vld [vmem:[%s10045_s3 + $0x428] sm:$0xff]  ;;  %v1494_v22 = vld [vmem:[%s10045_s3 + $0x438] sm:$0xff] }
 0x1b1   : > { %1764 = vmatprep.mubr.f32.mxu0 %v1416_v23  ;;  %1979 = vmatprep.mubr.f32.mxu1 %v1418_v0  ;;  %v1500_v23 = vld [vmem:[%s10045_s3 + $0x468] sm:$0xff]  ;;  %v1502_v0 = vld [vmem:[%s10045_s3 + $0x478] sm:$0xff] }
 0x1b2   : > { %2105 = vmatpush1.msra.mxu0 %v7291_v1  ;;  %5893 = vmatprep.subr.mxu1 %v1351_v24 }
 0x1b3   : > { %2106 = vmatprep.subr.mxu0 %v6382_v5  ;;  %5894 = vmatpush3.msra.mxu1 %v1351_v24  ;;  %v1346_v24 = vld [vmem:[%s7041_s1 + $0x2d8] sm:$0xff] }
 0x1b4   : > { %1765 = vmatmul.mubr.f32.gmra.mxu0 %v1415_v9  ;;  %1980 = vmatmul.mubr.f32.gmra.mxu1 %v1417_v49  ;;  %v1499_v9 = vld [vmem:[%s10045_s3 + $0x460] sm:$0xff]  ;;  %v1501_v49 = vld [vmem:[%s10045_s3 + $0x470] sm:$0xff] }
 0x1b5   : > { %2107 = vmatpush1.msra.mxu0 %v7302_v50  ;;  %1769 = vmatprep.mubr.f32.mxu0 %v1423_v26  ;;  %v1507_v26 = vld [vmem:[%s10045_s3 + $0x4a0] sm:$0xff] }
 0x1b6   : > { %1984 = vmatprep.mubr.f32.mxu1 %v1425_v8  ;;  %2108 = vmatprep.subr.mxu0 %v6382_v5  ;;  %v1509_v8 = vld [vmem:[%s10045_s3 + $0x4b0] sm:$0xff] }
 0x1b7   : > { %2109 = vmatpush1.msra.mxu0 %v7312_v3  ;;  %2643 = vmatprep.subr.mxu1 %v6382_v5 }
 0x1b8   : > { %1770 = vmatmul.mubr.f32.gmra.mxu0 %v1422_v4  ;;  %1985 = vmatmul.mubr.f32.gmra.mxu1 %v1424_v7  ;;  %v1345_v4 = vld [vmem:[%s7041_s1 + $0x2d0] sm:$0xff]  ;;  %v1506_v7 = vld [vmem:[%s10045_s3 + $0x498] sm:$0xff] }
 0x1b9   : > { %1774 = vmatprep.mubr.f32.mxu0 %v1430_v39  ;;  %1989 = vmatprep.mubr.f32.mxu1 %v1432_v21  ;;  %v1508_v39 = vld [vmem:[%s10045_s3 + $0x4a8] sm:$0xff]  ;;  %v1514_v21 = vld [vmem:[%s10045_s3 + $0x4d8] sm:$0xff] }
 0x1ba   : > { %2110 = vmatprep.subr.mxu0 %v6382_v5 }
 0x1bb   : > { %2111 = vmatpush1.msra.mxu0 %v7330_v40 }
 0x1bc   : > { %1775 = vmatmul.mubr.f32.gmra.mxu0 %v1429_v11  ;;  %1990 = vmatmul.mubr.f32.gmra.mxu1 %v1431_v51  ;;  %v1516_v11 = vld [vmem:[%s10045_s3 + $0x4e8] sm:$0xff] }
 0x1bd   : > { %1779 = vmatprep.mubr.f32.mxu0 %v1437_v52  ;;  %1994 = vmatprep.mubr.f32.mxu1 %v1439_v6  ;;  %v7518_v51 = vld [vmem:[%s7041_s1 + $0x2c8] sm:$0xff]  ;;  %v1513_v52 = vld [vmem:[%s10045_s3 + $0x4d0] sm:$0xff]  ;;  %v1515_v6 = vld [vmem:[%s10045_s3 + $0x4e0] sm:$0xff] }
 0x1be   : > { %2112 = vmatprep.subr.mxu0 %v6382_v5 }
 0x1bf   : > { %2113 = vmatpush1.msra.mxu0 %v7348_v25 }
 0x1c0   : > { %1780 = vmatmul.mubr.f32.gmra.mxu0 %v1436_v30  ;;  %1995 = vmatmul.mubr.f32.gmra.mxu1 %v1438_v31  ;;  %v1521_v30 = vld [vmem:[%s10045_s3 + $0x510] sm:$0xff]  ;;  %v1523_v31 = vld [vmem:[%s10045_s3 + $0x520] sm:$0xff] }
 0x1c1   : > { %1784 = vmatprep.mubr.f32.mxu0 %v1444_v14  ;;  %1999 = vmatprep.mubr.f32.mxu1 %v1446_v32  ;;  %v7535_v14 = vld [vmem:[%s7041_s1 + $0x2c0] sm:$0xff]  ;;  %v1520_v32 = vld [vmem:[%s10045_s3 + $0x508] sm:$0xff] }
 0x1c2   : > { %2114 = vmatprep.subr.mxu0 %v6382_v5 }
 0x1c3   : > { %2115 = vmatpush1.msra.mxu0 %v7365_v41 }
 0x1c4   : > { %1785 = vmatmul.mubr.f32.gmra.mxu0 %v1443_v53  ;;  %2000 = vmatmul.mubr.f32.gmra.mxu1 %v1445_v42  ;;  %v1522_v53 = vld [vmem:[%s10045_s3 + $0x518] sm:$0xff] }
 0x1c5   : > { %1789 = vmatprep.mubr.f32.mxu0 %v1451_v54  ;;  %2004 = vmatprep.mubr.f32.mxu1 %v1453_v63  ;;  %v7545_v42 = vld [vmem:[%s7041_s1 + $0x2b8] sm:$0xff]  ;;  %v1528_v54 = vld [vmem:[%s10045_s3 + $0x548] sm:$0xff] }
 0x1c6   : > { %2116 = vmatprep.subr.mxu0 %v6382_v5  ;;  %v1530_v63 = vld [vmem:[%s10045_s3 + $0x558] sm:$0xff] }
 0x1c7   : > { %2117 = vmatpush1.msra.mxu0 %v7382_v28 }
 0x1c8   : > { %1790 = vmatmul.mubr.f32.gmra.mxu0 %v1450_v20  ;;  %2005 = vmatmul.mubr.f32.gmra.mxu1 %v1452_v15  ;;  %v7555_v20 = vld [vmem:[%s7041_s1 + $0x2b0] sm:$0xff]  ;;  %v1527_v15 = vld [vmem:[%s10045_s3 + $0x540] sm:$0xff] }
 0x1c9   : > { %1794 = vmatprep.mubr.f32.mxu0 %v1458_v29  ;;  %2009 = vmatprep.mubr.f32.mxu1 %v1460_v55  ;;  %v1529_v29 = vld [vmem:[%s10045_s3 + $0x550] sm:$0xff]  ;;  %v1535_v55 = vld [vmem:[%s10045_s3 + $0x580] sm:$0xff] }
 0x1ca   : > { %2118 = vmatprep.subr.mxu0 %v6382_v5 }
 0x1cb   : > { %2119 = vmatpush1.msra.mxu0 %v7399_v56 }
 0x1cc   : > { %1795 = vmatmul.mubr.f32.gmra.mxu0 %v1457_v33  ;;  %2010 = vmatmul.mubr.f32.gmra.mxu1 %v1459_v44  ;;  %v1537_v33 = vld [vmem:[%s10045_s3 + $0x590] sm:$0xff]  ;;  %v7573_v44 = vld [vmem:[%s7041_s1 + $0x2a8] sm:$0xff] }
 0x1cd   : > { %1799 = vmatprep.mubr.f32.mxu0 %v1465_v34  ;;  %2014 = vmatprep.mubr.f32.mxu1 %v1467_v19  ;;  %v1534_v34 = vld [vmem:[%s10045_s3 + $0x578] sm:$0xff]  ;;  %v1536_v19 = vld [vmem:[%s10045_s3 + $0x588] sm:$0xff] }
 0x1ce   : > { %2120 = vmatprep.subr.mxu0 %v6382_v5 }
 0x1cf   : > { %2121 = vmatpush1.msra.mxu0 %v7416_v57 }
 0x1d0   : > { %1800 = vmatmul.mubr.f32.gmra.mxu0 %v1464_v35  ;;  %2015 = vmatmul.mubr.f32.gmra.mxu1 %v1466_v58  ;;  %v1542_v35 = vld [vmem:[%s10045_s3 + $0x5b8] sm:$0xff]  ;;  %v1544_v58 = vld [vmem:[%s10045_s3 + $0x5c8] sm:$0xff] }
 0x1d1   : > { %1804 = vmatprep.mubr.f32.mxu0 %v1472_v18  ;;  %2019 = vmatprep.mubr.f32.mxu1 %v1474_v38  ;;  %v7590_v18 = vld [vmem:[%s7041_s1 + $0x2a0] sm:$0xff]  ;;  %v1541_v38 = vld [vmem:[%s10045_s3 + $0x5b0] sm:$0xff] }
 0x1d2   : > { %2122 = vmatprep.subr.mxu0 %v6382_v5 }
 0x1d3   : > { %2123 = vmatpush2.msra.mxu0 %v1350_v36  ;;  %v1543_v36 = vld [vmem:[%s10045_s3 + $0x5c0] sm:$0xff] }
 0x1d4   : > { %1805 = vmatmul.mubr.f32.gmra.mxu0 %v1471_v10  ;;  %2020 = vmatmul.mubr.f32.gmra.mxu1 %v1473_v27  ;;  %v1549_v10 = vld [vmem:[%s10045_s3 + $0x5f0] sm:$0xff]  ;;  %v1551_v27 = vld [vmem:[%s10045_s3 + $0x600] sm:$0xff] }
 0x1d5   : > { %1809 = vmatprep.mubr.f32.mxu0 %v1479_v45  ;;  %2024 = vmatprep.mubr.f32.mxu1 %v1481_v2  ;;  %v7607_v45 = vld [vmem:[%s7041_s1 + $0x298] sm:$0xff]  ;;  %v1548_v2 = vld [vmem:[%s10045_s3 + $0x5e8] sm:$0xff] }
 0x1d6   : > { %2124 = vmatprep.subr.mxu0 %v6382_v5 }
 0x1d7   : > { %2125 = vmatpush2.msra.mxu0 %v1349_v59  ;;  %v1550_v59 = vld [vmem:[%s10045_s3 + $0x5f8] sm:$0xff] }
 0x1d8   : > { %1810 = vmatmul.mubr.f32.gmra.mxu0 %v1478_v60  ;;  %2025 = vmatmul.mubr.f32.gmra.mxu1 %v1480_v46  ;;  %v1556_v60 = vld [vmem:[%s10045_s3 + $0x628] sm:$0xff]  ;;  %v1558_v46 = vld [vmem:[%s10045_s3 + $0x638] sm:$0xff] }
 0x1d9   : > { %1814 = vmatprep.mubr.f32.mxu0 %v1486_v12  ;;  %2029 = vmatprep.mubr.f32.mxu1 %v1488_v43  ;;  %v7624_v12 = vld [vmem:[%s7041_s1 + $0x290] sm:$0xff]  ;;  %v1555_v43 = vld [vmem:[%s10045_s3 + $0x620] sm:$0xff] }
 0x1da   : > { %2126 = vmatprep.subr.mxu0 %v6382_v5 }
 0x1db   : > { %2127 = vmatpush2.msra.mxu0 %v1348_v37  ;;  %v1557_v37 = vld [vmem:[%s10045_s3 + $0x630] sm:$0xff] }
 0x1dc   : > { %1815 = vmatmul.mubr.f32.gmra.mxu0 %v1485_v13  ;;  %2030 = vmatmul.mubr.f32.gmra.mxu1 %v1487_v61  ;;  %v1563_v13 = vld [vmem:[%s10045_s3 + $0x660] sm:$0xff]  ;;  %v1565_v61 = vld [vmem:[%s10045_s3 + $0x670] sm:$0xff] }
 0x1dd   : > { %1819 = vmatprep.mubr.f32.mxu0 %v1493_v16  ;;  %2034 = vmatprep.mubr.f32.mxu1 %v1495_v62  ;;  %v7641_v16 = vld [vmem:[%s7041_s1 + $0x288] sm:$0xff]  ;;  %v1562_v62 = vld [vmem:[%s10045_s3 + $0x658] sm:$0xff] }
 0x1de   : > { %2128 = vmatprep.subr.mxu0 %v6382_v5 }
 0x1df   : > { %2129 = vmatpush2.msra.mxu0 %v1347_v48  ;;  %v1564_v48 = vld [vmem:[%s10045_s3 + $0x668] sm:$0xff] }
 0x1e0   : > { %1820 = vmatmul.mubr.f32.gmra.mxu0 %v1492_v17  ;;  %2035 = vmatmul.mubr.f32.gmra.mxu1 %v1494_v22  ;;  %v1364_v17 = vld [vmem:[%s10045_s3 + $0x28] sm:$0xff]  ;;  %v7655_v22 = vld [vmem:[%s7041_s1 + $0x280] sm:$0xff] }
 0x1e1   : > { %2130 = vmatprep.subr.mxu0 %v6382_v5  ;;  %1824 = vmatprep.mubr.f32.mxu0 %v1500_v23  ;;  %v1365_v23 = vld [vmem:[%s10045_s3 + $0x30] sm:$0xff] }
 0x1e2   : > { %2039 = vmatprep.mubr.f32.mxu1 %v1502_v0  ;;  %2131 = vmatpush2.msra.mxu0 %v1346_v24  ;;  %v1363_v0 = vld [vmem:[%s10045_s3 + $0x20] sm:$0xff]  ;;  %v1372_v24 = vld [vmem:[%s10045_s3 + $0x68] sm:$0xff] }
 0x1e3   : > { %2132 = vmatprep.subr.mxu0 %v6382_v5 }
 0x1e4   : > { %1825 = vmatmul.mubr.f32.gmra.mxu0 %v1499_v9  ;;  %2040 = vmatmul.mubr.f32.gmra.mxu1 %v1501_v49  ;;  %v5110_v9 = vld [vmem:[%s7041_s1 + $0x148] sm:$0xff]  ;;  %v1371_v49 = vld [vmem:[%s10045_s3 + $0x60] sm:$0xff] }
 0x1e5   : > { %1829 = vmatprep.mubr.f32.mxu0 %v1507_v26  ;;  %2044 = vmatprep.mubr.f32.mxu1 %v1509_v8  ;;  %v5109_v26 = vld [vmem:[%s7041_s1 + $0x140] sm:$0xff] }
 0x1e6   : > { %2133 = vmatpush2.msra.mxu0 %v1345_v4  ;;  %v1379_v8 = vld [vmem:[%s10045_s3 + $0xa0] sm:$0xff]  ;;  %v1370_v4 = vld [vmem:[%s10045_s3 + $0x58] sm:$0xff] }
 0x1e7   : > { %2134 = vmatprep.subr.mxu0 %v6382_v5 }
 0x1e8   : > { %1830 = vmatmul.mubr.f32.gmra.mxu0 %v1506_v7  ;;  %2045 = vmatmul.mubr.f32.gmra.mxu1 %v1508_v39  ;;  %v5108_v7 = vld [vmem:[%s7041_s1 + $0x138] sm:$0xff] }
 0x1e9   : > { %1834 = vmatprep.mubr.f32.mxu0 %v1514_v21  ;;  %2049 = vmatprep.mubr.f32.mxu1 %v1516_v11  ;;  %v1378_v39 = vld [vmem:[%s10045_s3 + $0x98] sm:$0xff]  ;;  %v5107_v11 = vld [vmem:[%s7041_s1 + $0x130] sm:$0xff] }
 0x1ea   : > { %2135 = vmatpush2.msra.mxu0 %v7518_v51  ;;  %v1386_v21 = vld [vmem:[%s10045_s3 + $0xd8] sm:$0xff] }
 0x1eb   : > { %2136 = vmatprep.subr.mxu0 %v6382_v5 }
 0x1ec   : > { %1835 = vmatmul.mubr.f32.gmra.mxu0 %v1513_v52  ;;  %2050 = vmatmul.mubr.f32.gmra.mxu1 %v1515_v6  ;;  %v5106_v52 = vld [vmem:[%s7041_s1 + $0x128] sm:$0xff]  ;;  %v1393_v6 = vld [vmem:[%s10045_s3 + $0x110] sm:$0xff] }
 0x1ed   : > { %1839 = vmatprep.mubr.f32.mxu0 %v1521_v30  ;;  %2054 = vmatprep.mubr.f32.mxu1 %v1523_v31  ;;  %v1400_v30 = vld [vmem:[%s10045_s3 + $0x148] sm:$0xff]  ;;  %v1385_v31 = vld [vmem:[%s10045_s3 + $0xd0] sm:$0xff] }
 0x1ee   : > { %2137 = vmatpush2.msra.mxu0 %v7535_v14 }
 0x1ef   : > { %2138 = vmatprep.subr.mxu0 %v6382_v5 }
 0x1f0   : > { %1840 = vmatmul.mubr.f32.gmra.mxu0 %v1520_v32  ;;  %2055 = vmatmul.mubr.f32.gmra.mxu1 %v1522_v53  ;;  %v5105_v32 = vld [vmem:[%s7041_s1 + $0x120] sm:$0xff]  ;;  %v1384_v53 = vld [vmem:[%s10045_s3 + $0xc8] sm:$0xff] }
 0x1f1   : > { %2139 = vmatpush2.msra.mxu0 %v7545_v42  ;;  %1844 = vmatprep.mubr.f32.mxu0 %v1528_v54  ;;  %v5104_v54 = vld [vmem:[%s7041_s1 + $0x118] sm:$0xff] }
 0x1f2   : > { %2059 = vmatprep.mubr.f32.mxu1 %v1530_v63  ;;  %2140 = vmatprep.subr.mxu0 %v6382_v5  ;;  %v1414_v63 = vld [vmem:[%s10045_s3 + $0x1b8] sm:$0xff] }
 0x1f3   : > { %2141 = vmatpush2.msra.mxu0 %v7555_v20 }
 0x1f4   : > { %1845 = vmatmul.mubr.f32.gmra.mxu0 %v1527_v15  ;;  %2060 = vmatmul.mubr.f32.gmra.mxu1 %v1529_v29  ;;  %v1392_v15 = vld [vmem:[%s10045_s3 + $0x108] sm:$0xff]  ;;  %v5103_v29 = vld [vmem:[%s7041_s1 + $0x110] sm:$0xff] }
 0x1f5   : > { %1849 = vmatprep.mubr.f32.mxu0 %v1535_v55  ;;  %2064 = vmatprep.mubr.f32.mxu1 %v1537_v33  ;;  %v1391_v55 = vld [vmem:[%s10045_s3 + $0x100] sm:$0xff]  ;;  %v5102_v33 = vld [vmem:[%s7041_s1 + $0x108] sm:$0xff] }
 0x1f6   : > { %2142 = vmatprep.subr.mxu0 %v6382_v5 }
 0x1f7   : > { %2143 = vmatpush2.msra.mxu0 %v7573_v44 }
 0x1f8   : > { %1850 = vmatmul.mubr.f32.gmra.mxu0 %v1534_v34  ;;  %2065 = vmatmul.mubr.f32.gmra.mxu1 %v1536_v19  ;;  %v1428_v34 = vld [vmem:[%s10045_s3 + $0x228] sm:$0xff]  ;;  %v5101_v19 = vld [vmem:[%s7041_s1 + $0x100] sm:$0xff] }
 0x1f9   : > { %1854 = vmatprep.mubr.f32.mxu0 %v1542_v35  ;;  %2069 = vmatprep.mubr.f32.mxu1 %v1544_v58  ;;  %v1399_v35 = vld [vmem:[%s10045_s3 + $0x140] sm:$0xff]  ;;  %v1398_v58 = vld [vmem:[%s10045_s3 + $0x138] sm:$0xff] }
 0x1fa   : > { %2144 = vmatprep.subr.mxu0 %v6382_v5 }
 0x1fb   : > { %2145 = vmatpush2.msra.mxu0 %v7590_v18 }
 0x1fc   : > { %1855 = vmatmul.mubr.f32.gmra.mxu0 %v1541_v38  ;;  %2070 = vmatmul.mubr.f32.gmra.mxu1 %v1543_v36  ;;  %v5100_v38 = vld [vmem:[%s7041_s1 + $0xf8] sm:$0xff] }
 0x1fd   : > { %1859 = vmatprep.mubr.f32.mxu0 %v1549_v10  ;;  %2074 = vmatprep.mubr.f32.mxu1 %v1551_v27  ;;  %v1442_v36 = vld [vmem:[%s10045_s3 + $0x298] sm:$0xff]  ;;  %v5099_v10 = vld [vmem:[%s7041_s1 + $0xf0] sm:$0xff] }
 0x1fe   : > { %2146 = vmatprep.subr.mxu0 %v6382_v5  ;;  %v1406_v27 = vld [vmem:[%s10045_s3 + $0x178] sm:$0xff] }
 0x1ff   : > { %2147 = vmatpush2.msra.mxu0 %v7607_v45 }
 0x200   : > { %1860 = vmatmul.mubr.f32.gmra.mxu0 %v1548_v2  ;;  %2075 = vmatmul.mubr.f32.gmra.mxu1 %v1550_v59  ;;  %v5098_v2 = vld [vmem:[%s7041_s1 + $0xe8] sm:$0xff]  ;;  %v1449_v59 = vld [vmem:[%s10045_s3 + $0x2d0] sm:$0xff] }
 0x201   : > { %1864 = vmatprep.mubr.f32.mxu0 %v1556_v60  ;;  %2079 = vmatprep.mubr.f32.mxu1 %v1558_v46  ;;  %v1456_v60 = vld [vmem:[%s10045_s3 + $0x308] sm:$0xff]  ;;  %v5097_v46 = vld [vmem:[%s7041_s1 + $0xe0] sm:$0xff] }
 0x202   : > { %2148 = vmatprep.subr.mxu0 %v6382_v5 }
 0x203   : > { %2149 = vmatpush2.msra.mxu0 %v7624_v12 }
 0x204   : > { %1865 = vmatmul.mubr.f32.gmra.mxu0 %v1555_v43  ;;  %2080 = vmatmul.mubr.f32.gmra.mxu1 %v1557_v37  ;;  %v1413_v43 = vld [vmem:[%s10045_s3 + $0x1b0] sm:$0xff]  ;;  %v5096_v37 = vld [vmem:[%s7041_s1 + $0xd8] sm:$0xff] }
 0x205   : > { %1869 = vmatprep.mubr.f32.mxu0 %v1563_v13  ;;  %2084 = vmatprep.mubr.f32.mxu1 %v1565_v61  ;;  %v1463_v13 = vld [vmem:[%s10045_s3 + $0x340] sm:$0xff]  ;;  %v1470_v61 = vld [vmem:[%s10045_s3 + $0x378] sm:$0xff] }
 0x206   : > { %2150 = vmatprep.subr.mxu0 %v6382_v5 }
 0x207   : > { %2151 = vmatpush2.msra.mxu0 %v7641_v16 }
 0x208   : > { %1870 = vmatmul.mubr.f32.gmra.mxu0 %v1562_v62  ;;  %2085 = vmatmul.mubr.f32.gmra.mxu1 %v1564_v48  ;;  %v5095_v62 = vld [vmem:[%s7041_s1 + $0xd0] sm:$0xff]  ;;  %v1420_v48 = vld [vmem:[%s10045_s3 + $0x1e8] sm:$0xff] }
 0x209   : > { %2152 = vmatprep.subr.mxu0 %v6382_v5  ;;  %2154 = vmatprep.mubr.f32.mxu0 %v1364_v17  ;;  %v5126_v17 = vld [vmem:[%s7041_s1 + $0x1c8] sm:$0xff] }
 0x20a   : > { %2153 = vmatpush2.msra.mxu0 %v7655_v22  ;;  %5895 = vmatprep.mubr.msk.f32.mxu1 %vm1569_vm1, %v1365_v23  ;;  %v1477_v23 = vld [vmem:[%s10045_s3 + $0x3b0] sm:$0xff] }
 0x20b   : > { %2858 = vmatprep.subr.mxu0 %v6382_v5 }
 0x20c   : > { %2155 = vmatmul.mubr.f32.vlgmr.msra.gmra.mxu0 %v1363_v0  ;;  %5896 = vmatmul.mubr.msk.f32.vlgmr.msra.gmra.mxu1 %vm1569_vm1, %v1372_v24  ;;  %v1484_v0 = vld [vmem:[%s10045_s3 + $0x3e8] sm:$0xff]  ;;  %v5125_v24 = vld [vmem:[%s7041_s1 + $0x1c0] sm:$0xff] }
 0x20d   : > { %2644 = vmatpush1.msra.mxu1 %v5110_v9  ;;  %2159 = vmatprep.mubr.f32.mxu0 %v1371_v49  ;;  %v1427_v9 = vld [vmem:[%s10045_s3 + $0x220] sm:$0xff]  ;;  %v5124_v49 = vld [vmem:[%s7041_s1 + $0x1b8] sm:$0xff] }
 0x20e   : > { %2645 = vmatprep.subr.mxu1 %v6382_v5  ;;  %2859 = vmatpush1.msra.mxu0 %v7273_v47  ;;  %v1377_v47 = vld [vmem:[%s10045_s3 + $0x90] sm:$0xff] }
 0x20f   : > { %2646 = vmatpush1.msra.mxu1 %v5109_v26  ;;  %5898 = vmatprep.mubr.msk.f32.mxu1 %vm1569_vm1, %v1379_v8  ;;  %v1491_v26 = vld [vmem:[%s10045_s3 + $0x420] sm:$0xff]  ;;  %v1498_v8 = vld [vmem:[%s10045_s3 + $0x458] sm:$0xff] }
 0x210   : > { %2647 = vmatprep.subr.mxu1 %v6382_v5  ;;  %2160 = vmatmul.mubr.f32.gmra.mxu0 %v1370_v4  ;;  %v5123_v4 = vld [vmem:[%s7041_s1 + $0x1b0] sm:$0xff] }
 0x211   : > { %2648 = vmatpush1.msra.mxu1 %v5108_v7  ;;  %2164 = vmatprep.mubr.f32.mxu0 %v1378_v39  ;;  %v1433_v7 = vld [vmem:[%s10045_s3 + $0x250] sm:$0xff]  ;;  %v5122_v39 = vld [vmem:[%s7041_s1 + $0x1a8] sm:$0xff] }
 0x212   : > { %2649 = vmatprep.subr.mxu1 %v6382_v5  ;;  %5899 = vmatmul.mubr.msk.f32.gmra.mxu1 %vm1569_vm1, %v1386_v21  ;;  %v1505_v21 = vld [vmem:[%s10045_s3 + $0x490] sm:$0xff] }
 0x213   : > { %2650 = vmatpush1.msra.mxu1 %v5107_v11  ;;  %2860 = vmatprep.subr.mxu0 %v6382_v5  ;;  %v1512_v11 = vld [vmem:[%s10045_s3 + $0x4c8] sm:$0xff] }
 0x214   : > { %2651 = vmatprep.subr.mxu1 %v6382_v5  ;;  %2165 = vmatmul.mubr.f32.gmra.mxu0 %v1377_v47  ;;  %v5121_v47 = vld [vmem:[%s7041_s1 + $0x1a0] sm:$0xff] }
 0x215   : > { %2652 = vmatpush1.msra.mxu1 %v5106_v52  ;;  %2861 = vmatpush1.msra.mxu0 %v7291_v1  ;;  %v1407_v1 = vld [vmem:[%s10045_s3 + $0x180] sm:$0xff]  ;;  %v5132_v52 = vld [vmem:[%s7041_s1 + $0x1f8] sm:$0xff] }
 0x216   : > { %5901 = vmatprep.mubr.msk.f32.mxu1 %vm1569_vm1, %v1393_v6  ;;  %2653 = vmatprep.subr.mxu1 %v6382_v5  ;;  %v1440_v6 = vld [vmem:[%s10045_s3 + $0x288] sm:$0xff] }
 0x217   : > { %5902 = vmatmul.mubr.msk.f32.gmra.mxu1 %vm1569_vm1, %v1400_v30  ;;  %2169 = vmatprep.mubr.f32.mxu0 %v1385_v31  ;;  %v5120_v30 = vld [vmem:[%s7041_s1 + $0x198] sm:$0xff]  ;;  %v1519_v31 = vld [vmem:[%s10045_s3 + $0x500] sm:$0xff] }
 0x218   : > { %2654 = vmatpush1.msra.mxu1 %v5105_v32  ;;  %2862 = vmatprep.subr.mxu0 %v6382_v5  ;;  %v1526_v32 = vld [vmem:[%s10045_s3 + $0x538] sm:$0xff] }
 0x219   : > { %2655 = vmatprep.subr.mxu1 %v6382_v5  ;;  %2170 = vmatmul.mubr.f32.gmra.mxu0 %v1384_v53  ;;  %v5119_v53 = vld [vmem:[%s7041_s1 + $0x190] sm:$0xff] }
 0x21a   : > { %2656 = vmatpush1.msra.mxu1 %v5104_v54  ;;  %2863 = vmatpush1.msra.mxu0 %v7302_v50  ;;  %v1421_v50 = vld [vmem:[%s10045_s3 + $0x1f0] sm:$0xff] }
 0x21b   : > { %5904 = vmatprep.mubr.msk.f32.mxu1 %vm1569_vm1, %v1407_v1  ;;  %2657 = vmatprep.subr.mxu1 %v6382_v5  ;;  %v5131_v54 = vld [vmem:[%s7041_s1 + $0x1f0] sm:$0xff]  ;;  %v1448_v1 = vld [vmem:[%s10045_s3 + $0x2c8] sm:$0xff] }
 0x21c   : > { %5905 = vmatmul.mubr.msk.f32.gmra.mxu1 %vm1569_vm1, %v1414_v63  ;;  %2174 = vmatprep.mubr.f32.mxu0 %v1392_v15  ;;  %v1447_v63 = vld [vmem:[%s10045_s3 + $0x2c0] sm:$0xff]  ;;  %v5118_v15 = vld [vmem:[%s7041_s1 + $0x188] sm:$0xff] }
 0x21d   : > { %2658 = vmatpush1.msra.mxu1 %v5103_v29  ;;  %2864 = vmatprep.subr.mxu0 %v6382_v5  ;;  %v1533_v29 = vld [vmem:[%s10045_s3 + $0x570] sm:$0xff] }
 0x21e   : > { %2659 = vmatprep.subr.mxu1 %v6382_v5  ;;  %2175 = vmatmul.mubr.f32.gmra.mxu0 %v1391_v55  ;;  %v5130_v55 = vld [vmem:[%s7041_s1 + $0x1e8] sm:$0xff] }
 0x21f   : > { %2660 = vmatpush1.msra.mxu1 %v5102_v33  ;;  %2865 = vmatpush1.msra.mxu0 %v7312_v3  ;;  %v1435_v3 = vld [vmem:[%s10045_s3 + $0x260] sm:$0xff]  ;;  %v1540_v33 = vld [vmem:[%s10045_s3 + $0x5a8] sm:$0xff] }
 0x220   : > { %5907 = vmatprep.mubr.msk.f32.mxu1 %vm1569_vm1, %v1421_v50  ;;  %2661 = vmatprep.subr.mxu1 %v6382_v5  ;;  %v1455_v50 = vld [vmem:[%s10045_s3 + $0x300] sm:$0xff] }
 0x221   : > { %5908 = vmatmul.mubr.msk.f32.gmra.mxu1 %vm1569_vm1, %v1428_v34  ;;  %2866 = vmatprep.subr.mxu0 %v6382_v5  ;;  %v5117_v34 = vld [vmem:[%s7041_s1 + $0x180] sm:$0xff] }
 0x222   : > { %2662 = vmatpush1.msra.mxu1 %v5101_v19  ;;  %2179 = vmatprep.mubr.f32.mxu0 %v1399_v35  ;;  %v1454_v19 = vld [vmem:[%s10045_s3 + $0x2f8] sm:$0xff] }
 0x223   : > { %2663 = vmatprep.subr.mxu1 %v6382_v5  ;;  %2867 = vmatpush1.msra.mxu0 %v7330_v40  ;;  %v1405_v40 = vld [vmem:[%s10045_s3 + $0x170] sm:$0xff]  ;;  %v5116_v35 = vld [vmem:[%s7041_s1 + $0x178] sm:$0xff] }
 0x224   : > { %2180 = vmatmul.mubr.f32.gmra.mxu0 %v1398_v58  ;;  %2664 = vmatpush1.msra.mxu1 %v5100_v38  ;;  %v1547_v58 = vld [vmem:[%s10045_s3 + $0x5e0] sm:$0xff] }
 0x225   : > { %5910 = vmatprep.mubr.msk.f32.mxu1 %vm1569_vm1, %v1435_v3  ;;  %2665 = vmatprep.subr.mxu1 %v6382_v5  ;;  %v5129_v38 = vld [vmem:[%s7041_s1 + $0x1e0] sm:$0xff]  ;;  %v1554_v3 = vld [vmem:[%s10045_s3 + $0x618] sm:$0xff] }
 0x226   : > { %5911 = vmatmul.mubr.msk.f32.gmra.mxu1 %vm1569_vm1, %v1442_v36  ;;  %2868 = vmatprep.subr.mxu0 %v6382_v5  ;;  %v1462_v36 = vld [vmem:[%s10045_s3 + $0x338] sm:$0xff] }
 0x227   : > { %2666 = vmatpush1.msra.mxu1 %v5099_v10  ;;  %2184 = vmatprep.mubr.f32.mxu0 %v1406_v27  ;;  %v5115_v10 = vld [vmem:[%s7041_s1 + $0x170] sm:$0xff] }
 0x228   : > { %2667 = vmatprep.subr.mxu1 %v6382_v5  ;;  %2869 = vmatpush1.msra.mxu0 %v7348_v25  ;;  %v1412_v25 = vld [vmem:[%s10045_s3 + $0x1a8] sm:$0xff]  ;;  %v1461_v27 = vld [vmem:[%s10045_s3 + $0x330] sm:$0xff] }
 0x229   : > { %2185 = vmatmul.mubr.f32.gmra.mxu0 %v1405_v40  ;;  %2668 = vmatpush1.msra.mxu1 %v5098_v2  ;;  %v5114_v40 = vld [vmem:[%s7041_s1 + $0x168] sm:$0xff]  ;;  %v1561_v2 = vld [vmem:[%s10045_s3 + $0x650] sm:$0xff] }
 0x22a   : > { %5913 = vmatprep.mubr.msk.f32.mxu1 %vm1569_vm1, %v1449_v59  ;;  %2669 = vmatprep.subr.mxu1 %v6382_v5  ;;  %v5128_v59 = vld [vmem:[%s7041_s1 + $0x1d8] sm:$0xff] }
 0x22b   : > { %5914 = vmatmul.mubr.msk.f32.gmra.mxu1 %vm1569_vm1, %v1456_v60  ;;  %2870 = vmatprep.subr.mxu0 %v6382_v5  ;;  %v1568_v60 = vld [vmem:[%s10045_s3 + $0x688] sm:$0xff] }
 0x22c   : > { %2670 = vmatpush1.msra.mxu1 %v5097_v46  ;;  %2189 = vmatprep.mubr.f32.mxu0 %v1413_v43  ;;  %v1469_v46 = vld [vmem:[%s10045_s3 + $0x370] sm:$0xff]  ;;  %v5113_v43 = vld [vmem:[%s7041_s1 + $0x160] sm:$0xff] }
 0x22d   : > { %2671 = vmatprep.subr.mxu1 %v6382_v5  ;;  %2871 = vmatpush1.msra.mxu0 %v7365_v41  ;;  %v1419_v41 = vld [vmem:[%s10045_s3 + $0x1e0] sm:$0xff] }
 0x22e   : > { %2190 = vmatmul.mubr.f32.gmra.mxu0 %v1412_v25  ;;  %2672 = vmatpush1.msra.mxu1 %v5096_v37  ;;  %v1468_v25 = vld [vmem:[%s10045_s3 + $0x368] sm:$0xff]  ;;  %v5112_v37 = vld [vmem:[%s7041_s1 + $0x158] sm:$0xff] }
 0x22f   : > { %5916 = vmatprep.mubr.msk.f32.mxu1 %vm1569_vm1, %v1463_v13  ;;  %2673 = vmatprep.subr.mxu1 %v6382_v5  ;;  %v5127_v13 = vld [vmem:[%s7041_s1 + $0x1d0] sm:$0xff] }
 0x230   : > { %5917 = vmatmul.mubr.msk.f32.gmra.mxu1 %vm1569_vm1, %v1470_v61  ;;  %2872 = vmatprep.subr.mxu0 %v6382_v5 }
 0x231   : > { %2674 = vmatpush1.msra.mxu1 %v5095_v62  ;;  %2194 = vmatprep.mubr.f32.mxu0 %v1420_v48 }
 0x232   : > { %2675 = vmatprep.subr.mxu1 %v6382_v5  ;;  %2873 = vmatpush1.msra.mxu0 %v7382_v28  ;;  %v1426_v28 = vld [vmem:[%s10045_s3 + $0x218] sm:$0xff] }
 0x233   : > { %2195 = vmatmul.mubr.f32.gmra.mxu0 %v1419_v41  ;;  %2676 = vmatpush2.msra.mxu1 %v5126_v17  ;;  %v5111_v41 = vld [vmem:[%s7041_s1 + $0x150] sm:$0xff]  ;;  %v1476_v17 = vld [vmem:[%s10045_s3 + $0x3a8] sm:$0xff] }
 0x234   : > { %5919 = vmatprep.mubr.msk.f32.mxu1 %vm1569_vm1, %v1477_v23  ;;  %2677 = vmatprep.subr.mxu1 %v6382_v5 }
 0x235   : > { %2874 = vmatprep.subr.mxu0 %v6382_v5  ;;  %5920 = vmatmul.mubr.msk.f32.gmra.mxu1 %vm1569_vm1, %v1484_v0 }
 0x236   : > { %2678 = vmatpush2.msra.mxu1 %v5125_v24  ;;  %2875 = vmatpush1.msra.mxu0 %v7399_v56  ;;  %v1434_v56 = vld [vmem:[%s10045_s3 + $0x258] sm:$0xff]  ;;  %v6151_v24 = vld [vmem:[%s10045_s3 + $0x8] sm:$0xff] }
 0x237   : > { %2199 = vmatprep.mubr.f32.mxu0 %v1427_v9  ;;  %2679 = vmatprep.subr.mxu1 %v6382_v5  ;;  %v1475_v9 = vld [vmem:[%s10045_s3 + $0x3a0] sm:$0xff] }
 0x238   : > { %2200 = vmatmul.mubr.f32.gmra.mxu0 %v1426_v28  ;;  %2680 = vmatpush2.msra.mxu1 %v5124_v49 }
 0x239   : > { %5922 = vmatprep.mubr.msk.f32.mxu1 %vm1569_vm1, %v1491_v26  ;;  %2681 = vmatprep.subr.mxu1 %v6382_v5  ;;  %v5174_v26 = vld [vmem:[%s7041_s1 + $0x348] sm:$0xff] }
 0x23a   : > { %2876 = vmatprep.subr.mxu0 %v6382_v5  ;;  %5923 = vmatmul.mubr.msk.f32.gmra.mxu1 %vm1569_vm1, %v1498_v8 }
 0x23b   : > { %2682 = vmatpush2.msra.mxu1 %v5123_v4  ;;  %2877 = vmatpush1.msra.mxu0 %v7416_v57  ;;  %v1441_v57 = vld [vmem:[%s10045_s3 + $0x290] sm:$0xff]  ;;  %v6152_v4 = vld [vmem:[%s10045_s3] sm:$0xff] }
 0x23c   : > { %2204 = vmatprep.mubr.f32.mxu0 %v1434_v56  ;;  %2683 = vmatprep.subr.mxu1 %v6382_v5  ;;  %v1483_v56 = vld [vmem:[%s10045_s3 + $0x3e0] sm:$0xff] }
 0x23d   : > { %2205 = vmatmul.mubr.f32.gmra.mxu0 %v1433_v7  ;;  %2684 = vmatpush2.msra.mxu1 %v5122_v39 }
 0x23e   : > { %5925 = vmatprep.mubr.msk.f32.mxu1 %vm1569_vm1, %v1505_v21  ;;  %2685 = vmatprep.subr.mxu1 %v6382_v5  ;;  %v1482_v21 = vld [vmem:[%s10045_s3 + $0x3d8] sm:$0xff] }
 0x23f   : > { %2878 = vmatprep.subr.mxu0 %v6382_v5  ;;  %5926 = vmatmul.mubr.msk.f32.gmra.mxu1 %vm1569_vm1, %v1512_v11 }
 0x240   : > { %2686 = vmatpush2.msra.mxu1 %v5121_v47  ;;  %2879 = vmatpush1.msra.mxu0 %v5132_v52  ;;  %v6153_v52 = vld [vmem:[%s10045_s3 + $0x40] sm:$0xff] }
 0x241   : > { %2209 = vmatprep.mubr.f32.mxu0 %v1441_v57  ;;  %2687 = vmatprep.subr.mxu1 %v6382_v5  ;;  %v5173_v57 = vld [vmem:[%s7041_s1 + $0x340] sm:$0xff] }
 0x242   : > { %2210 = vmatmul.mubr.f32.gmra.mxu0 %v1440_v6  ;;  %2688 = vmatpush2.msra.mxu1 %v5120_v30  ;;  %v1490_v30 = vld [vmem:[%s10045_s3 + $0x418] sm:$0xff] }
 0x243   : > { %5928 = vmatprep.mubr.msk.f32.mxu1 %vm1569_vm1, %v1519_v31  ;;  %2689 = vmatprep.subr.mxu1 %v6382_v5 }
 0x244   : > { %2880 = vmatprep.subr.mxu0 %v6382_v5  ;;  %5929 = vmatmul.mubr.msk.f32.gmra.mxu1 %vm1569_vm1, %v1526_v32 }
 0x245   : > { %2690 = vmatpush2.msra.mxu1 %v5119_v53  ;;  %2881 = vmatpush1.msra.mxu0 %v5131_v54  ;;  %v1489_v53 = vld [vmem:[%s10045_s3 + $0x410] sm:$0xff] }
 0x246   : > { %2214 = vmatprep.mubr.f32.mxu0 %v1448_v1  ;;  %2691 = vmatprep.subr.mxu1 %v6382_v5 }
 0x247   : > { %2215 = vmatmul.mubr.f32.gmra.mxu0 %v1447_v63  ;;  %2692 = vmatpush2.msra.mxu1 %v5118_v15  ;;  %v6155_v63 = vld [vmem:[%s10045_s3 + $0x78] sm:$0xff] }
 0x248   : > { %2882 = vmatprep.subr.mxu0 %v6382_v5  ;;  %5931 = vmatprep.mubr.msk.f32.mxu1 %vm1569_vm1, %v1533_v29  ;;  %v5172_v15 = vld [vmem:[%s7041_s1 + $0x338] sm:$0xff] }
 0x249   : > { %2693 = vmatprep.subr.mxu1 %v6382_v5  ;;  %2883 = vmatpush1.msra.mxu0 %v5130_v55  ;;  %v1497_v55 = vld [vmem:[%s10045_s3 + $0x450] sm:$0xff] }
 0x24a   : > { %5932 = vmatmul.mubr.msk.f32.gmra.mxu1 %vm1569_vm1, %v1540_v33  ;;  %2219 = vmatprep.mubr.f32.mxu0 %v1455_v50 }
 0x24b   : > { %2694 = vmatpush2.msra.mxu1 %v5117_v34  ;;  %2220 = vmatmul.mubr.f32.gmra.mxu0 %v1454_v19  ;;  %v1496_v34 = vld [vmem:[%s10045_s3 + $0x448] sm:$0xff] }
 0x24c   : > { %2695 = vmatprep.subr.mxu1 %v6382_v5  ;;  %2884 = vmatprep.subr.mxu0 %v6382_v5 }
 0x24d   : > { %2696 = vmatpush2.msra.mxu1 %v5116_v35  ;;  %5934 = vmatprep.mubr.msk.f32.mxu1 %vm1569_vm1, %v1547_v58  ;;  %v6157_v58 = vld [vmem:[%s10045_s3 + $0xb0] sm:$0xff] }
 0x24e   : > { %2697 = vmatprep.subr.mxu1 %v6382_v5  ;;  %2885 = vmatpush1.msra.mxu0 %v5129_v38  ;;  %v5171_v38 = vld [vmem:[%s7041_s1 + $0x330] sm:$0xff] }
 0x24f   : > { %5935 = vmatmul.mubr.msk.f32.gmra.mxu1 %vm1569_vm1, %v1554_v3  ;;  %2224 = vmatprep.mubr.f32.mxu0 %v1462_v36 }
 0x250   : > { %2698 = vmatpush2.msra.mxu1 %v5115_v10  ;;  %2225 = vmatmul.mubr.f32.gmra.mxu0 %v1461_v27  ;;  %v1504_v27 = vld [vmem:[%s10045_s3 + $0x488] sm:$0xff] }
 0x251   : > { %2699 = vmatprep.subr.mxu1 %v6382_v5  ;;  %2886 = vmatprep.subr.mxu0 %v6382_v5 }
 0x252   : > { %2700 = vmatpush2.msra.mxu1 %v5114_v40  ;;  %5937 = vmatprep.mubr.msk.f32.mxu1 %vm1569_vm1, %v1561_v2 }
 0x253   : > { %2701 = vmatprep.subr.mxu1 %v6382_v5  ;;  %2887 = vmatpush1.msra.mxu0 %v5128_v59  ;;  %v1726_v61 = vpop.f32.mrf.mxu0  ;;  %v6159_v59 = vld [vmem:[%s10045_s3 + $0xe8] sm:$0xff] }
 0x254   : > { %5938 = vmatmul.mubr.msk.f32.gmra.mxu1 %vm1569_vm1, %v1568_v60  ;;  %2229 = vmatprep.mubr.f32.mxu0 %v1469_v46  ;;  %v1941_v62 = vpop.f32.mrf.mxu1  ;;  %v5170_v60 = vld [vmem:[%s7041_s1 + $0x328] sm:$0xff]  ;;  %v1503_v46 = vld [vmem:[%s10045_s3 + $0x480] sm:$0xff] }
 0x255   : > { %2702 = vmatpush2.msra.mxu1 %v5113_v43  ;;  %2230 = vmatmul.mubr.f32.gmra.mxu0 %v1468_v25  ;;  %v7963_v48 = vadd.f32 %v1941_v62, %v1726_v61  ;;  %v1728_v23 = vpop.f32.mrf.mxu0 }
 0x256   : > { %2703 = vmatprep.subr.mxu1 %v6382_v5  ;;  %2888 = vmatprep.subr.mxu0 %v6382_v5  ;;  %v1943_v0 = vpop.f32.mrf.mxu1 }
 0x257   : > { %2704 = vmatpush2.msra.mxu1 %v5112_v37  ;;  %2889 = vmatpush1.msra.mxu0 %v5127_v13  ;;  %v1731_v28 = vpop.f32.mrf.mxu0  ;;  %v6160_v37 = vld [vmem:[%s10045_s3 + $0xe0] sm:$0xff] }
 0x258   : > { %2705 = vmatprep.subr.mxu1 %v6382_v5  ;;  %2707 = vmatprep.mubr.f32.mxu1 %v6151_v24  ;;  %v1946_v49 = vpop.f32.mrf.mxu1  ;;  %v1511_v13 = vld [vmem:[%s10045_s3 + $0x4c0] sm:$0xff] }
 0x259   : > { %2706 = vmatpush2.msra.mxu1 %v5111_v41  ;;  %2234 = vmatprep.mubr.f32.mxu0 %v1476_v17  ;;  %v7979_v8 = vadd.f32 %v1946_v49, %v1731_v28  ;;  %v1733_v7 = vpop.f32.mrf.mxu0  ;;  %v6161_v41 = vld [vmem:[%s10045_s3 + $0x120] sm:$0xff]  ;;  %v1518_v28 = vld [vmem:[%s10045_s3 + $0x4f8] sm:$0xff] }
 0x25a   : > { %2708 = vmatmul.mubr.f32.vlgmr.msra.gmra.mxu1 %v6152_v4  ;;  %2890 = vmatprep.subr.mxu0 %v6382_v5  ;;  %v1948_v39 = vpop.f32.mrf.mxu1  ;;  %v5169_v17 = vld [vmem:[%s7041_s1 + $0x320] sm:$0xff]  ;;  %v6163_v4 = vld [vmem:[%s10045_s3 + $0x158] sm:$0xff] }
 0x25b   : > { %3073 = vmatprep.subr.mxu1 %v6382_v5  ;;  %2235 = vmatmul.mubr.f32.gmra.mxu0 %v1475_v9  ;;  %v6162_v9 = vld [vmem:[%s10045_s3 + $0x118] sm:$0xff] }
 0x25c   : > { %2891 = vmatpush2.msra.mxu0 %v7518_v51  ;;  %3074 = vmatpush1.msra.mxu1 %v5174_v26  ;;  %v1736_v11 = vpop.f32.mrf.mxu0  ;;  %v1951_v47 = vpop.f32.mrf.mxu1  ;;  %v6154_v51 = vld [vmem:[%s10045_s3 + $0x38] sm:$0xff] }
 0x25d   : > { %2712 = vmatprep.mubr.f32.mxu1 %v6153_v52  ;;  %2239 = vmatprep.mubr.f32.mxu0 %v1483_v56  ;;  %v7997_v6 = vadd.f32 %v1951_v47, %v1736_v11  ;;  %v5168_v56 = vld [vmem:[%s7041_s1 + $0x318] sm:$0xff]  ;;  %v6164_v11 = vld [vmem:[%s10045_s3 + $0x150] sm:$0xff] }
 0x25e   : > { %2713 = vmatmul.mubr.f32.gmra.mxu1 %v6154_v51  ;;  %2892 = vmatprep.subr.mxu0 %v6382_v5  ;;  %v1738_v31 = vpop.f32.mrf.mxu0  ;;  %v1953_v32 = vpop.f32.mrf.mxu1  ;;  %v1525_v47 = vld [vmem:[%s10045_s3 + $0x530] sm:$0xff] }
 0x25f   : > { %3075 = vmatprep.subr.mxu1 %v6382_v5  ;;  %2240 = vmatmul.mubr.f32.gmra.mxu0 %v1482_v21  ;;  %v6165_v51 = vld [vmem:[%s10045_s3 + $0x190] sm:$0xff] }
 0x260   : > { %2893 = vmatpush2.msra.mxu0 %v7535_v14  ;;  %3076 = vmatpush1.msra.mxu1 %v5173_v57  ;;  %v1741_v54 = vpop.f32.mrf.mxu0  ;;  %v1956_v1 = vpop.f32.mrf.mxu1  ;;  %v6156_v14 = vld [vmem:[%s10045_s3 + $0x70] sm:$0xff] }
 0x261   : > { %2717 = vmatprep.mubr.f32.mxu1 %v6155_v63  ;;  %2244 = vmatprep.mubr.f32.mxu0 %v1490_v30  ;;  %v8015_v29 = vadd.f32 %v1956_v1, %v1741_v54  ;;  %v5167_v30 = vld [vmem:[%s7041_s1 + $0x310] sm:$0xff]  ;;  %v6166_v54 = vld [vmem:[%s10045_s3 + $0x188] sm:$0xff] }
 0x262   : > { %2718 = vmatmul.mubr.f32.gmra.mxu1 %v6156_v14  ;;  %2894 = vmatprep.subr.mxu0 %v6382_v5  ;;  %v1743_v33 = vpop.f32.mrf.mxu0  ;;  %v1958_v50 = vpop.f32.mrf.mxu1  ;;  %v1532_v1 = vld [vmem:[%s10045_s3 + $0x568] sm:$0xff]  ;;  %v1531_v14 = vld [vmem:[%s10045_s3 + $0x560] sm:$0xff] }
 0x263   : > { %3077 = vmatprep.subr.mxu1 %v6382_v5  ;;  %2245 = vmatmul.mubr.f32.gmra.mxu0 %v1489_v53 }
 0x264   : > { %2895 = vmatpush2.msra.mxu0 %v7545_v42  ;;  %3078 = vmatpush1.msra.mxu1 %v5172_v15  ;;  %v1746_v19 = vpop.f32.mrf.mxu0  ;;  %v1961_v35 = vpop.f32.mrf.mxu1  ;;  %v6158_v42 = vld [vmem:[%s10045_s3 + $0xa8] sm:$0xff] }
 0x265   : > { %2722 = vmatprep.mubr.f32.mxu1 %v6157_v58  ;;  %2249 = vmatprep.mubr.f32.mxu0 %v1497_v55  ;;  %v8033_v3 = vadd.f32 %v1961_v35, %v1746_v19  ;;  %v6169_v19 = vld [vmem:[%s10045_s3 + $0x1c0] sm:$0xff] }
 0x266   : > { %2723 = vmatmul.mubr.f32.gmra.mxu1 %v6158_v42  ;;  %2896 = vmatprep.subr.mxu0 %v6382_v5  ;;  %v1748_v36 = vpop.f32.mrf.mxu0  ;;  %v1963_v10 = vpop.f32.mrf.mxu1  ;;  %v1539_v35 = vld [vmem:[%s10045_s3 + $0x5a0] sm:$0xff] }
 0x267   : > { %3079 = vmatprep.subr.mxu1 %v6382_v5  ;;  %2250 = vmatmul.mubr.f32.gmra.mxu0 %v1496_v34  ;;  %v6168_v34 = vld [vmem:[%s7041_s1 + $0x308] sm:$0xff]  ;;  %v6170_v36 = vld [vmem:[%s10045_s3 + $0x200] sm:$0xff] }
 0x268   : > { %2897 = vmatpush2.msra.mxu0 %v7555_v20  ;;  %3080 = vmatpush1.msra.mxu1 %v5171_v38  ;;  %v1751_v40 = vpop.f32.mrf.mxu0  ;;  %v1966_v2 = vpop.f32.mrf.mxu1 }
 0x269   : > { %2727 = vmatprep.mubr.f32.mxu1 %v6159_v59  ;;  %2898 = vmatprep.subr.mxu0 %v6382_v5  ;;  %v8052_v43 = vadd.f32 %v1966_v2, %v1751_v40  ;;  %v6171_v40 = vld [vmem:[%s7041_s1 + $0x300] sm:$0xff]  ;;  %v5148_v2 = vld [vmem:[%s7041_s1 + $0x278] sm:$0xff] }
 0x26a   : > { %3081 = vmatprep.subr.mxu1 %v6382_v5  ;;  %2254 = vmatprep.mubr.f32.mxu0 %v1504_v27  ;;  %v1753_v20 = vpop.f32.mrf.mxu0  ;;  %v1968_v25 = vpop.f32.mrf.mxu1  ;;  %v6172_v59 = vld [vmem:[%s10045_s3 + $0x1f8] sm:$0xff] }
 0x26b   : > { %2728 = vmatmul.mubr.f32.gmra.mxu1 %v6160_v37  ;;  %2899 = vmatpush2.msra.mxu0 %v7573_v44  ;;  %v1510_v44 = vld [vmem:[%s10045_s3 + $0x4b8] sm:$0xff]  ;;  %v1545_v25 = vld [vmem:[%s10045_s3 + $0x5d0] sm:$0xff] }
 0x26c   : > { %3082 = vmatpush1.msra.mxu1 %v5170_v60  ;;  %2255 = vmatmul.mubr.f32.gmra.mxu0 %v1503_v46  ;;  %v1756_v61 = vpop.f32.mrf.mxu0  ;;  %v1971_v62 = vpop.f32.mrf.mxu1  ;;  %v5164_v60 = vld [vmem:[%s7041_s1 + $0x2f8] sm:$0xff] }
 0x26d   : > { %2732 = vmatprep.mubr.f32.mxu1 %v6161_v41  ;;  %2900 = vmatprep.subr.mxu0 %v6382_v5  ;;  %v8070_v23 = vadd.f32 %v1971_v62, %v1756_v61  ;;  %v1546_v46 = vld [vmem:[%s10045_s3 + $0x5d8] sm:$0xff]  ;;  %v5147_v41 = vld [vmem:[%s7041_s1 + $0x270] sm:$0xff] }
 0x26e   : > { %3083 = vmatprep.subr.mxu1 %v6382_v5  ;;  %2259 = vmatprep.mubr.f32.mxu0 %v1511_v13  ;;  %v1758_v0 = vpop.f32.mrf.mxu0  ;;  %v1973_v24 = vpop.f32.mrf.mxu1  ;;  %v6173_v13 = vld [vmem:[%s10045_s3 + $0x238] sm:$0xff] }
 0x26f   : > { %2733 = vmatmul.mubr.f32.gmra.mxu1 %v6162_v9  ;;  %2901 = vmatpush2.msra.mxu0 %v7590_v18  ;;  %v1517_v18 = vld [vmem:[%s10045_s3 + $0x4f0] sm:$0xff] }
 0x270   : > { %3084 = vmatpush1.msra.mxu1 %v5169_v17  ;;  %2260 = vmatmul.mubr.f32.gmra.mxu0 %v1510_v44  ;;  %v1761_v49 = vpop.f32.mrf.mxu0  ;;  %v1976_v26 = vpop.f32.mrf.mxu1  ;;  %v6174_v17 = vld [vmem:[%s10045_s3 + $0x230] sm:$0xff] }
 0x271   : > { %2737 = vmatprep.mubr.f32.mxu1 %v6163_v4  ;;  %2902 = vmatprep.subr.mxu0 %v6382_v5  ;;  %v8088_v7 = vadd.f32 %v1976_v26, %v1761_v49  ;;  %v5163_v44 = vld [vmem:[%s7041_s1 + $0x2f0] sm:$0xff] }
 0x272   : > { %3085 = vmatprep.subr.mxu1 %v6382_v5  ;;  %2264 = vmatprep.mubr.f32.mxu0 %v1518_v28  ;;  %v1763_v39 = vpop.f32.mrf.mxu0  ;;  %v1978_v21 = vpop.f32.mrf.mxu1  ;;  %v1553_v0 = vld [vmem:[%s10045_s3 + $0x610] sm:$0xff]  ;;  %v1552_v28 = vld [vmem:[%s10045_s3 + $0x608] sm:$0xff] }
 0x273   : > { %2738 = vmatmul.mubr.f32.gmra.mxu1 %v6164_v11  ;;  %2903 = vmatpush2.msra.mxu0 %v7607_v45  ;;  %v1524_v45 = vld [vmem:[%s10045_s3 + $0x528] sm:$0xff]  ;;  %v6175_v26 = vld [vmem:[%s10045_s3 + $0x270] sm:$0xff] }
 0x274   : > { %3086 = vmatpush1.msra.mxu1 %v5168_v56  ;;  %2265 = vmatmul.mubr.f32.gmra.mxu0 %v1517_v18  ;;  %v1766_v52 = vpop.f32.mrf.mxu0  ;;  %v1981_v57 = vpop.f32.mrf.mxu1  ;;  %v5146_v18 = vld [vmem:[%s7041_s1 + $0x268] sm:$0xff] }
 0x275   : > { %2742 = vmatprep.mubr.f32.mxu1 %v6165_v51  ;;  %2904 = vmatprep.subr.mxu0 %v6382_v5  ;;  %v8106_v31 = vadd.f32 %v1981_v57, %v1766_v52  ;;  %v5162_v39 = vld [vmem:[%s7041_s1 + $0x2e8] sm:$0xff]  ;;  %v1559_v57 = vld [vmem:[%s10045_s3 + $0x640] sm:$0xff] }
 0x276   : > { %3087 = vmatprep.subr.mxu1 %v6382_v5  ;;  %2269 = vmatprep.mubr.f32.mxu0 %v1525_v47  ;;  %v1768_v32 = vpop.f32.mrf.mxu0  ;;  %v1983_v53 = vpop.f32.mrf.mxu1  ;;  %v6176_v21 = vld [vmem:[%s10045_s3 + $0x268] sm:$0xff] }
 0x277   : > { %2743 = vmatmul.mubr.f32.gmra.mxu1 %v6166_v54  ;;  %2905 = vmatpush2.msra.mxu0 %v7624_v12  ;;  %v6167_v12 = vld [vmem:[%s10045_s3 + $0x1c8] sm:$0xff]  ;;  %v5145_v53 = vld [vmem:[%s7041_s1 + $0x260] sm:$0xff] }
 0x278   : > { %3088 = vmatpush1.msra.mxu1 %v5167_v30  ;;  %2270 = vmatmul.mubr.f32.gmra.mxu0 %v1524_v45  ;;  %v1771_v63 = vpop.f32.mrf.mxu0  ;;  %v1986_v15 = vpop.f32.mrf.mxu1  ;;  %v1560_v11 = vld [vmem:[%s10045_s3 + $0x648] sm:$0xff]  ;;  %v5161_v54 = vld [vmem:[%s7041_s1 + $0x2e0] sm:$0xff] }
 0x279   : > { %2906 = vmatprep.subr.mxu0 %v6382_v5  ;;  %3089 = vmatprep.subr.mxu1 %v6382_v5  ;;  %v8121_v55 = vadd.f32 %v1986_v15, %v1771_v63  ;;  %v6177_v32 = vld [vmem:[%s10045_s3 + $0x2a8] sm:$0xff]  ;;  %v1567_v63 = vld [vmem:[%s10045_s3 + $0x680] sm:$0xff] }
 0x27a   : > { %2747 = vmatprep.mubr.f32.mxu1 %v6167_v12  ;;  %2907 = vmatpush2.msra.mxu0 %v7641_v16  ;;  %v1773_v33 = vpop.f32.mrf.mxu0  ;;  %v1988_v50 = vpop.f32.mrf.mxu1  ;;  %v1538_v16 = vld [vmem:[%s10045_s3 + $0x598] sm:$0xff] }
 0x27b   : > { %3090 = vmatpush1.msra.mxu1 %v6168_v34  ;;  %2274 = vmatprep.mubr.f32.mxu0 %v1532_v1  ;;  %v6178_v1 = vld [vmem:[%s10045_s3 + $0x2a0] sm:$0xff]  ;;  %v1566_v12 = vld [vmem:[%s10045_s3 + $0x678] sm:$0xff] }
 0x27c   : > { %2748 = vmatmul.mubr.f32.gmra.mxu1 %v6169_v19  ;;  %2275 = vmatmul.mubr.f32.gmra.mxu0 %v1531_v14  ;;  %v1776_v58 = vpop.f32.mrf.mxu0  ;;  %v1991_v38 = vpop.f32.mrf.mxu1  ;;  %v6179_v19 = vld [vmem:[%s10045_s3 + $0x2e0] sm:$0xff] }
 0x27d   : > { %2908 = vmatprep.subr.mxu0 %v6382_v5  ;;  %3091 = vmatprep.subr.mxu1 %v6382_v5  ;;  %v8139_v42 = vadd.f32 %v1991_v38, %v1776_v58  ;;  %v5160_v58 = vld [vmem:[%s7041_s1 + $0x2d8] sm:$0xff] }
 0x27e   : > { %2752 = vmatprep.mubr.f32.mxu1 %v6170_v36  ;;  %2909 = vmatpush2.msra.mxu0 %v7655_v22  ;;  %v1778_v10 = vpop.f32.mrf.mxu0  ;;  %v1993_v27 = vpop.f32.mrf.mxu1  ;;  %v6180_v38 = vld [vmem:[%s10045_s3 + $0x2d8] sm:$0xff] }
 0x27f   : > { %3092 = vmatpush1.msra.mxu1 %v6171_v40  ;;  %2279 = vmatprep.mubr.f32.mxu0 %v1539_v35  ;;  %v5144_v35 = vld [vmem:[%s7041_s1 + $0x258] sm:$0xff]  ;;  %v5143_v10 = vld [vmem:[%s7041_s1 + $0x250] sm:$0xff] }
 0x280   : > { %2753 = vmatmul.mubr.f32.gmra.mxu1 %v6172_v59  ;;  %2280 = vmatmul.mubr.f32.gmra.mxu0 %v1538_v16  ;;  %v1781_v20 = vpop.f32.mrf.mxu0  ;;  %v1996_v22 = vpop.f32.mrf.mxu1  ;;  %v6181_v59 = vld [vmem:[%s10045_s3 + $0x318] sm:$0xff] }
 0x281   : > { %2910 = vmatprep.subr.mxu0 %v6382_v5  ;;  %3093 = vmatprep.subr.mxu1 %v6382_v5  ;;  %v8159_v37 = vadd.f32 %v1996_v22, %v1781_v20 }
 0x282   : > { %2757 = vmatprep.mubr.f32.mxu1 %v6173_v13  ;;  %2911 = vmatpush2.msra.mxu0 %v5148_v2  ;;  %v1783_v61 = vpop.f32.mrf.mxu0  ;;  %v1998_v62 = vpop.f32.mrf.mxu1 }
 0x283   : > { %3094 = vmatpush1.msra.mxu1 %v5164_v60  ;;  %2284 = vmatprep.mubr.f32.mxu0 %v1546_v46  ;;  %v5159_v60 = vld [vmem:[%s7041_s1 + $0x2d0] sm:$0xff]  ;;  %v5198_v62 = vld [vmem:[%s7041_s1 + $0x408] sm:$0xff] }
 0x284   : > { %2758 = vmatmul.mubr.f32.gmra.mxu1 %v6174_v17  ;;  %2285 = vmatmul.mubr.f32.gmra.mxu0 %v1545_v25  ;;  %v1786_v24 = vpop.f32.mrf.mxu0  ;;  %v2001_v9 = vpop.f32.mrf.mxu1  ;;  %v6182_v46 = vld [vmem:[%s10045_s3 + $0x310] sm:$0xff]  ;;  %v6183_v25 = vld [vmem:[%s10045_s3 + $0x18] sm:$0xff] }
 0x285   : > { %2912 = vmatprep.subr.mxu0 %v6382_v5  ;;  %3095 = vmatprep.subr.mxu1 %v6382_v5  ;;  %v8177_v49 = vadd.f32 %v2001_v9, %v1786_v24  ;;  %v6184_v61 = vld [vmem:[%s10045_s3 + $0x10] sm:$0xff]  ;;  %v6187_v9 = vld [vmem:[%s10045_s3 + $0x348] sm:$0xff] }
 0x286   : > { %2762 = vmatprep.mubr.f32.mxu1 %v6175_v26  ;;  %2913 = vmatpush2.msra.mxu0 %v5147_v41  ;;  %v1788_v4 = vpop.f32.mrf.mxu0  ;;  %v2003_v56 = vpop.f32.mrf.mxu1  ;;  %v5190_v41 = vld [vmem:[%s7041_s1 + $0x3c8] sm:$0xff]  ;;  %v6186_v24 = vld [vmem:[%s10045_s3 + $0x50] sm:$0xff] }
 0x287   : > { %3096 = vmatpush1.msra.mxu1 %v5163_v44  ;;  %2289 = vmatprep.mubr.f32.mxu0 %v1553_v0  ;;  %v6185_v0 = vld [vmem:[%s10045_s3 + $0x350] sm:$0xff]  ;;  %v6188_v56 = vld [vmem:[%s10045_s3 + $0x48] sm:$0xff] }
 0x288   : > { %2763 = vmatmul.mubr.f32.gmra.mxu1 %v6176_v21  ;;  %2290 = vmatmul.mubr.f32.gmra.mxu0 %v1552_v28  ;;  %v1791_v47 = vpop.f32.mrf.mxu0  ;;  %v2006_v52 = vpop.f32.mrf.mxu1 }
 0x289   : > { %2914 = vmatprep.subr.mxu0 %v6382_v5  ;;  %3097 = vmatprep.subr.mxu1 %v6382_v5  ;;  %v8195_v51 = vadd.f32 %v2006_v52, %v1791_v47  ;;  %v6190_v47 = vld [vmem:[%s10045_s3 + $0x88] sm:$0xff]  ;;  %v6191_v52 = vld [vmem:[%s10045_s3 + $0x380] sm:$0xff] }
 0x28a   : > { %2915 = vmatpush2.msra.mxu0 %v5146_v18  ;;  %3098 = vmatpush1.msra.mxu1 %v5162_v39  ;;  %v1793_v30 = vpop.f32.mrf.mxu0  ;;  %v2008_v45 = vpop.f32.mrf.mxu1  ;;  %v6189_v18 = vld [vmem:[%s10045_s3 + $0x388] sm:$0xff]  ;;  %v5189_v39 = vld [vmem:[%s7041_s1 + $0x3c0] sm:$0xff] }
 0x28b   : > { %2767 = vmatprep.mubr.f32.mxu1 %v6177_v32  ;;  %2294 = vmatprep.mubr.f32.mxu0 %v1560_v11  ;;  %v6192_v32 = vld [vmem:[%s10045_s3 + $0x3c0] sm:$0xff] }
 0x28c   : > { %2768 = vmatmul.mubr.f32.gmra.mxu1 %v6178_v1  ;;  %2295 = vmatmul.mubr.f32.gmra.mxu0 %v1559_v57  ;;  %v1796_v15 = vpop.f32.mrf.mxu0  ;;  %v2011_v14 = vpop.f32.mrf.mxu1  ;;  %v5188_v57 = vld [vmem:[%s7041_s1 + $0x3b8] sm:$0xff]  ;;  %v5187_v1 = vld [vmem:[%s7041_s1 + $0x3b0] sm:$0xff] }
 0x28d   : > { %2916 = vmatprep.subr.mxu0 %v6382_v5  ;;  %3099 = vmatprep.subr.mxu1 %v6382_v5  ;;  %v8213_v33 = vadd.f32 %v2011_v14, %v1796_v15  ;;  %v6194_v14 = vld [vmem:[%s10045_s3 + $0xc0] sm:$0xff] }
 0x28e   : > { %2917 = vmatpush2.msra.mxu0 %v5145_v53  ;;  %3100 = vmatpush1.msra.mxu1 %v5161_v54  ;;  %v1798_v50 = vpop.f32.mrf.mxu0  ;;  %v2013_v34 = vpop.f32.mrf.mxu1  ;;  %v6193_v54 = vld [vmem:[%s10045_s3 + $0x80] sm:$0xff] }
 0x28f   : > { %2772 = vmatprep.mubr.f32.mxu1 %v6179_v19  ;;  %2299 = vmatprep.mubr.f32.mxu0 %v1567_v63  ;;  %v5197_v50 = vld [vmem:[%s7041_s1 + $0x400] sm:$0xff] }
 0x290   : > { %2773 = vmatmul.mubr.f32.gmra.mxu1 %v6180_v38  ;;  %2300 = vmatmul.mubr.f32.gmra.mxu0 %v1566_v12  ;;  %v1801_v16 = vpop.f32.mrf.mxu0  ;;  %v2016_v36 = vpop.f32.mrf.mxu1  ;;  %v6195_v12 = vld [vmem:[%s10045_s3 + $0x3b8] sm:$0xff] }
 0x291   : > { %2918 = vmatprep.subr.mxu0 %v6382_v5  ;;  %3101 = vmatprep.subr.mxu1 %v6382_v5  ;;  %v8226_v27 = vadd.f32 %v2016_v36, %v1801_v16  ;;  %v6197_v38 = vld [vmem:[%s10045_s3 + $0xb8] sm:$0xff]  ;;  %v5186_v16 = vld [vmem:[%s7041_s1 + $0x3a8] sm:$0xff] }
 0x292   : > { %2919 = vmatpush2.msra.mxu0 %v5144_v35  ;;  %3102 = vmatpush1.msra.mxu1 %v5160_v58  ;;  %v1803_v40 = vpop.f32.mrf.mxu0  ;;  %v2018_v2 = vpop.f32.mrf.mxu1  ;;  %v6196_v35 = vld [vmem:[%s10045_s3 + $0x3f8] sm:$0xff] }
 0x293   : > { %2777 = vmatprep.mubr.f32.mxu1 %v6181_v59  ;;  %2920 = vmatprep.subr.mxu0 %v6382_v5  ;;  %v6198_v40 = vld [vmem:[%s10045_s3 + $0xf8] sm:$0xff]  ;;  %v6199_v2 = vld [vmem:[%s10045_s3 + $0x3f0] sm:$0xff]  ;;  %v5185_v59 = vld [vmem:[%s7041_s1 + $0x3a0] sm:$0xff] }
 0x294   : > { %2778 = vmatmul.mubr.f32.gmra.mxu1 %v6182_v46  ;;  %2921 = vmatpush2.msra.mxu0 %v5143_v10  ;;  %v1806_v20 = vpop.f32.mrf.mxu0  ;;  %v2021_v22 = vpop.f32.mrf.mxu1 }
 0x295   : > { %2922 = vmatprep.mubr.f32.mxu0 %v6183_v25  ;;  %3103 = vmatprep.subr.mxu1 %v6382_v5  ;;  %v8240_v13 = vadd.f32 %v2021_v22, %v1806_v20  ;;  %v6200_v20 = vld [vmem:[%s10045_s3 + $0x430] sm:$0xff] }
 0x296   : > { %2923 = vmatmul.mubr.f32.vlgmr.msra.gmra.mxu0 %v6184_v61  ;;  %3104 = vmatpush1.msra.mxu1 %v5159_v60  ;;  %v1808_v17 = vpop.f32.mrf.mxu0  ;;  %v2023_v44 = vpop.f32.mrf.mxu1  ;;  %v6201_v25 = vld [vmem:[%s10045_s3 + $0xf0] sm:$0xff]  ;;  %v5184_v61 = vld [vmem:[%s7041_s1 + $0x398] sm:$0xff] }
 0x297   : > { %2782 = vmatprep.mubr.f32.mxu1 %v6185_v0  ;;  %2927 = vmatprep.mubr.f32.mxu0 %v6186_v24  ;;  %v6202_v17 = vld [vmem:[%s10045_s3 + $0x130] sm:$0xff]  ;;  %v6203_v44 = vld [vmem:[%s10045_s3 + $0x428] sm:$0xff] }
 0x298   : > { %2783 = vmatmul.mubr.f32.gmra.mxu1 %v6187_v9  ;;  %3105 = vmatprep.subr.mxu1 %v6382_v5  ;;  %v1811_v28 = vpop.f32.mrf.mxu0  ;;  %v2026_v26 = vpop.f32.mrf.mxu1  ;;  %v5183_v0 = vld [vmem:[%s7041_s1 + $0x390] sm:$0xff] }
 0x299   : > { %5940 = vmatprep.subr.mxu0 %v5198_v62  ;;  %3106 = vmatpush2.msra.mxu1 %v5190_v41  ;;  %v8257_v4 = vadd.f32 %v2026_v26, %v1811_v28  ;;  %v6204_v28 = vld [vmem:[%s10045_s3 + $0x468] sm:$0xff] }
 0x29a   : > { %2928 = vmatmul.mubr.f32.gmra.mxu0 %v6188_v56  ;;  %2787 = vmatprep.mubr.f32.mxu1 %v6189_v18  ;;  %v1813_v21 = vpop.f32.mrf.mxu0  ;;  %v2028_v11 = vpop.f32.mrf.mxu1  ;;  %v6205_v56 = vld [vmem:[%s10045_s3 + $0x128] sm:$0xff]  ;;  %v5196_v18 = vld [vmem:[%s7041_s1 + $0x3f8] sm:$0xff] }
 0x29b   : > { %5941 = vmatpush3.msra.mxu0 %v5198_v62  ;;  %2932 = vmatprep.mubr.f32.mxu0 %v6190_v47  ;;  %v6206_v11 = vld [vmem:[%s10045_s3 + $0x168] sm:$0xff] }
 0x29c   : > { %2788 = vmatmul.mubr.f32.gmra.mxu1 %v6191_v52  ;;  %3107 = vmatprep.subr.mxu1 %v6382_v5  ;;  %v1816_v30 = vpop.f32.mrf.mxu0  ;;  %v2031_v45 = vpop.f32.mrf.mxu1  ;;  %v5182_v47 = vld [vmem:[%s7041_s1 + $0x388] sm:$0xff]  ;;  %v6207_v52 = vld [vmem:[%s10045_s3 + $0x460] sm:$0xff] }
 0x29d   : > { %3108 = vmatpush2.msra.mxu1 %v5189_v39  ;;  %2792 = vmatprep.mubr.f32.mxu1 %v6192_v32  ;;  %v8277_v53 = vadd.f32 %v2031_v45, %v1816_v30  ;;  %v6208_v45 = vld [vmem:[%s10045_s3 + $0x4a0] sm:$0xff] }
 0x29e   : > { %2933 = vmatmul.mubr.f32.gmra.mxu0 %v6193_v54  ;;  %3109 = vmatprep.subr.mxu1 %v6382_v5  ;;  %v1818_v63 = vpop.f32.mrf.mxu0  ;;  %v2033_v15 = vpop.f32.mrf.mxu1  ;;  %v6209_v54 = vld [vmem:[%s10045_s3 + $0x160] sm:$0xff] }
 0x29f   : > { %2937 = vmatprep.mubr.f32.mxu0 %v6194_v14  ;;  %3110 = vmatpush2.msra.mxu1 %v5188_v57  ;;  %v6210_v14 = vld [vmem:[%s10045_s3 + $0x1a0] sm:$0xff] }
 0x2a0   : > { %2793 = vmatmul.mubr.f32.gmra.mxu1 %v6195_v12  ;;  %3111 = vmatprep.subr.mxu1 %v6382_v5  ;;  %v1821_v34 = vpop.f32.mrf.mxu0  ;;  %v2036_v19 = vpop.f32.mrf.mxu1  ;;  %v6211_v12 = vld [vmem:[%s10045_s3 + $0x498] sm:$0xff] }
 0x2a1   : > { %2797 = vmatprep.mubr.f32.mxu1 %v6196_v35  ;;  %3112 = vmatpush2.msra.mxu1 %v5187_v1  ;;  %v8295_v58 = vadd.f32 %v2036_v19, %v1821_v34  ;;  %v5181_v1 = vld [vmem:[%s7041_s1 + $0x380] sm:$0xff]  ;;  %v6212_v35 = vld [vmem:[%s10045_s3 + $0x4d8] sm:$0xff] }
 0x2a2   : > { %2938 = vmatmul.mubr.f32.gmra.mxu0 %v6197_v38  ;;  %3113 = vmatprep.subr.mxu1 %v6382_v5  ;;  %v1823_v36 = vpop.f32.mrf.mxu0  ;;  %v2038_v10 = vpop.f32.mrf.mxu1 }
 0x2a3   : > { %2942 = vmatprep.mubr.f32.mxu0 %v6198_v40  ;;  %5942 = vmatprep.subr.mxu0 %v5197_v50  ;;  %v5179_v40 = vld [vmem:[%s7041_s1 + $0x370] sm:$0xff] }
 0x2a4   : > { %2798 = vmatmul.mubr.f32.gmra.mxu1 %v6199_v2  ;;  %5943 = vmatpush3.msra.mxu0 %v5197_v50  ;;  %v1826_v60 = vpop.f32.mrf.mxu0  ;;  %v2041_v46 = vpop.f32.mrf.mxu1  ;;  %v5180_v50 = vld [vmem:[%s7041_s1 + $0x378] sm:$0xff] }
 0x2a5   : > { %2802 = vmatprep.mubr.f32.mxu1 %v6200_v20  ;;  %3114 = vmatpush2.msra.mxu1 %v5186_v16  ;;  %v8312_v22 = vadd.f32 %v2041_v46, %v1826_v60  ;;  %v6213_v16 = vld [vmem:[%s10045_s3 + $0x198] sm:$0xff]  ;;  %v5195_v20 = vld [vmem:[%s7041_s1 + $0x3f0] sm:$0xff] }
 0x2a6   : > { %2943 = vmatmul.mubr.f32.gmra.mxu0 %v6201_v25  ;;  %3115 = vmatprep.subr.mxu1 %v6382_v5  ;;  %v1828_v62 = vpop.f32.mrf.mxu0  ;;  %v2043_v41 = vpop.f32.mrf.mxu1  ;;  %v6214_v2 = vld [vmem:[%s10045_s3 + $0x1d8] sm:$0xff]  ;;  %v6216_v25 = vld [vmem:[%s10045_s3 + $0x510] sm:$0xff] }
 0x2a7   : > { %2947 = vmatprep.mubr.f32.mxu0 %v6202_v17  ;;  %3116 = vmatpush2.msra.mxu1 %v5185_v59  ;;  %v6215_v59 = vld [vmem:[%s10045_s3 + $0x4d0] sm:$0xff]  ;;  %v5178_v41 = vld [vmem:[%s7041_s1 + $0x368] sm:$0xff] }
 0x2a8   : > { %2803 = vmatmul.mubr.f32.gmra.mxu1 %v6203_v44  ;;  %3117 = vmatprep.subr.mxu1 %v6382_v5  ;;  %v1831_v24 = vpop.f32.mrf.mxu0  ;;  %v2046_v9 = vpop.f32.mrf.mxu1  ;;  %v6217_v62 = vld [vmem:[%s10045_s3 + $0x1d0] sm:$0xff] }
 0x2a9   : > { %2807 = vmatprep.mubr.f32.mxu1 %v6204_v28  ;;  %3118 = vmatpush2.msra.mxu1 %v5184_v61  ;;  %v8330_v26 = vadd.f32 %v2046_v9, %v1831_v24  ;;  %v6219_v24 = vld [vmem:[%s10045_s3 + $0x508] sm:$0xff] }
 0x2aa   : > { %2948 = vmatmul.mubr.f32.gmra.mxu0 %v6205_v56  ;;  %3119 = vmatprep.subr.mxu1 %v6382_v5  ;;  %v1833_v39 = vpop.f32.mrf.mxu0  ;;  %v2048_v21 = vpop.f32.mrf.mxu1  ;;  %v5177_v56 = vld [vmem:[%s7041_s1 + $0x360] sm:$0xff] }
 0x2ab   : > { %2952 = vmatprep.mubr.f32.mxu0 %v6206_v11  ;;  %3120 = vmatpush2.msra.mxu1 %v5183_v0  ;;  %v6218_v0 = vld [vmem:[%s10045_s3 + $0x210] sm:$0xff]  ;;  %v6221_v21 = vld [vmem:[%s10045_s3 + $0x208] sm:$0xff] }
 0x2ac   : > { %2808 = vmatmul.mubr.f32.gmra.mxu1 %v6207_v52  ;;  %3121 = vmatprep.subr.mxu1 %v6382_v5  ;;  %v1836_v57 = vpop.f32.mrf.mxu0  ;;  %v2051_v30 = vpop.f32.mrf.mxu1  ;;  %v5176_v52 = vld [vmem:[%s7041_s1 + $0x358] sm:$0xff] }
 0x2ad   : > { %2812 = vmatprep.mubr.f32.mxu1 %v6208_v45  ;;  %5944 = vmatprep.subr.mxu0 %v5196_v18  ;;  %v8348_v32 = vadd.f32 %v2051_v30, %v1836_v57  ;;  %v6222_v57 = vld [vmem:[%s10045_s3 + $0x248] sm:$0xff]  ;;  %v6223_v30 = vld [vmem:[%s10045_s3 + $0x540] sm:$0xff] }
 0x2ae   : > { %2953 = vmatmul.mubr.f32.gmra.mxu0 %v6209_v54  ;;  %3122 = vmatpush2.msra.mxu1 %v5182_v47  ;;  %v1838_v63 = vpop.f32.mrf.mxu0  ;;  %v2053_v15 = vpop.f32.mrf.mxu1 }
 0x2af   : > { %2957 = vmatprep.mubr.f32.mxu0 %v6210_v14  ;;  %5945 = vmatpush3.msra.mxu0 %v5196_v18  ;;  %v6220_v18 = vld [vmem:[%s10045_s3 + $0x548] sm:$0xff]  ;;  %v6224_v63 = vld [vmem:[%s10045_s3 + $0x580] sm:$0xff] }
 0x2b0   : > { %2813 = vmatmul.mubr.f32.gmra.mxu1 %v6211_v12  ;;  %3123 = vmatprep.subr.mxu1 %v6382_v5  ;;  %v1841_v34 = vpop.f32.mrf.mxu0  ;;  %v2056_v19 = vpop.f32.mrf.mxu1  ;;  %v5194_v14 = vld [vmem:[%s7041_s1 + $0x3e8] sm:$0xff]  ;;  %v6225_v12 = vld [vmem:[%s10045_s3 + $0x240] sm:$0xff] }
 0x2b1   : > { %2817 = vmatprep.mubr.f32.mxu1 %v6212_v35  ;;  %3124 = vmatpush2.msra.mxu1 %v5181_v1  ;;  %v8365_v38 = vadd.f32 %v2056_v19, %v1841_v34  ;;  %v5175_v1 = vld [vmem:[%s7041_s1 + $0x350] sm:$0xff]  ;;  %v6226_v19 = vld [vmem:[%s10045_s3 + $0x280] sm:$0xff] }
 0x2b2   : > { %2958 = vmatmul.mubr.f32.gmra.mxu0 %v6213_v16  ;;  %3125 = vmatprep.subr.mxu1 %v6382_v5  ;;  %v1843_v36 = vpop.f32.mrf.mxu0  ;;  %v2058_v10 = vpop.f32.mrf.mxu1  ;;  %v5193_v35 = vld [vmem:[%s7041_s1 + $0x3e0] sm:$0xff]  ;;  %v6227_v16 = vld [vmem:[%s10045_s3 + $0x578] sm:$0xff] }
 0x2b3   : > { %2962 = vmatprep.mubr.f32.mxu0 %v6214_v2  ;;  %3126 = vmatpush2.msra.mxu1 %v5180_v50  ;;  %v5192_v2 = vld [vmem:[%s7041_s1 + $0x3d8] sm:$0xff] }
 0x2b4   : > { %2818 = vmatmul.mubr.f32.gmra.mxu1 %v6215_v59  ;;  %3127 = vmatprep.subr.mxu1 %v6382_v5  ;;  %v1846_v60 = vpop.f32.mrf.mxu0  ;;  %v2061_v46 = vpop.f32.mrf.mxu1  ;;  %v6229_v59 = vld [vmem:[%s10045_s3 + $0x278] sm:$0xff] }
 0x2b5   : > { %2822 = vmatprep.mubr.f32.mxu1 %v6216_v25  ;;  %3128 = vmatpush2.msra.mxu1 %v5179_v40  ;;  %v8383_v61 = vadd.f32 %v2061_v46, %v1846_v60  ;;  %v5191_v25 = vld [vmem:[%s7041_s1 + $0x3d0] sm:$0xff] }
 0x2b6   : > { %2963 = vmatmul.mubr.f32.gmra.mxu0 %v6217_v62  ;;  %3129 = vmatprep.subr.mxu1 %v6382_v5  ;;  %v1848_v17 = vpop.f32.mrf.mxu0  ;;  %v2063_v44 = vpop.f32.mrf.mxu1  ;;  %v6231_v62 = vld [vmem:[%s10045_s3 + $0x5b0] sm:$0xff] }
 0x2b7   : > { %2967 = vmatprep.mubr.f32.mxu0 %v6218_v0  ;;  %5946 = vmatprep.subr.mxu0 %v5195_v20  ;;  %v6232_v44 = vld [vmem:[%s10045_s3 + $0x5f0] sm:$0xff] }
 0x2b8   : > { %2823 = vmatmul.mubr.f32.gmra.mxu1 %v6219_v24  ;;  %5947 = vmatpush3.msra.mxu0 %v5195_v20  ;;  %v1851_v9 = vpop.f32.mrf.mxu0  ;;  %v2066_v28 = vpop.f32.mrf.mxu1  ;;  %v6230_v20 = vld [vmem:[%s10045_s3 + $0x2b8] sm:$0xff]  ;;  %v6233_v24 = vld [vmem:[%s10045_s3 + $0x2b0] sm:$0xff] }
 0x2b9   : > { %2827 = vmatprep.mubr.f32.mxu1 %v6220_v18  ;;  %3130 = vmatpush2.msra.mxu1 %v5178_v41  ;;  %v8400_v39 = vadd.f32 %v2066_v28, %v1851_v9  ;;  %v6235_v18 = vld [vmem:[%s10045_s3 + $0x5e8] sm:$0xff] }
 0x2ba   : > { %2968 = vmatmul.mubr.f32.gmra.mxu0 %v6221_v21  ;;  %3131 = vmatprep.subr.mxu1 %v6382_v5  ;;  %v1853_v11 = vpop.f32.mrf.mxu0  ;;  %v2068_v47 = vpop.f32.mrf.mxu1 }
 0x2bb   : > { %2972 = vmatprep.mubr.f32.mxu0 %v6222_v57  ;;  %3132 = vmatpush2.msra.mxu1 %v5177_v56  ;;  %v6234_v56 = vld [vmem:[%s10045_s3 + $0x2f0] sm:$0xff]  ;;  %v6236_v47 = vld [vmem:[%s10045_s3 + $0x628] sm:$0xff] }
 0x2bc   : > { %2828 = vmatmul.mubr.f32.gmra.mxu1 %v6223_v30  ;;  %v1856_v45 = vpop.f32.mrf.mxu0  ;;  %v2071_v54 = vpop.f32.mrf.mxu1  ;;  %3133 = vmatprep.subr.mxu1 %v6382_v5  ;;  %v6237_v57 = vld [vmem:[%s10045_s3 + $0x2e8] sm:$0xff] }
 0x2bd   : > { %2832 = vmatprep.mubr.f32.mxu1 %v6224_v63  ;;  %v8418_v15 = vadd.f32 %v2071_v54, %v1856_v45  ;;  %3134 = vmatpush2.msra.mxu1 %v5176_v52  ;;  %v6238_v54 = vld [vmem:[%s10045_s3 + $0x328] sm:$0xff] }
 0x2be   : > { %2973 = vmatmul.mubr.f32.gmra.mxu0 %v6225_v12  ;;  %v1858_v50 = vpop.f32.mrf.mxu0  ;;  %v2073_v34 = vpop.f32.mrf.mxu1  ;;  %3135 = vmatprep.subr.mxu1 %v6382_v5  ;;  %v6228_v5 = vld [vmem:[%s10045_s3 + $0x5b8] sm:$0xff]  ;;  %v6240_v12 = vld [vmem:[%s10045_s3 + $0x660] sm:$0xff] }
 0x2bf   : > { %2977 = vmatprep.mubr.f32.mxu0 %v6226_v19  ;;  %3136 = vmatpush2.msra.mxu1 %v5175_v1  ;;  %v6239_v1 = vld [vmem:[%s10045_s3 + $0x620] sm:$0xff] }
 0x2c0   : > { %2833 = vmatmul.mubr.f32.gmra.mxu1 %v6227_v16  ;;  %v1861_v36 = vpop.f32.mrf.mxu0  ;;  %v2076_v10 = vpop.f32.mrf.mxu1  ;;  %5948 = vmatprep.subr.mxu0 %v5194_v14  ;;  %v6241_v34 = vld [vmem:[%s10045_s3 + $0x320] sm:$0xff] }
 0x2c1   : > { %2837 = vmatprep.mubr.f32.mxu1 %v6228_v5  ;;  %v8435_v40 = vadd.f32 %v2076_v10, %v1861_v36  ;;  %5949 = vmatpush3.msra.mxu0 %v5194_v14  ;;  %v6242_v16 = vld [vmem:[%s10045_s3 + $0x360] sm:$0xff]  ;;  %v6243_v10 = vld [vmem:[%s10045_s3 + $0x658] sm:$0xff]  ;;  %v6244_v5 = vld [vmem:[%s10045_s3 + $0x28] sm:$0xff] }
 0x2c2   : > { %2978 = vmatmul.mubr.f32.gmra.mxu0 %v6229_v59  ;;  %v1863_v60 = vpop.f32.mrf.mxu0  ;;  %v2078_v46 = vpop.f32.mrf.mxu1  ;;  %5950 = vmatprep.subr.mxu0 %v5193_v35  ;;  %v6245_v59 = vld [vmem:[%s10045_s3 + $0x358] sm:$0xff] }
 0x2c3   : > { %2982 = vmatprep.mubr.f32.mxu0 %v6230_v20  ;;  %5951 = vmatpush3.msra.mxu0 %v5193_v35  ;;  %v6246_v20 = vld [vmem:[%s10045_s3 + $0x398] sm:$0xff] }
 0x2c4   : > { %2838 = vmatmul.mubr.f32.gmra.mxu1 %v6231_v62  ;;  %v1866_v41 = vpop.f32.mrf.mxu0  ;;  %v2081_v17 = vpop.f32.mrf.mxu1  ;;  %5952 = vmatprep.subr.mxu0 %v5192_v2  ;;  %v6247_v62 = vld [vmem:[%s10045_s3 + $0x20] sm:$0xff] }
 0x2c5   : > { %2842 = vmatprep.mubr.f32.mxu1 %v6232_v44  ;;  %v8451_v0 = vadd.f32 %v2081_v17, %v1866_v41  ;;  %5953 = vmatpush3.msra.mxu0 %v5192_v2  ;;  %v6248_v17 = vld [vmem:[%s10045_s3 + $0x60] sm:$0xff] }
 0x2c6   : > { %2983 = vmatmul.mubr.f32.gmra.mxu0 %v6233_v24  ;;  %v1868_v9 = vpop.f32.mrf.mxu0  ;;  %v2083_v28 = vpop.f32.mrf.mxu1  ;;  %5954 = vmatprep.subr.mxu0 %v5191_v25  ;;  %v6249_v24 = vld [vmem:[%s10045_s3 + $0x390] sm:$0xff] }
 0x2c7   : > { %2987 = vmatprep.mubr.f32.mxu0 %v6234_v56  ;;  %5955 = vmatpush3.msra.mxu0 %v5191_v25  ;;  %v6250_v28 = vld [vmem:[%s10045_s3 + $0x3d0] sm:$0xff] }
 0x2c8   : > { %2843 = vmatmul.mubr.f32.gmra.mxu1 %v6235_v18  ;;  %v1871_v21 = vpop.f32.mrf.mxu0  ;;  %v2086_v11 = vpop.f32.mrf.mxu1 }
 0x2c9   : > { %2847 = vmatprep.mubr.f32.mxu1 %v6236_v47  ;;  %v8465_v52 = vadd.f32 %v2086_v11, %v1871_v21  ;;  %v6251_v21 = vld [vmem:[%s10045_s3 + $0x58] sm:$0xff] }
 0x2ca   : > { %2988 = vmatmul.mubr.f32.gmra.mxu0 %v6237_v57  ;;  %v1873_v30 = vpop.f32.mrf.mxu0  ;;  %v2088_v45 = vpop.f32.mrf.mxu1  ;;  %v6253_v57 = vld [vmem:[%s10045_s3 + $0x3c8] sm:$0xff] }
 0x2cb   : > { %2992 = vmatprep.mubr.f32.mxu0 %v6238_v54  ;;  %v6254_v45 = vld [vmem:[%s10045_s3 + $0x408] sm:$0xff] }
 0x2cc   : > { %2848 = vmatmul.mubr.f32.gmra.mxu1 %v6239_v1  ;;  %v2156_v63 = vpop.f32.mrf.mxu0  ;;  %v5897_v14 = vpop.f32.mrf.mxu1  ;;  %v6255_v1 = vld [vmem:[%s10045_s3 + $0x90] sm:$0xff] }
 0x2cd   : > { %2852 = vmatprep.mubr.f32.mxu1 %v6240_v12  ;;  %v2157_v50 = vadd.f32 %v2156_v63, %v7963_v48  ;;  %v6256_v12 = vld [vmem:[%s10045_s3 + $0xd0] sm:$0xff] }
 0x2ce   : > { %2993 = vmatmul.mubr.f32.gmra.mxu0 %v6241_v34  ;;  %v2158_v19 = vpop.f32.mrf.mxu0  ;;  %v2371_v35 = vpop.f32.mrf.mxu1  ;;  %v6257_v34 = vld [vmem:[%s10045_s3 + $0x400] sm:$0xff] }
 0x2cf   : > { %2997 = vmatprep.mubr.f32.mxu0 %v6242_v16  ;;  %v8486_v36 = vadd.f32 %v2371_v35, %v2157_v50  ;;  %v3533_v50 = vld [vmem:[%s10046_s4] sm:$0xff] }
 0x2d0   : > { %2853 = vmatmul.mubr.f32.gmra.mxu1 %v6243_v10  ;;  %v2161_v48 = vpop.f32.mrf.mxu0  ;;  %v6258_v16 = vld [vmem:[%s10045_s3 + $0x440] sm:$0xff] }
 0x2d1   : > { %3137 = vmatprep.mubr.f32.mxu1 %v6244_v5  ;;  %v2162_v2 = vadd.f32 %v2161_v48, %v7979_v8  ;;  %v6259_v48 = vld [vmem:[%s10045_s3 + $0xc8] sm:$0xff] }
 0x2d2   : > { %2998 = vmatmul.mubr.f32.gmra.mxu0 %v6245_v59  ;;  %v2163_v60 = vpop.f32.mrf.mxu0  ;;  %v5900_v46 = vpop.f32.mrf.mxu1 }
 0x2d3   : > { %3002 = vmatprep.mubr.f32.mxu0 %v6246_v20  ;;  %v8501_v25 = vadd.f32 %v5897_v14, %v2162_v2  ;;  %v6260_v2 = vld [vmem:[%s10045_s3 + $0x108] sm:$0xff]  ;;  %v6262_v20 = vld [vmem:[%s10045_s3 + $0x478] sm:$0xff] }
 0x2d4   : > { %3138 = vmatmul.mubr.f32.vlgmr.msra.gmra.mxu1 %v6247_v62  ;;  %v2166_v8 = vpop.f32.mrf.mxu0  ;;  %v2381_v41 = vpop.f32.mrf.mxu1 }
 0x2d5   : > { %3142 = vmatprep.mubr.f32.mxu1 %v6248_v17  ;;  %v2167_v44 = vadd.f32 %v2166_v8, %v7997_v6  ;;  %v6252_v6 = vld [vmem:[%s10045_s3 + $0x98] sm:$0xff]  ;;  %v6263_v8 = vld [vmem:[%s10045_s3 + $0x100] sm:$0xff] }
 0x2d6   : > { %3003 = vmatmul.mubr.f32.gmra.mxu0 %v6249_v24  ;;  %v2168_v9 = vpop.f32.mrf.mxu0  ;;  %v6264_v17 = vld [vmem:[%s10045_s3 + $0x140] sm:$0xff]  ;;  %v3535_v24 = vld [vmem:[%s10046_s4 + $0x10] sm:$0xff] }
 0x2d7   : > { %3007 = vmatprep.mubr.f32.mxu0 %v6250_v28  ;;  %v8516_v56 = vadd.f32 %v2381_v41, %v2167_v44  ;;  %v5903_v18 = vpop.f32.mrf.mxu1  ;;  %v3537_v9 = vld [vmem:[%s10046_s4 + $0x20] sm:$0xff]  ;;  %v6265_v28 = vld [vmem:[%s10045_s3 + $0x470] sm:$0xff] }
 0x2d8   : > { %3143 = vmatmul.mubr.f32.gmra.mxu1 %v6251_v21 }
 0x2d9   : > { %3147 = vmatprep.mubr.f32.mxu1 %v6252_v6  ;;  %v2171_v11 = vpop.f32.mrf.mxu0  ;;  %v2391_v47 = vpop.f32.mrf.mxu1 }
 0x2da   : > { %3008 = vmatmul.mubr.f32.gmra.mxu0 %v6253_v57  ;;  %v2172_v30 = vadd.f32 %v2171_v11, %v8015_v29  ;;  %v6383_v29 = vmov 0  }
 0x2db   : > { %3012 = vmatprep.mubr.f32.mxu0 %v6254_v45  ;;  %v2173_v54 = vpop.f32.mrf.mxu0  ;;  %6149 = vset.pattern.permute.xlu0 %v6383_v29 }
 0x2dc   : > { %3148 = vmatmul.mubr.f32.gmra.mxu1 %v6255_v1  ;;  %v8534_v63 = vadd.f32 %v5900_v46, %v2172_v30  ;;  %v8536_v14 = vpop.f32.mrf.mxu1  ;;  %3550 = vperm.xlu0 %6149, %v3533_v50   ;;  %v6261_v46 = vld [vmem:[%s10045_s3 + $0x438] sm:$0xff]  ;;  %v6269_v1 = vld [vmem:[%s10045_s3 + $0x4a8] sm:$0xff] }
 0x2dd   : > { %3152 = vmatprep.mubr.f32.mxu1 %v6256_v12  ;;  %6150 = vset.pattern.permute.xlu1 %v6383_v29  ;;  %v6268_v30 = vld [vmem:[%s10045_s3 + $0x178] sm:$0xff]  ;;  %v6270_v29 = vld [vmem:[%s10045_s3 + $0x4e8] sm:$0xff] }
 0x2de   : > { %3013 = vmatmul.mubr.f32.gmra.mxu0 %v6257_v34  ;;  %v2176_v19 = vpop.f32.mrf.mxu0  ;;  %v2401_v35 = vpop.f32.mrf.mxu1  ;;  %3560 = vperm.xlu1 %6150, %v3535_v24   ;;  %v3536_v54 = vld [vmem:[%s10046_s4 + $0x18] sm:$0xff]  ;;  %v3543_v24 = vld [vmem:[%s10046_s4 + $0x50] sm:$0xff] }
 0x2df   : > { %3017 = vmatprep.mubr.f32.mxu0 %v6258_v16  ;;  %v2177_v10 = vadd.f32 %v2176_v19, %v8033_v3  ;;  %v3534_v3 = vld [vmem:[%s10046_s4 + $0x8] sm:$0xff]  ;;  %v6271_v19 = vld [vmem:[%s10045_s3 + $0x170] sm:$0xff] }
 0x2e0   : > { %3153 = vmatmul.mubr.f32.gmra.mxu1 %v6259_v48  ;;  %v2178_v5 = vpop.f32.mrf.mxu0  ;;  %3555 = vperm.xlu0 %6149, %v3534_v3   ;;  %v3538_v48 = vld [vmem:[%s10046_s4 + $0x28] sm:$0xff]  ;;  %v6274_v3 = vld [vmem:[%s10045_s3 + $0x520] sm:$0xff] }
 0x2e1   : > { %3157 = vmatprep.mubr.f32.mxu1 %v6260_v2  ;;  %v8557_v59 = vadd.f32 %v2391_v47, %v2177_v10  ;;  %v8559_v60 = vpop.f32.mrf.mxu1  ;;  %v6267_v47 = vld [vmem:[%s10045_s3 + $0x138] sm:$0xff]  ;;  %v3541_v5 = vld [vmem:[%s10046_s4 + $0x40] sm:$0xff] }
 0x2e2   : > { %3018 = vmatmul.mubr.f32.gmra.mxu0 %v6261_v46  ;;  %3565 = vperm.xlu1 %6150, %v3536_v54  }
 0x2e3   : > { %3022 = vmatprep.mubr.f32.mxu0 %v6262_v20  ;;  %v8570_v62 = vpop.f32.mrf.mxu1  ;;  %v6275_v20 = vld [vmem:[%s10045_s3 + $0x1a8] sm:$0xff] }
 0x2e4   : > { %3158 = vmatmul.mubr.f32.gmra.mxu1 %v6263_v8  ;;  %v2181_v41 = vpop.f32.mrf.mxu0  ;;  %3570 = vperm.xlu0 %6149, %v3537_v9   ;;  %v6277_v9 = vld [vmem:[%s10045_s3 + $0x518] sm:$0xff] }
 0x2e5   : > { %3162 = vmatprep.mubr.f32.mxu1 %v6264_v17  ;;  %v2182_v44 = vadd.f32 %v2181_v41, %v8052_v43  ;;  %v6266_v43 = vld [vmem:[%s10045_s3 + $0x4b0] sm:$0xff]  ;;  %v6276_v17 = vld [vmem:[%s10045_s3 + $0x1e8] sm:$0xff] }
 0x2e6   : > { %3023 = vmatmul.mubr.f32.gmra.mxu0 %v6265_v28  ;;  %v2183_v21 = vpop.f32.mrf.mxu0  ;;  %v8588_v6 = vpop.f32.mrf.mxu1  ;;  %3575 = vperm.xlu1 %6150, %v3538_v48  }
 0x2e7   : > { %3027 = vmatprep.mubr.f32.mxu0 %v6266_v43  ;;  %v8593_v11 = vadd.f32 %v5903_v18, %v2182_v44  ;;  %v3539_v18 = vld [vmem:[%s10046_s4 + $0x30] sm:$0xff]  ;;  %v6279_v43 = vld [vmem:[%s10045_s3 + $0x1e0] sm:$0xff] }
 0x2e8   : > { %3163 = vmatmul.mubr.f32.gmra.mxu1 %v6267_v47  ;;  %v8598_v57 = vpop.f32.mrf.mxu1  ;;  %3580 = vperm.xlu0 %6149, %v3539_v18   ;;  %v3542_v18 = vld [vmem:[%s10046_s4 + $0x48] sm:$0xff] }
 0x2e9   : > { %3167 = vmatprep.mubr.f32.mxu1 %v6268_v30  ;;  %v2186_v45 = vpop.f32.mrf.mxu0  ;;  %v6280_v30 = vld [vmem:[%s10045_s3 + $0x220] sm:$0xff] }
 0x2ea   : > { %3028 = vmatmul.mubr.f32.gmra.mxu0 %v6269_v1  ;;  %v2187_v12 = vadd.f32 %v2186_v45, %v8070_v23  ;;  %v6272_v23 = vld [vmem:[%s10045_s3 + $0x1b0] sm:$0xff]  ;;  %v3545_v1 = vld [vmem:[%s10046_s4 + $0x60] sm:$0xff] }
 0x2eb   : > { %3032 = vmatprep.mubr.f32.mxu0 %v6270_v29  ;;  %v2188_v50 = vpop.f32.mrf.mxu0  ;;  %v8616_v34 = vpop.f32.mrf.mxu1  ;;  %v6282_v29 = vld [vmem:[%s10045_s3 + $0x590] sm:$0xff] }
 0x2ec   : > { %3168 = vmatmul.mubr.f32.gmra.mxu1 %v6271_v19  ;;  %v8621_v16 = vadd.f32 %v2401_v35, %v2187_v12  ;;  %v6273_v35 = vld [vmem:[%s10045_s3 + $0x4e0] sm:$0xff]  ;;  %3590 = vperm.xlu0 %6149, %v3541_v5   ;;  %v6283_v19 = vld [vmem:[%s10045_s3 + $0x218] sm:$0xff] }
 0x2ed   : > { %3172 = vmatprep.mubr.f32.mxu1 %v6272_v23  ;;  %v8626_v10 = vpop.f32.mrf.mxu1  ;;  %v3544_v5 = vld [vmem:[%s10046_s4 + $0x58] sm:$0xff] }
 0x2ee   : > { %3033 = vmatmul.mubr.f32.gmra.mxu0 %v6273_v35  ;;  %v2191_v2 = vpop.f32.mrf.mxu0  ;;  %v3547_v35 = vld [vmem:[%s10046_s4 + $0x70] sm:$0xff] }
 0x2ef   : > { %3037 = vmatprep.mubr.f32.mxu0 %v6274_v3  ;;  %v2192_v46 = vadd.f32 %v2191_v2, %v8088_v7  ;;  %v3540_v7 = vld [vmem:[%s10046_s4 + $0x38] sm:$0xff]  ;;  %v6285_v2 = vld [vmem:[%s10045_s3 + $0x588] sm:$0xff] }
 0x2f0   : > { %3173 = vmatmul.mubr.f32.gmra.mxu1 %v6275_v20  ;;  %v2193_v8 = vpop.f32.mrf.mxu0  ;;  %v8644_v41 = vpop.f32.mrf.mxu1  ;;  %3585 = vperm.xlu1 %6150, %v3540_v7   ;;  %v6288_v7 = vld [vmem:[%s10045_s3 + $0x290] sm:$0xff] }
 0x2f1   : > { %3177 = vmatprep.mubr.f32.mxu1 %v6276_v17  ;;  %v8650_v44 = vadd.f32 %v8536_v14, %v2192_v46  ;;  %v6278_v14 = vld [vmem:[%s10045_s3 + $0x558] sm:$0xff]  ;;  %3600 = vperm.xlu0 %6149, %v3543_v24   ;;  %v6287_v8 = vld [vmem:[%s10045_s3 + $0x250] sm:$0xff] }
 0x2f2   : > { %3038 = vmatmul.mubr.f32.gmra.mxu0 %v6277_v9  ;;  %v8661_v28 = vpop.f32.mrf.mxu1  ;;  %v3546_v9 = vld [vmem:[%s10046_s4 + $0x68] sm:$0xff] }
 0x2f3   : > { %10101 = vst [vmem:[#allocation19_spill] sm:$0xff] %v8650_v44  ;;  %3042 = vmatprep.mubr.f32.mxu0 %v6278_v14  ;;  %v2196_v21 = vpop.f32.mrf.mxu0 }
 0x2f4   : > { %3178 = vmatmul.mubr.f32.gmra.mxu1 %v6279_v43  ;;  %v2197_v47 = vadd.f32 %v2196_v21, %v8106_v31  ;;  %v6281_v31 = vld [vmem:[%s10045_s3 + $0x550] sm:$0xff]  ;;  %3595 = vperm.xlu1 %6150, %v3542_v18   ;;  %v6290_v21 = vld [vmem:[%s10045_s3 + $0x600] sm:$0xff] }
 0x2f5   : > { %3182 = vmatprep.mubr.f32.mxu1 %v6280_v30  ;;  %v2198_v45 = vpop.f32.mrf.mxu0  ;;  %v8673_v54 = vpop.f32.mrf.mxu1  ;;  %3610 = vperm.xlu0 %6149, %v3545_v1   ;;  %v6291_v30 = vld [vmem:[%s10045_s3 + $0x288] sm:$0xff]  ;;  %v6293_v1 = vld [vmem:[%s10045_s3 + $0x5f8] sm:$0xff] }
 0x2f6   : > { %3043 = vmatmul.mubr.f32.gmra.mxu0 %v6281_v31  ;;  %v8685_v12 = vadd.f32 %v8570_v62, %v2197_v47  ;;  %v6284_v62 = vld [vmem:[%s10045_s3 + $0x258] sm:$0xff] }
 0x2f7   : > { %3047 = vmatprep.mubr.f32.mxu0 %v6282_v29  ;;  %v8690_v50 = vpop.f32.mrf.mxu1  ;;  %v6294_v29 = vld [vmem:[%s10045_s3 + $0x638] sm:$0xff] }
 0x2f8   : > { %10102 = vst [vmem:[#allocation20_spill] sm:$0xff] %v8685_v12  ;;  %3183 = vmatmul.mubr.f32.gmra.mxu1 %v6283_v19  ;;  %v2201_v23 = vpop.f32.mrf.mxu0  ;;  %3605 = vperm.xlu1 %6150, %v3544_v5   ;;  %v6295_v19 = vld [vmem:[%s10045_s3 + $0x2c0] sm:$0xff] }
 0x2f9   : > { %3187 = vmatprep.mubr.f32.mxu1 %v6284_v62  ;;  %v2202_v48 = vadd.f32 %v2201_v23, %v8121_v55  ;;  %v6286_v55 = vld [vmem:[%s10045_s3 + $0x5c8] sm:$0xff]  ;;  %3620 = vperm.xlu0 %6149, %v3547_v35  }
 0x2fa   : > { %3048 = vmatmul.mubr.f32.gmra.mxu0 %v6285_v2  ;;  %v2203_v3 = vpop.f32.mrf.mxu0  ;;  %v8708_v46 = vpop.f32.mrf.mxu1  ;;  %v6298_v2 = vld [vmem:[%s10045_s3 + $0x670] sm:$0xff] }
 0x2fb   : > { %3052 = vmatprep.mubr.f32.mxu0 %v6286_v55  ;;  %v8714_v20 = vadd.f32 %v8559_v60, %v2202_v48  ;;  %v6289_v60 = vld [vmem:[%s10045_s3 + $0x5c0] sm:$0xff]  ;;  %v6299_v55 = vld [vmem:[%s10045_s3 + $0x2f8] sm:$0xff] }
 0x2fc   : > { %3188 = vmatmul.mubr.f32.gmra.mxu1 %v6287_v8  ;;  %v8719_v17 = vpop.f32.mrf.mxu1  ;;  %3615 = vperm.xlu1 %6150, %v3546_v9   ;;  %v6296_v48 = vld [vmem:[%s10045_s3 + $0x300] sm:$0xff]  ;;  %v6300_v8 = vld [vmem:[%s10045_s3 + $0x338] sm:$0xff] }
 0x2fd   : > { %10103 = vst [vmem:[#allocation21_spill] sm:$0xff] %v8714_v20  ;;  %3192 = vmatprep.mubr.f32.mxu1 %v6288_v7  ;;  %v2206_v24 = vpop.f32.mrf.mxu0 }
 0x2fe   : > { %3053 = vmatmul.mubr.f32.gmra.mxu0 %v6289_v60  ;;  %v2207_v14 = vadd.f32 %v2206_v24, %v8139_v42  ;;  %v6292_v42 = vld [vmem:[%s10045_s3 + $0x2c8] sm:$0xff] }
 0x2ff   : > { %3057 = vmatprep.mubr.f32.mxu0 %v6290_v21  ;;  %v2208_v43 = vpop.f32.mrf.mxu0  ;;  %v8734_v47 = vpop.f32.mrf.mxu1  ;;  %v6301_v24 = vld [vmem:[%s10045_s3 + $0x668] sm:$0xff]  ;;  %v6303_v21 = vld [vmem:[%s10045_s3 + $0x330] sm:$0xff] }
 0x300   : > { %3193 = vmatmul.mubr.f32.gmra.mxu1 %v6291_v30  ;;  %v8740_v45 = vadd.f32 %v8598_v57, %v2207_v14 }
 0x301   : > { %3197 = vmatprep.mubr.f32.mxu1 %v6292_v42  ;;  %v8745_v18 = vpop.f32.mrf.mxu1 }
 0x302   : > { %10104 = vst [vmem:[#allocation22_spill] sm:$0xff] %v8740_v45  ;;  %3058 = vmatmul.mubr.f32.gmra.mxu0 %v6293_v1  ;;  %v2211_v31 = vpop.f32.mrf.mxu0  ;;  %v6305_v1 = vld [vmem:[%s10045_s3 + $0x68] sm:$0xff] }
 0x303   : > { %3062 = vmatprep.mubr.f32.mxu0 %v6294_v29  ;;  %v2212_v57 = vadd.f32 %v2211_v31, %v8159_v37  ;;  %v6297_v37 = vld [vmem:[%s10045_s3 + $0x630] sm:$0xff] }
 0x304   : > { %3198 = vmatmul.mubr.f32.gmra.mxu1 %v6295_v19  ;;  %v2213_v23 = vpop.f32.mrf.mxu0  ;;  %v8757_v62 = vpop.f32.mrf.mxu1 }
 0x305   : > { %3202 = vmatprep.mubr.f32.mxu1 %v6296_v48  ;;  %v8763_v5 = vadd.f32 %v8588_v6, %v2212_v57  ;;  %v6307_v57 = vld [vmem:[%s10045_s3 + $0x368] sm:$0xff] }
 0x306   : > { %3063 = vmatmul.mubr.f32.gmra.mxu0 %v6297_v37  ;;  %v8768_v35 = vpop.f32.mrf.mxu1  ;;  %v6308_v23 = vld [vmem:[%s10045_s3 + $0x3a8] sm:$0xff]  ;;  %v6309_v37 = vld [vmem:[%s10045_s3 + $0xd8] sm:$0xff] }
 0x307   : > { %10105 = vst [vmem:[#allocation23_spill] sm:$0xff] %v8763_v5  ;;  %3067 = vmatprep.mubr.f32.mxu0 %v6298_v2  ;;  %v2216_v3 = vpop.f32.mrf.mxu0 }
 0x308   : > { %3203 = vmatmul.mubr.f32.gmra.mxu1 %v6299_v55  ;;  %v2217_v6 = vadd.f32 %v2216_v3, %v8177_v49  ;;  %v6302_v49 = vld [vmem:[%s10045_s3 + $0x30] sm:$0xff] }
 0x309   : > { %3207 = vmatprep.mubr.f32.mxu1 %v6300_v8  ;;  %v2218_v7 = vpop.f32.mrf.mxu0  ;;  %v6310_v3 = vld [vmem:[%s10045_s3 + $0x110] sm:$0xff]  ;;  %v6312_v8 = vld [vmem:[%s10045_s3 + $0x3e0] sm:$0xff] }
 0x30a   : > { %3068 = vmatmul.mubr.f32.gmra.mxu0 %v6301_v24  ;;  %v8784_v9 = vadd.f32 %v8626_v10, %v2217_v6  ;;  %v8786_v60 = vpop.f32.mrf.mxu1  ;;  %v6304_v10 = vld [vmem:[%s10045_s3 + $0x370] sm:$0xff]  ;;  %v6313_v24 = vld [vmem:[%s10045_s3 + $0x148] sm:$0xff] }
 0x30b   : > { %5956 = vmatprep.mubr.msk.f32.mxu0 %vm1569_vm1, %v6302_v49  ;;  %v2221_v14 = vpop.f32.mrf.mxu0  ;;  %v6314_v49 = vld [vmem:[%s10045_s3 + $0x180] sm:$0xff] }
 0x30c   : > { %10106 = vst [vmem:[#allocation24_spill] sm:$0xff] %v8784_v9  ;;  %3208 = vmatmul.mubr.f32.gmra.mxu1 %v6303_v21  ;;  %v2222_v43 = vadd.f32 %v2221_v14, %v8195_v51  ;;  %v8796_v30 = vpop.f32.mrf.mxu1  ;;  %v6306_v51 = vld [vmem:[%s10045_s3 + $0xa0] sm:$0xff]  ;;  %v6315_v21 = vld [vmem:[%s10045_s3 + $0x3d8] sm:$0xff] }
 0x30d   : > { %3212 = vmatprep.mubr.f32.mxu1 %v6304_v10  ;;  %v2223_v42 = vpop.f32.mrf.mxu0 }
 0x30e   : > { %5957 = vmatmul.mubr.msk.f32.vlgmr.msra.gmra.mxu0 %vm1569_vm1, %v6305_v1  ;;  %v8806_v31 = vadd.f32 %v8616_v34, %v2222_v43  ;;  %v6317_v1 = vld [vmem:[%s10045_s3 + $0x1b8] sm:$0xff] }
 0x30f   : > { %5959 = vmatprep.mubr.msk.f32.mxu0 %vm1569_vm1, %v6306_v51  ;;  %v8812_v29 = vpop.f32.mrf.mxu1 }
 0x310   : > { %10107 = vst [vmem:[#allocation25_spill] sm:$0xff] %v8806_v31  ;;  %3213 = vmatmul.mubr.f32.gmra.mxu1 %v6307_v57  ;;  %v2226_v19 = vpop.f32.mrf.mxu0 }
 0x311   : > { %3217 = vmatprep.mubr.f32.mxu1 %v6308_v23  ;;  %v2227_v34 = vadd.f32 %v2226_v19, %v8213_v33  ;;  %v8821_v48 = vpop.f32.mrf.mxu1  ;;  %v6311_v33 = vld [vmem:[%s10045_s3 + $0x3a0] sm:$0xff]  ;;  %v6319_v19 = vld [vmem:[%s10045_s3 + $0x410] sm:$0xff] }
 0x312   : > { %5960 = vmatmul.mubr.msk.f32.gmra.mxu0 %vm1569_vm1, %v6309_v37  ;;  %v2228_v2 = vpop.f32.mrf.mxu0 }
 0x313   : > { %5962 = vmatprep.mubr.msk.f32.mxu0 %vm1569_vm1, %v6310_v3  ;;  %v8832_v55 = vadd.f32 %v8661_v28, %v2227_v34  ;;  %v6320_v2 = vld [vmem:[%s10045_s3 + $0x450] sm:$0xff] }
 0x314   : > { %3218 = vmatmul.mubr.f32.gmra.mxu1 %v6311_v33  ;;  %v8837_v6 = vpop.f32.mrf.mxu1  ;;  %v6321_v33 = vld [vmem:[%s10045_s3 + $0x228] sm:$0xff] }
 0x315   : > { %10108 = vst [vmem:[#allocation26_spill] sm:$0xff] %v8832_v55  ;;  %3222 = vmatprep.mubr.f32.mxu1 %v6312_v8  ;;  %v2231_v7 = vpop.f32.mrf.mxu0 }
 0x316   : > { %5963 = vmatmul.mubr.msk.f32.gmra.mxu0 %vm1569_vm1, %v6313_v24  ;;  %v2232_v28 = vadd.f32 %v2231_v7, %v8226_v27  ;;  %v8857_v10 = vpop.f32.mrf.mxu1  ;;  %v6316_v27 = vld [vmem:[%s10045_s3 + $0x418] sm:$0xff] }
 0x317   : > { %5965 = vmatprep.mubr.msk.f32.mxu0 %vm1569_vm1, %v6314_v49  ;;  %v2233_v14 = vpop.f32.mrf.mxu0 }
 0x318   : > { %3223 = vmatmul.mubr.f32.gmra.mxu1 %v6315_v21  ;;  %v8855_v43 = vadd.f32 %v8644_v41, %v2232_v28  ;;  %v6318_v41 = vld [vmem:[%s10045_s3 + $0x1f0] sm:$0xff]  ;;  %v6324_v21 = vld [vmem:[%s10045_s3 + $0x488] sm:$0xff] }
 0x319   : > { %3227 = vmatprep.mubr.f32.mxu1 %v6316_v27 }
 0x31a   : > { %5966 = vmatmul.mubr.msk.f32.gmra.mxu0 %vm1569_vm1, %v6317_v1  ;;  %v8868_v51 = vpop.f32.mrf.mxu1  ;;  %v6325_v1 = vld [vmem:[%s10045_s3 + $0x298] sm:$0xff] }
 0x31b   : > { %5968 = vmatprep.mubr.msk.f32.mxu0 %vm1569_vm1, %v6318_v41  ;;  %v2236_v57 = vpop.f32.mrf.mxu0 }
 0x31c   : > { %3228 = vmatmul.mubr.f32.gmra.mxu1 %v6319_v19  ;;  %v2237_v23 = vadd.f32 %v2236_v57, %v8240_v13  ;;  %v2711_v34 = vpop.f32.mrf.mxu1  ;;  %v6322_v13 = vld [vmem:[%s10045_s3 + $0x260] sm:$0xff] }
 0x31d   : > { %v2238_v37 = vpop.f32.mrf.mxu0  ;;  %3232 = vmatprep.mubr.f32.mxu1 %v6320_v2  ;;  %v6328_v2 = vld [vmem:[%s10045_s3 + $0x4c0] sm:$0xff] }
 0x31e   : > { %v8882_v3 = vadd.f32 %v8690_v50, %v2237_v23  ;;  %5969 = vmatmul.mubr.msk.f32.gmra.mxu0 %vm1569_vm1, %v6321_v33  ;;  %v8888_v8 = vpop.f32.mrf.mxu1  ;;  %v6323_v50 = vld [vmem:[%s10045_s3 + $0x448] sm:$0xff] }
 0x31f   : > { %5971 = vmatprep.mubr.msk.f32.mxu0 %vm1569_vm1, %v6322_v13  ;;  %v2241_v7 = vpop.f32.mrf.mxu0  ;;  %v6329_v13 = vld [vmem:[%s10045_s3 + $0x308] sm:$0xff] }
 0x320   : > { %3233 = vmatmul.mubr.f32.gmra.mxu1 %v6323_v50  ;;  %v2242_v28 = vadd.f32 %v2241_v7, %v8257_v4  ;;  %v2716_v49 = vpop.f32.mrf.mxu1  ;;  %v6326_v4 = vld [vmem:[%s10045_s3 + $0x2d0] sm:$0xff] }
 0x321   : > { %v2243_v14 = vpop.f32.mrf.mxu0  ;;  %3237 = vmatprep.mubr.f32.mxu1 %v6324_v21 }
 0x322   : > { %v8904_v27 = vadd.f32 %v8673_v54, %v2242_v28  ;;  %5972 = vmatmul.mubr.msk.f32.gmra.mxu0 %vm1569_vm1, %v6325_v1  ;;  %v8910_v41 = vpop.f32.mrf.mxu1  ;;  %v6327_v54 = vld [vmem:[%s10045_s3 + $0x480] sm:$0xff]  ;;  %v6332_v1 = vld [vmem:[%s10045_s3 + $0x4f8] sm:$0xff] }
 0x323   : > { %5974 = vmatprep.mubr.msk.f32.mxu0 %vm1569_vm1, %v6326_v4  ;;  %v2246_v57 = vpop.f32.mrf.mxu0 }
 0x324   : > { %3238 = vmatmul.mubr.f32.gmra.mxu1 %v6327_v54  ;;  %v2247_v23 = vadd.f32 %v2246_v57, %v8277_v53  ;;  %v2721_v34 = vpop.f32.mrf.mxu1  ;;  %v6330_v53 = vld [vmem:[%s10045_s3 + $0x340] sm:$0xff]  ;;  %v6333_v57 = vld [vmem:[%s10045_s3 + $0x378] sm:$0xff] }
 0x325   : > { %v2248_v37 = vpop.f32.mrf.mxu0  ;;  %3242 = vmatprep.mubr.f32.mxu1 %v6328_v2 }
 0x326   : > { %v8926_v33 = vadd.f32 %v8719_v17, %v2247_v23  ;;  %5975 = vmatmul.mubr.msk.f32.gmra.mxu0 %vm1569_vm1, %v6329_v13  ;;  %v8932_v7 = vpop.f32.mrf.mxu1  ;;  %v6331_v17 = vld [vmem:[%s10045_s3 + $0x4b8] sm:$0xff]  ;;  %v6336_v13 = vld [vmem:[%s10045_s3 + $0x530] sm:$0xff] }
 0x327   : > { %5977 = vmatprep.mubr.msk.f32.mxu0 %vm1569_vm1, %v6330_v53  ;;  %v2251_v50 = vpop.f32.mrf.mxu0  ;;  %v6337_v53 = vld [vmem:[%s10045_s3 + $0x3e8] sm:$0xff] }
 0x328   : > { %3243 = vmatmul.mubr.f32.gmra.mxu1 %v6331_v17  ;;  %v2252_v49 = vadd.f32 %v2251_v50, %v8295_v58  ;;  %v2726_v14 = vpop.f32.mrf.mxu1  ;;  %v6334_v58 = vld [vmem:[%s10045_s3 + $0x3b0] sm:$0xff] }
 0x329   : > { %v2253_v21 = vpop.f32.mrf.mxu0  ;;  %3247 = vmatprep.mubr.f32.mxu1 %v6332_v1  ;;  %v6339_v14 = vld [vmem:[%s10045_s3 + $0x528] sm:$0xff] }
 0x32a   : > { %v8948_v4 = vadd.f32 %v8708_v46, %v2252_v49  ;;  %5978 = vmatmul.mubr.msk.f32.gmra.mxu0 %vm1569_vm1, %v6333_v57  ;;  %v6335_v46 = vld [vmem:[%s10045_s3 + $0x4f0] sm:$0xff] }
 0x32b   : > { %v8954_v54 = vpop.f32.mrf.mxu1  ;;  %5980 = vmatprep.mubr.msk.f32.mxu0 %vm1569_vm1, %v6334_v58  ;;  %v6340_v58 = vld [vmem:[%s10045_s3 + $0x568] sm:$0xff] }
 0x32c   : > { %3248 = vmatmul.mubr.f32.gmra.mxu1 %v6335_v46  ;;  %v2256_v34 = vpop.f32.mrf.mxu0  ;;  %v6341_v46 = vld [vmem:[%s10045_s3 + $0x458] sm:$0xff] }
 0x32d   : > { %v2257_v37 = vadd.f32 %v2256_v34, %v8312_v22  ;;  %v2731_v2 = vpop.f32.mrf.mxu1  ;;  %3252 = vmatprep.mubr.f32.mxu1 %v6336_v13  ;;  %v6338_v22 = vld [vmem:[%s10045_s3 + $0x420] sm:$0xff] }
 0x32e   : > { %5981 = vmatmul.mubr.msk.f32.gmra.mxu0 %vm1569_vm1, %v6337_v53  ;;  %v2258_v50 = vpop.f32.mrf.mxu0  ;;  %v6343_v13 = vld [vmem:[%s10045_s3 + $0x560] sm:$0xff] }
 0x32f   : > { %v8974_v17 = vadd.f32 %v8745_v18, %v2257_v37  ;;  %v8976_v49 = vpop.f32.mrf.mxu1  ;;  %5983 = vmatprep.mubr.msk.f32.mxu0 %vm1569_vm1, %v6338_v22 }
 0x330   : > { %3253 = vmatmul.mubr.f32.gmra.mxu1 %v6339_v14  ;;  %v2261_v21 = vpop.f32.mrf.mxu0  ;;  %v6344_v14 = vld [vmem:[%s10045_s3 + $0x5a0] sm:$0xff] }
 0x331   : > { %10109 = vst [vmem:[#allocation27_spill] sm:$0xff] %v8974_v17  ;;  %v2262_v18 = vadd.f32 %v2261_v21, %v8330_v26  ;;  %v2736_v57 = vpop.f32.mrf.mxu1  ;;  %3257 = vmatprep.mubr.f32.mxu1 %v6340_v58  ;;  %v6342_v26 = vld [vmem:[%s10045_s3 + $0x490] sm:$0xff]  ;;  %v6345_v21 = vld [vmem:[%s10045_s3 + $0x4c8] sm:$0xff] }
 0x332   : > { %5984 = vmatmul.mubr.msk.f32.gmra.mxu0 %vm1569_vm1, %v6341_v46  ;;  %v2263_v34 = vpop.f32.mrf.mxu0  ;;  %v6347_v46 = vld [vmem:[%s10045_s3 + $0x598] sm:$0xff] }
 0x333   : > { %v8996_v37 = vadd.f32 %v8734_v47, %v2262_v18  ;;  %v8998_v2 = vpop.f32.mrf.mxu1  ;;  %5986 = vmatprep.mubr.msk.f32.mxu0 %vm1569_vm1, %v6342_v26 }
 0x334   : > { %3258 = vmatmul.mubr.f32.gmra.mxu1 %v6343_v13  ;;  %v2266_v53 = vpop.f32.mrf.mxu0 }
 0x335   : > { %v2267_v47 = vadd.f32 %v2266_v53, %v8348_v32  ;;  %v2741_v22 = vpop.f32.mrf.mxu1  ;;  %3262 = vmatprep.mubr.f32.mxu1 %v6344_v14  ;;  %v6346_v32 = vld [vmem:[%s10045_s3 + $0x500] sm:$0xff]  ;;  %v6348_v53 = vld [vmem:[%s10045_s3 + $0x5d8] sm:$0xff] }
 0x336   : > { %5987 = vmatmul.mubr.msk.f32.gmra.mxu0 %vm1569_vm1, %v6345_v21  ;;  %v2268_v18 = vpop.f32.mrf.mxu0 }
 0x337   : > { %v9018_v57 = vadd.f32 %v8768_v35, %v2267_v47  ;;  %v9020_v58 = vpop.f32.mrf.mxu1  ;;  %5989 = vmatprep.mubr.msk.f32.mxu0 %vm1569_vm1, %v6346_v32  ;;  %v6349_v47 = vld [vmem:[%s10045_s3 + $0x538] sm:$0xff]  ;;  %v6351_v18 = vld [vmem:[%s10045_s3 + $0x5d0] sm:$0xff] }
 0x338   : > { %3263 = vmatmul.mubr.f32.gmra.mxu1 %v6347_v46  ;;  %v2271_v34 = vpop.f32.mrf.mxu0 }
 0x339   : > { %10110 = vst [vmem:[#allocation28_spill] sm:$0xff] %v9018_v57  ;;  %v2272_v35 = vadd.f32 %v2271_v34, %v8365_v38  ;;  %v2746_v13 = vpop.f32.mrf.mxu1  ;;  %3267 = vmatprep.mubr.f32.mxu1 %v6348_v53  ;;  %v6350_v38 = vld [vmem:[%s10045_s3 + $0x570] sm:$0xff] }
 0x33a   : > { %5990 = vmatmul.mubr.msk.f32.gmra.mxu0 %vm1569_vm1, %v6349_v47  ;;  %v2273_v22 = vpop.f32.mrf.mxu0  ;;  %v6352_v34 = vld [vmem:[%s10045_s3 + $0x610] sm:$0xff] }
 0x33b   : > { %v9040_v14 = vadd.f32 %v8757_v62, %v2272_v35  ;;  %5992 = vmatprep.mubr.msk.f32.mxu0 %vm1569_vm1, %v6350_v38  ;;  %v6353_v35 = vld [vmem:[%s10045_s3 + $0x5a8] sm:$0xff] }
 0x33c   : > { %v9046_v21 = vpop.f32.mrf.mxu1  ;;  %3268 = vmatmul.mubr.f32.gmra.mxu1 %v6351_v18  ;;  %v2276_v32 = vpop.f32.mrf.mxu0  ;;  %v6355_v38 = vld [vmem:[%s10045_s3 + $0x608] sm:$0xff] }
 0x33d   : > { %10111 = vst [vmem:[#allocation29_spill] sm:$0xff] %v9040_v14  ;;  %v2277_v62 = vadd.f32 %v2276_v32, %v8383_v61  ;;  %3272 = vmatprep.mubr.f32.mxu1 %v6352_v34  ;;  %v6354_v61 = vld [vmem:[%s10045_s3 + $0x5e0] sm:$0xff]  ;;  %v6357_v34 = vld [vmem:[%s10045_s3 + $0x618] sm:$0xff] }
 0x33e   : > { %5993 = vmatmul.mubr.msk.f32.gmra.mxu0 %vm1569_vm1, %v6353_v35  ;;  %v2751_v13 = vpop.f32.mrf.mxu1  ;;  %v2278_v53 = vpop.f32.mrf.mxu0 }
 0x33f   : > { %v9062_v47 = vadd.f32 %v8796_v30, %v2277_v62  ;;  %5995 = vmatprep.mubr.msk.f32.mxu0 %vm1569_vm1, %v6354_v61  ;;  %v6356_v62 = vld [vmem:[%s10045_s3 + $0x648] sm:$0xff] }
 0x340   : > { %v9068_v22 = vpop.f32.mrf.mxu1  ;;  %3273 = vmatmul.mubr.f32.gmra.mxu1 %v6355_v38  ;;  %v2281_v18 = vpop.f32.mrf.mxu0  ;;  %v6359_v38 = vld [vmem:[%s10045_s3 + $0x640] sm:$0xff] }
 0x341   : > { %10112 = vst [vmem:[#allocation30_spill] sm:$0xff] %v9062_v47  ;;  %v2282_v30 = vadd.f32 %v2281_v18, %v8400_v39  ;;  %3277 = vmatprep.mubr.f32.mxu1 %v6356_v62  ;;  %v6358_v39 = vld [vmem:[%s10045_s3 + $0x650] sm:$0xff] }
 0x342   : > { %5996 = vmatmul.mubr.msk.f32.gmra.mxu0 %vm1569_vm1, %v6357_v34  ;;  %v2756_v35 = vpop.f32.mrf.mxu1  ;;  %v2283_v13 = vpop.f32.mrf.mxu0  ;;  %v6361_v34 = vld [vmem:[%s10045_s3 + $0x688] sm:$0xff] }
 0x343   : > { %v9084_v53 = vadd.f32 %v8786_v60, %v2282_v30  ;;  %5998 = vmatprep.mubr.msk.f32.mxu0 %vm1569_vm1, %v6358_v39  ;;  %v6360_v30 = vld [vmem:[%s10045_s3 + $0x680] sm:$0xff] }
 0x344   : > { %v9090_v61 = vpop.f32.mrf.mxu1  ;;  %3278 = vmatmul.mubr.f32.gmra.mxu1 %v6359_v38  ;;  %v2286_v18 = vpop.f32.mrf.mxu0 }
 0x345   : > { %10113 = vst [vmem:[#allocation31_spill] sm:$0xff] %v9084_v53  ;;  %v2287_v60 = vadd.f32 %v2286_v18, %v8418_v15  ;;  %3282 = vmatprep.mubr.f32.mxu1 %v6360_v30  ;;  %v6362_v15 = vld [vmem:[%s10045_s3 + $0x678] sm:$0xff] }
 0x346   : > { %5999 = vmatmul.mubr.msk.f32.gmra.mxu0 %vm1569_vm1, %v6361_v34  ;;  %v2761_v35 = vpop.f32.mrf.mxu1  ;;  %v2288_v13 = vpop.f32.mrf.mxu0 }
 0x347   : > { %v9106_v39 = vadd.f32 %v8821_v48, %v2287_v60 }
 0x348   : > { %v9108_v38 = vpop.f32.mrf.mxu1  ;;  %3283 = vmatmul.mubr.f32.gmra.mxu1 %v6362_v15  ;;  %v2291_v18 = vpop.f32.mrf.mxu0 }
 0x349   : > { %10114 = vst [vmem:[#allocation32_spill] sm:$0xff] %v9106_v39  ;;  %v2292_v32 = vadd.f32 %v2291_v18, %v8435_v40 }
 0x34a   : > { %v2766_v62 = vpop.f32.mrf.mxu1  ;;  %v2293_v34 = vpop.f32.mrf.mxu0 }
 0x34b   : > { %v9117_v35 = vadd.f32 %v8812_v29, %v2292_v32 }
 0x34c   : > { %v9119_v48 = vpop.f32.mrf.mxu1  ;;  %v2296_v60 = vpop.f32.mrf.mxu0 }
 0x34d   : > { %10115 = vst [vmem:[#allocation33_spill] sm:$0xff] %v9117_v35  ;;  %v2297_v26 = vadd.f32 %v2296_v60, %v8451_v0 }
 0x34e   : > { %v2771_v15 = vpop.f32.mrf.mxu1  ;;  %v2298_v46 = vpop.f32.mrf.mxu0 }
 0x34f   : > { %v9125_v1 = vadd.f32 %v8857_v10, %v2297_v26 }
 0x350   : > { %v9127_v30 = vpop.f32.mrf.mxu1  ;;  %v2301_v40 = vpop.f32.mrf.mxu0 }
 0x351   : > { %10116 = vst [vmem:[#allocation34_spill] sm:$0xff] %v9125_v1  ;;  %v2302_v32 = vadd.f32 %v2301_v40, %v8465_v52 }
 0x352   : > { %v2776_v62 = vpop.f32.mrf.mxu1  ;;  %v2303_v18 = vpop.f32.mrf.mxu0 }
 0x353   : > { %v9133_v34 = vadd.f32 %v8837_v6, %v2302_v32 }
 0x354   : > { %v9135_v13 = vpop.f32.mrf.mxu1 }
 0x355   : > { %10117 = vst [vmem:[#allocation35_spill] sm:$0xff] %v9133_v34 }
 0x356   : > { %v2924_v10 = vpop.f32.mrf.mxu0  ;;  %v2781_v26 = vpop.f32.mrf.mxu1 }
 0x357   : > { %v9140_v46 = vadd.f32 %v2924_v10, %v8868_v51  ;;  %v3551_v57 = vpop.permute.xlu0 %3550 }
 0x358   : > { %v2926_v60 = vpop.f32.mrf.mxu0  ;;  %v9142_v15 = vpop.f32.mrf.mxu1 }
 0x35a   : > { %v2929_v29 = vpop.f32.mrf.mxu0  ;;  %v2786_v52 = vpop.f32.mrf.mxu1 }
 0x35b   : > { %v9145_v40 = vadd.f32 %v2929_v29, %v8888_v8 }
 0x35c   : > { %v2931_v6 = vpop.f32.mrf.mxu0  ;;  %v9147_v32 = vpop.f32.mrf.mxu1 }
 0x35e   : > { %v2934_v62 = vpop.f32.mrf.mxu0  ;;  %v2791_v18 = vpop.f32.mrf.mxu1 }
 0x35f   : > { %v9150_v0 = vadd.f32 %v2934_v62, %v8910_v41 }
 0x360   : > { %v2936_v26 = vpop.f32.mrf.mxu0  ;;  %v9152_v50 = vpop.f32.mrf.mxu1 }
 0x362   : > { %v2939_v51 = vpop.f32.mrf.mxu0  ;;  %v2796_v10 = vpop.f32.mrf.mxu1 }
 0x363   : > { %v9155_v60 = vadd.f32 %v2939_v51, %v8932_v7 }
 0x364   : > { %v2941_v52 = vpop.f32.mrf.mxu0  ;;  %v9157_v28 = vpop.f32.mrf.mxu1 }
 0x366   : > { %v2944_v8 = vpop.f32.mrf.mxu0  ;;  %v2801_v29 = vpop.f32.mrf.mxu1 }
 0x367   : > { %v9160_v6 = vadd.f32 %v2944_v8, %v8954_v54 }
 0x368   : > { %v2946_v18 = vpop.f32.mrf.mxu0  ;;  %v9162_v23 = vpop.f32.mrf.mxu1 }
 0x36a   : > { %v2949_v41 = vpop.f32.mrf.mxu0  ;;  %v2806_v62 = vpop.f32.mrf.mxu1 }
 0x36b   : > { %v9165_v26 = vadd.f32 %v2949_v41, %v8976_v49 }
 0x36c   : > { %v2951_v10 = vpop.f32.mrf.mxu0  ;;  %v9167_v24 = vpop.f32.mrf.mxu1 }
 0x36e   : > { %v2954_v7 = vpop.f32.mrf.mxu0  ;;  %v2811_v51 = vpop.f32.mrf.mxu1 }
 0x36f   : > { %v9170_v52 = vadd.f32 %v2954_v7, %v8998_v2 }
 0x370   : > { %v2956_v29 = vpop.f32.mrf.mxu0  ;;  %v9172_v19 = vpop.f32.mrf.mxu1 }
 0x372   : > { %v2959_v54 = vpop.f32.mrf.mxu0  ;;  %v2816_v8 = vpop.f32.mrf.mxu1 }
 0x373   : > { %v9175_v18 = vadd.f32 %v2959_v54, %v9020_v58 }
 0x374   : > { %v2961_v62 = vpop.f32.mrf.mxu0  ;;  %v9177_v42 = vpop.f32.mrf.mxu1 }
 0x376   : > { %v2964_v49 = vpop.f32.mrf.mxu0  ;;  %v2821_v41 = vpop.f32.mrf.mxu1 }
 0x377   : > { %v9180_v10 = vadd.f32 %v2964_v49, %v9046_v21 }
 0x378   : > { %v2966_v51 = vpop.f32.mrf.mxu0  ;;  %v9182_v34 = vpop.f32.mrf.mxu1 }
 0x37a   : > { %v2969_v2 = vpop.f32.mrf.mxu0  ;;  %v2826_v7 = vpop.f32.mrf.mxu1 }
 0x37b   : > { %v9185_v29 = vadd.f32 %v2969_v2, %v9068_v22 }
 0x37c   : > { %v2971_v8 = vpop.f32.mrf.mxu0  ;;  %v9187_v55 = vpop.f32.mrf.mxu1 }
 0x37e   : > { %v2974_v58 = vpop.f32.mrf.mxu0  ;;  %v2831_v54 = vpop.f32.mrf.mxu1 }
 0x37f   : > { %v9190_v62 = vadd.f32 %v2974_v58, %v9090_v61 }
 0x380   : > { %v2976_v41 = vpop.f32.mrf.mxu0  ;;  %v9192_v1 = vpop.f32.mrf.mxu1 }
 0x382   : > { %v2979_v21 = vpop.f32.mrf.mxu0  ;;  %v2836_v49 = vpop.f32.mrf.mxu1 }
 0x383   : > { %v9195_v51 = vadd.f32 %v2979_v21, %v9108_v38 }
 0x384   : > { %v2981_v7 = vpop.f32.mrf.mxu0  ;;  %v9197_v31 = vpop.f32.mrf.mxu1 }
 0x386   : > { %v2984_v22 = vpop.f32.mrf.mxu0  ;;  %v2841_v2 = vpop.f32.mrf.mxu1 }
 0x387   : > { %v9200_v8 = vadd.f32 %v2984_v22, %v9119_v48 }
 0x388   : > { %v2986_v54 = vpop.f32.mrf.mxu0  ;;  %v9202_v39 = vpop.f32.mrf.mxu1 }
 0x389   : > { %10118 = vst [vmem:[#allocation36_spill] sm:$0xff] %v9200_v8  ;;  %10119 = vst [vmem:[#allocation37_spill] sm:$0xff] %v9202_v39 }
 0x38a   : > { %v2989_v61 = vpop.f32.mrf.mxu0  ;;  %v2846_v58 = vpop.f32.mrf.mxu1 }
 0x38b   : > { %v9205_v41 = vadd.f32 %v2989_v61, %v9127_v30 }
 0x38c   : > { %v2991_v49 = vpop.f32.mrf.mxu0  ;;  %v9207_v5 = vpop.f32.mrf.mxu1 }
 0x38d   : > { %10120 = vst [vmem:[#allocation38_spill] sm:$0xff] %v9205_v41  ;;  %10121 = vst [vmem:[#allocation39_spill] sm:$0xff] %v9207_v5 }
 0x38e   : > { %v2994_v38 = vpop.f32.mrf.mxu0  ;;  %v2851_v21 = vpop.f32.mrf.mxu1 }
 0x38f   : > { %v9210_v7 = vadd.f32 %v2994_v38, %v9135_v13 }
 0x390   : > { %v2996_v2 = vpop.f32.mrf.mxu0  ;;  %v9212_v35 = vpop.f32.mrf.mxu1 }
 0x391   : > { %10122 = vst [vmem:[#allocation40_spill] sm:$0xff] %v9210_v7  ;;  %10123 = vst [vmem:[#allocation41_spill] sm:$0xff] %v9212_v35 }
 0x392   : > { %v2999_v48 = vpop.f32.mrf.mxu0  ;;  %v2856_v22 = vpop.f32.mrf.mxu1 }
 0x393   : > { %v9215_v54 = vadd.f32 %v2999_v48, %v9142_v15 }
 0x394   : > { %v3001_v58 = vpop.f32.mrf.mxu0  ;;  %v3139_v9 = vpop.f32.mrf.mxu1 }
 0x395   : > { %v9218_v30 = vadd.f32 %v3139_v9, %v9140_v46 }
 0x396   : > { %v3004_v61 = vpop.f32.mrf.mxu0  ;;  %v3141_v49 = vpop.f32.mrf.mxu1 }
 0x397   : > { %v9221_v21 = vadd.f32 %v3004_v61, %v9147_v32 }
 0x398   : > { %v3006_v13 = vpop.f32.mrf.mxu0  ;;  %v3144_v38 = vpop.f32.mrf.mxu1 }
 0x399   : > { %v9224_v2 = vadd.f32 %v3144_v38, %v9145_v40 }
 0x39a   : > { %v3009_v7 = vpop.f32.mrf.mxu0  ;;  %v3146_v22 = vpop.f32.mrf.mxu1 }
 0x39b   : > { %v9227_v15 = vadd.f32 %v3009_v7, %v9152_v50 }
 0x39c   : > { %v3011_v48 = vpop.f32.mrf.mxu0  ;;  %v3149_v58 = vpop.f32.mrf.mxu1 }
 0x39d   : > { %v9230_v9 = vadd.f32 %v3149_v58, %v9150_v0 }
 0x39e   : > { %v3014_v46 = vpop.f32.mrf.mxu0  ;;  %v3151_v49 = vpop.f32.mrf.mxu1 }
 0x39f   : > { %v9233_v32 = vadd.f32 %v3014_v46, %v9157_v28 }
 0x3a0   : > { %v3016_v61 = vpop.f32.mrf.mxu0  ;;  %v3154_v13 = vpop.f32.mrf.mxu1 }
 0x3a1   : > { %v9236_v40 = vadd.f32 %v3154_v13, %v9155_v60 }
 0x3a2   : > { %v3019_v38 = vpop.f32.mrf.mxu0  ;;  %v3156_v22 = vpop.f32.mrf.mxu1 }
 0x3a3   : > { %v9239_v50 = vadd.f32 %v3019_v38, %v9162_v23 }
 0x3a4   : > { %v3021_v7 = vpop.f32.mrf.mxu0  ;;  %v3159_v48 = vpop.f32.mrf.mxu1 }
 0x3a5   : > { %v9242_v0 = vadd.f32 %v3159_v48, %v9160_v6 }
 0x3a6   : > { %v3024_v58 = vpop.f32.mrf.mxu0  ;;  %v3161_v49 = vpop.f32.mrf.mxu1 }
 0x3a7   : > { %v9245_v28 = vadd.f32 %v3024_v58, %v9167_v24 }
 0x3a8   : > { %v3026_v46 = vpop.f32.mrf.mxu0  ;;  %v3164_v61 = vpop.f32.mrf.mxu1 }
 0x3a9   : > { %v9248_v60 = vadd.f32 %v3164_v61, %v9165_v26 }
 0x3aa   : > { %v3029_v13 = vpop.f32.mrf.mxu0  ;;  %v3166_v22 = vpop.f32.mrf.mxu1 }
 0x3ab   : > { %v9251_v23 = vadd.f32 %v3029_v13, %v9172_v19 }
 0x3ac   : > { %v3031_v38 = vpop.f32.mrf.mxu0  ;;  %v3169_v7 = vpop.f32.mrf.mxu1 }
 0x3ad   : > { %v9254_v6 = vadd.f32 %v3169_v7, %v9170_v52 }
 0x3ae   : > { %v3034_v48 = vpop.f32.mrf.mxu0  ;;  %v3171_v49 = vpop.f32.mrf.mxu1 }
 0x3af   : > { %v9257_v24 = vadd.f32 %v3034_v48, %v9177_v42 }
 0x3b0   : > { %v3036_v58 = vpop.f32.mrf.mxu0  ;;  %v3174_v46 = vpop.f32.mrf.mxu1 }
 0x3b1   : > { %v9260_v26 = vadd.f32 %v3174_v46, %v9175_v18 }
 0x3b2   : > { %v3039_v61 = vpop.f32.mrf.mxu0  ;;  %v3176_v22 = vpop.f32.mrf.mxu1 }
 0x3b3   : > { %v9263_v19 = vadd.f32 %v3039_v61, %v9182_v34 }
 0x3b4   : > { %v3041_v13 = vpop.f32.mrf.mxu0  ;;  %v3179_v38 = vpop.f32.mrf.mxu1 }
 0x3b5   : > { %v9266_v52 = vadd.f32 %v3179_v38, %v9180_v10 }
 0x3b6   : > { %v3044_v7 = vpop.f32.mrf.mxu0  ;;  %v3181_v49 = vpop.f32.mrf.mxu1 }
 0x3b7   : > { %v9269_v42 = vadd.f32 %v3044_v7, %v9187_v55 }
 0x3b8   : > { %v3046_v48 = vpop.f32.mrf.mxu0  ;;  %v3184_v58 = vpop.f32.mrf.mxu1 }
 0x3b9   : > { %10124 = vst [vmem:[#allocation42_spill] sm:$0xff] %v9269_v42  ;;  %v9272_v18 = vadd.f32 %v3184_v58, %v9185_v29 }
 0x3ba   : > { %v3049_v46 = vpop.f32.mrf.mxu0  ;;  %v3186_v22 = vpop.f32.mrf.mxu1 }
 0x3bb   : > { %10125 = vst [vmem:[#allocation43_spill] sm:$0xff] %v9272_v18  ;;  %v9275_v34 = vadd.f32 %v3049_v46, %v9192_v1 }
 0x3bc   : > { %v3051_v61 = vpop.f32.mrf.mxu0  ;;  %v3189_v13 = vpop.f32.mrf.mxu1 }
 0x3bd   : > { %v9278_v10 = vadd.f32 %v3189_v13, %v9190_v62 }
 0x3be   : > { %v3054_v38 = vpop.f32.mrf.mxu0  ;;  %v3191_v49 = vpop.f32.mrf.mxu1 }
 0x3bf   : > { %10126 = vst [vmem:[#allocation44_spill] sm:$0xff] %v9278_v10  ;;  %v9281_v55 = vadd.f32 %v3054_v38, %v9197_v31 }
 0x3c0   : > { %v3056_v7 = vpop.f32.mrf.mxu0  ;;  %v3194_v48 = vpop.f32.mrf.mxu1 }
 0x3c1   : > { %10127 = vst [vmem:[#allocation45_spill] sm:$0xff] %v9281_v55  ;;  %v9284_v29 = vadd.f32 %v3194_v48, %v9195_v51 }
 0x3c2   : > { %v9286_v58 = vpop.f32.mrf.mxu0  ;;  %v3196_v22 = vpop.f32.mrf.mxu1 }
 0x3c3   : > { %10128 = vst [vmem:[#allocation46_spill] sm:$0xff] %v9284_v29  ;;  %10129 = vst [vmem:[#allocation47_spill] sm:$0xff] %v9286_v58 }
 0x3c4   : > { %v3061_v1 = vpop.f32.mrf.mxu0  ;;  %v9288_v46 = vpop.f32.mrf.mxu1 }
 0x3c5   : > { %10130 = vst [vmem:[#allocation48_spill] sm:$0xff] %v9288_v46 }
 0x3c6   : > { %v9290_v61 = vpop.f32.mrf.mxu0  ;;  %v3201_v62 = vpop.f32.mrf.mxu1 }
 0x3c7   : > { %10131 = vst [vmem:[#allocation49_spill] sm:$0xff] %v9290_v61 }
 0x3c8   : > { %v3066_v13 = vpop.f32.mrf.mxu0  ;;  %v9292_v35 = vpop.f32.mrf.mxu1 }
 0x3c9   : > { %10132 = vst [vmem:[#allocation50_spill] sm:$0xff] %v9292_v35 }
 0x3ca   : > { %v9294_v49 = vpop.f32.mrf.mxu0  ;;  %v3206_v31 = vpop.f32.mrf.mxu1 }
 0x3cb   : > { %10133 = vst [vmem:[#allocation51_spill] sm:$0xff] %v9294_v49 }
 0x3cc   : > { %v3071_v38 = vpop.f32.mrf.mxu0  ;;  %v9296_v7 = vpop.f32.mrf.mxu1 }
 0x3cd   : > { %10134 = vst [vmem:[#allocation52_spill] sm:$0xff] %v9296_v7 }
 0x3ce   : > { %v5958_v51 = vpop.f32.mrf.mxu0  ;;  %v3211_v48 = vpop.f32.mrf.mxu1 }
 0x3d0   : > { %v3354_v41 = vpop.f32.mrf.mxu0  ;;  %v3214_v47 = vpop.f32.mrf.mxu1 }
 0x3d1   : > { %v3355_v39 = vadd.f32 %v3354_v41, %v9218_v30 }
 0x3d2   : > { %v5961_v22 = vpop.f32.mrf.mxu0  ;;  %v3216_v1 = vpop.f32.mrf.mxu1 }
 0x3d4   : > { %v3364_v20 = vpop.f32.mrf.mxu0  ;;  %v3219_v29 = vpop.f32.mrf.mxu1 }
 0x3d6   : > { %v9298_v53 = vpop.f32.mrf.mxu0  ;;  %v3221_v62 = vpop.f32.mrf.mxu1 }
 0x3d8   : > { %v3374_v13 = vpop.f32.mrf.mxu0  ;;  %v3224_v45 = vpop.f32.mrf.mxu1 }
 0x3da   : > { %v9300_v35 = vpop.f32.mrf.mxu0  ;;  %v3226_v49 = vpop.f32.mrf.mxu1 }
 0x3dc   : > { %v9302_v31 = vpop.f32.mrf.mxu0  ;;  %v3229_v38 = vpop.f32.mrf.mxu1 }
 0x3de   : > { %v9304_v7 = vpop.f32.mrf.mxu0  ;;  %v3231_v48 = vpop.f32.mrf.mxu1 }
 0x3df   : > { %10135 = vst [vmem:[#allocation53_spill] sm:$0xff] %v9304_v7  ;;  %v3215_v7 = vadd.f32 %v3214_v47, %v9215_v54  ;;  %v3561_v48 = vpop.permute.xlu1 %3560  ;;  %v3220_v47 = vadd.f32 %v3219_v29, %v9221_v21  ;;  %v3230_v21 = vadd.f32 %v3229_v38, %v9233_v32  ;;  %v10143_v32 = vmax.f32 %v8501_v25, %v8882_v3 }
 0x3e0   : > { %v9306_v55 = vpop.f32.mrf.mxu0  ;;  %v3234_v18 = vpop.f32.mrf.mxu1  ;;  %v3380_v25 = vadd.f32 %v9298_v53, %v9248_v60  ;;  %v3385_v3 = vadd.f32 %v9302_v31, %v9254_v6 }
 0x3e1   : > { %v3395_v53 = vadd.f32 %v9306_v55, %v9266_v52 }
 0x3e2   : > { %v9308_v1 = vpop.f32.mrf.mxu0  ;;  %v3236_v61 = vpop.f32.mrf.mxu1 }
 0x3e3   : > { %10136 = vst [vmem:[#allocation54_spill] sm:$0xff] %v9308_v1  ;;  %v3556_v1 = vpop.permute.xlu0 %3555  ;;  %v3566_v54 = vpop.permute.xlu1 %3565 }
 0x3e4   : > { %v9310_v5 = vpop.f32.mrf.mxu0  ;;  %v3239_v62 = vpop.f32.mrf.mxu1 }
 0x3e5   : > { %10137 = vst [vmem:[#allocation55_spill] sm:$0xff] %v9310_v5  ;;  %v3225_v5 = vadd.f32 %v3224_v45, %v9227_v15  ;;  %v3235_v45 = vadd.f32 %v3234_v18, %v9239_v50 }
 0x3e6   : > { %v9312_v44 = vpop.f32.mrf.mxu0  ;;  %v3241_v49 = vpop.f32.mrf.mxu1 }
 0x3e7   : > { %10138 = vst [vmem:[#allocation56_spill] sm:$0xff] %v9312_v44 }
 0x3e8   : > { %v9314_v42 = vpop.f32.mrf.mxu0  ;;  %v3244_v46 = vpop.f32.mrf.mxu1 }
 0x3e9   : > { %10139 = vst [vmem:[#allocation57_spill] sm:$0xff] %v9314_v42  ;;  %v3365_v42 = vadd.f32 %v3364_v20, %v9230_v9  ;;  %v3375_v20 = vadd.f32 %v3374_v13, %v9242_v0 }
 0x3ea   : > { %v5979_v8 = vpop.f32.mrf.mxu0  ;;  %v3246_v58 = vpop.f32.mrf.mxu1 }
 0x3eb   : > { %v3430_v61 = vadd.f32 %v5979_v8, %v3215_v7  ;;  %v10141_v58 = vmax.f32 %v8486_v36, %v8855_v43  ;;  %v3360_v8 = vadd.f32 %v5958_v51, %v9224_v2  ;;  %v10142_v36 = vmax.f32 %v8516_v56, %v8904_v27 }
 0x3ec   : > { %v9318_v14 = vpop.f32.mrf.mxu0  ;;  %v3249_v12 = vpop.f32.mrf.mxu1  ;;  %v3240_v56 = vadd.f32 %v3239_v62, %v9245_v28  ;;  %v3245_v27 = vadd.f32 %v3244_v46, %v9251_v23 }
 0x3ed   : > { %10140 = vst [vmem:[#allocation58_spill] sm:$0xff] %v9318_v14  ;;  %v3503_v10 = vmax.f32 %v3355_v39, %v3430_v61  ;;  %v3571_v39 = vpop.permute.xlu0 %3570  ;;  %v3250_v60 = vadd.f32 %v3249_v12, %v9257_v24 }
 0x3ee   : > { %v5982_v49 = vpop.f32.mrf.mxu0  ;;  %v3251_v44 = vpop.f32.mrf.mxu1 }
 0x3ef   : > { %v3518_v41 = vmax.f32 %v10141_v58, %v3503_v10  ;;  %v3440_v30 = vadd.f32 %v5982_v49, %v3225_v5  ;;  %v3370_v10 = vadd.f32 %v5961_v22, %v9236_v40 }
 0x3f0   : > { %v3434_v7 = vpop.f32.mrf.mxu0  ;;  %v3254_v14 = vpop.f32.mrf.mxu1 }
 0x3f1   : > { %v3623_v15 = vadd.f32 %v3551_v57, %v3518_v41  ;;  %v3505_v61 = vmax.f32 %v3365_v42, %v3440_v30  ;;  %v3435_v44 = vadd.f32 %v3434_v7, %v3220_v47  ;;  %v3576_v57 = vpop.permute.xlu1 %3575  ;;  %v3581_v38 = vpop.permute.xlu0 %3580  ;;  %v3255_v28 = vadd.f32 %v3254_v14, %v9263_v19 }
 0x3f2   : > { %v5985_v9 = vpop.f32.mrf.mxu0  ;;  %v3256_v29 = vpop.f32.mrf.mxu1 }
 0x3f3   : > { %v3638_v17 = vmax.f32 %v3623_v15, 0.0  ;;  %v3520_v5 = vmax.f32 %v10142_v36, %v3505_v61  ;;  %v3504_v43 = vmax.f32 %v3360_v8, %v3435_v44  ;;  %v3450_v2 = vadd.f32 %v5985_v9, %v3235_v45  ;;  %v10147_v44 = vld [vmem:[#allocation27_spill] sm:$0xff]  ;;  %v10149_v29 = vld [vmem:[#allocation44_spill] sm:$0xff] }
 0x3f4   : > { %v3444_v50 = vpop.f32.mrf.mxu0  ;;  %v3259_v18 = vpop.f32.mrf.mxu1  ;;  %v10150_v36 = vld [vmem:[#allocation55_spill] sm:$0xff] }
 0x3f5   : > { %3655 = vst [vmem:[%s9335_s15] sm:$0xff] %v3638_v17  ;;  %v3625_v0 = vadd.f32 %v3561_v48, %v3520_v5  ;;  %v3519_v42 = vmax.f32 %v10143_v32, %v3504_v43  ;;  %v3507_v51 = vmax.f32 %v3375_v20, %v3450_v2  ;;  %v3445_v13 = vadd.f32 %v3444_v50, %v3230_v21  ;;  %v3586_v19 = vpop.permute.xlu1 %3585  ;;  %v3591_v15 = vpop.permute.xlu0 %3590  ;;  %v10152_v43 = vld [vmem:[#allocation29_spill] sm:$0xff] }
 0x3f6   : > { %v5988_v40 = vpop.f32.mrf.mxu0  ;;  %v3261_v22 = vpop.f32.mrf.mxu1  ;;  %v10144_v17 = vmax.f32 %v8557_v59, %v8948_v4  ;;  %v10145_v59 = vmax.f32 %v8534_v63, %v8926_v33  ;;  %v3390_v63 = vadd.f32 %v9300_v35, %v9260_v26  ;;  %v10146_v33 = vmax.f32 %v8621_v16, %v8996_v37  ;;  %v10154_v32 = vld [vmem:[#allocation37_spill] sm:$0xff] }
 0x3f7   : > { %v3640_v49 = vmax.f32 %v3625_v0, 0.0  ;;  %v3624_v47 = vadd.f32 %v3556_v1, %v3519_v42  ;;  %v3506_v58 = vmax.f32 %v3370_v10, %v3445_v13  ;;  %v3460_v23 = vadd.f32 %v5988_v40, %v3245_v27  ;;  %v10157_v13 = vld [vmem:[#allocation48_spill] sm:$0xff]  ;;  %v10158_v27 = vld [vmem:[#allocation42_spill] sm:$0xff] }
 0x3f8   : > { %v3522_v48 = vmax.f32 %v10144_v17, %v3507_v51  ;;  %v3454_v46 = vpop.f32.mrf.mxu0  ;;  %v3264_v62 = vpop.f32.mrf.mxu1  ;;  %v3405_v35 = vadd.f32 %v10150_v36, %v10149_v29  ;;  %v10156_v51 = vld [vmem:[#allocation36_spill] sm:$0xff]  ;;  %v3260_v40 = vadd.f32 %v3259_v18, %v10158_v27  ;;  %v10174_v36 = vld [vmem:[#allocation30_spill] sm:$0xff] }
 0x3f9   : > { %3657 = vst [vmem:[%s9335_s15 + $0x10] sm:$0xff] %v3640_v49  ;;  %v3639_v41 = vmax.f32 %v3624_v47, 0.0  ;;  %v3521_v4 = vmax.f32 %v10145_v59, %v3506_v58  ;;  %v3455_v30 = vadd.f32 %v3454_v46, %v3240_v56  ;;  %v3509_v6 = vmax.f32 %v3385_v3, %v3460_v23  ;;  %v10160_v58 = vld [vmem:[#allocation28_spill] sm:$0xff]  ;;  %v10162_v23 = vld [vmem:[#allocation39_spill] sm:$0xff]  ;;  %v10163_v46 = vld [vmem:[#allocation49_spill] sm:$0xff] }
 0x3fa   : > { %v3627_v1 = vadd.f32 %v3571_v39, %v3522_v48  ;;  %v5991_v31 = vpop.f32.mrf.mxu0  ;;  %v3266_v14 = vpop.f32.mrf.mxu1  ;;  %v3265_v12 = vadd.f32 %v3264_v62, %v9275_v34  ;;  %v10151_v34 = vld [vmem:[#allocation20_spill] sm:$0xff]  ;;  %v3200_v56 = vadd.f32 %v10157_v13, %v10156_v51  ;;  %v10159_v48 = vld [vmem:[#allocation19_spill] sm:$0xff]  ;;  %v3065_v62 = vadd.f32 %v10163_v46, %v10162_v23 }
 0x3fb   : > { %3656 = vst [vmem:[%s9335_s15 + $0x8] sm:$0xff] %v3639_v41  ;;  %v3626_v7 = vadd.f32 %v3566_v54, %v3521_v4  ;;  %v3508_v45 = vmax.f32 %v3380_v25, %v3455_v30  ;;  %v3470_v39 = vadd.f32 %v5991_v31, %v3255_v28  ;;  %v3524_v52 = vmax.f32 %v10146_v33, %v3509_v6  ;;  %v10164_v41 = vld [vmem:[#allocation43_spill] sm:$0xff]  ;;  %v10166_v14 = vld [vmem:[#allocation45_spill] sm:$0xff]  ;;  %v10170_v33 = vld [vmem:[#allocation46_spill] sm:$0xff] }
 0x3fc   : > { %v3642_v8 = vmax.f32 %v3627_v1, 0.0  ;;  %v3464_v24 = vpop.f32.mrf.mxu0  ;;  %v3269_v55 = vpop.f32.mrf.mxu1  ;;  %v10148_v54 = vmax.f32 %v8593_v11, %v10147_v44  ;;  %v10153_v2 = vmax.f32 %v10151_v34, %v10152_v43  ;;  %v10155_v11 = vld [vmem:[#allocation47_spill] sm:$0xff]  ;;  %v10161_v25 = vmax.f32 %v10159_v48, %v10160_v58  ;;  %v10165_v1 = vld [vmem:[#allocation53_spill] sm:$0xff]  ;;  %v10176_v34 = vld [vmem:[#allocation38_spill] sm:$0xff] }
 0x3fd   : > { %v3641_v61 = vmax.f32 %v3626_v7, 0.0  ;;  %v3511_v21 = vmax.f32 %v3395_v53, %v3470_v39  ;;  %v3465_v9 = vadd.f32 %v3464_v24, %v3250_v60  ;;  %v3629_v26 = vadd.f32 %v3581_v38, %v3524_v52  ;;  %v3601_v60 = vpop.permute.xlu0 %3600  ;;  %v10167_v7 = vld [vmem:[#allocation22_spill] sm:$0xff]  ;;  %v10172_v24 = vld [vmem:[#allocation57_spill] sm:$0xff]  ;;  %v10180_v51 = vld [vmem:[#allocation40_spill] sm:$0xff] }
 0x3fe   : > { %3659 = vst [vmem:[%s9335_s15 + $0x20] sm:$0xff] %v3642_v8  ;;  %v3523_v20 = vmax.f32 %v10148_v54, %v3508_v45  ;;  %v5994_v5 = vpop.f32.mrf.mxu0  ;;  %v3271_v16 = vpop.f32.mrf.mxu1  ;;  %v3060_v42 = vadd.f32 %v10155_v11, %v10154_v32  ;;  %v3400_v59 = vadd.f32 %v10165_v1, %v10164_v41  ;;  %v3270_v8 = vadd.f32 %v3269_v55, %v10166_v14  ;;  %v10168_v45 = vld [vmem:[#allocation31_spill] sm:$0xff]  ;;  %v10171_v52 = vld [vmem:[#allocation54_spill] sm:$0xff]  ;;  %v10173_v55 = vld [vmem:[#allocation21_spill] sm:$0xff] }
 0x3ff   : > { %3658 = vst [vmem:[%s9335_s15 + $0x18] sm:$0xff] %v3641_v61  ;;  %v3526_v10 = vmax.f32 %v10153_v2, %v3511_v21  ;;  %v3510_v50 = vmax.f32 %v3390_v63, %v3465_v9  ;;  %v3480_v0 = vadd.f32 %v5994_v5, %v3265_v12  ;;  %v3644_v22 = vmax.f32 %v3629_v26, 0.0  ;;  %v10177_v43 = vld [vmem:[#allocation50_spill] sm:$0xff]  ;;  %v10181_v13 = vld [vmem:[#allocation52_spill] sm:$0xff]  ;;  %v10190_v14 = vld [vmem:[#allocation25_spill] sm:$0xff] }
 0x400   : > { %v3628_v37 = vadd.f32 %v3576_v57, %v3523_v20  ;;  %v3474_v38 = vpop.f32.mrf.mxu0  ;;  %v3274_v49 = vpop.f32.mrf.mxu1  ;;  %v10169_v39 = vmax.f32 %v10167_v7, %v10168_v45  ;;  %v3410_v12 = vadd.f32 %v10171_v52, %v10170_v33  ;;  %v3205_v2 = vadd.f32 %v10177_v43, %v10176_v34  ;;  %v10185_v48 = vld [vmem:[#allocation56_spill] sm:$0xff]  ;;  %v10193_v52 = vld [vmem:[#allocation26_spill] sm:$0xff] }
 0x401   : > { %v3596_v57 = vpop.permute.xlu1 %3595  ;;  %v3631_v17 = vadd.f32 %v3591_v15, %v3526_v10  ;;  %v3525_v3 = vmax.f32 %v10161_v25, %v3510_v50  ;;  %v3513_v28 = vmax.f32 %v3405_v35, %v3480_v0  ;;  %3661 = vst [vmem:[%s9335_s15 + $0x30] sm:$0xff] %v3644_v22  ;;  %v3475_v18 = vadd.f32 %v3474_v38, %v3260_v40  ;;  %v10178_v10 = vld [vmem:[#allocation41_spill] sm:$0xff]  ;;  %v10179_v50 = vld [vmem:[#allocation51_spill] sm:$0xff]  ;;  %v10182_v40 = vld [vmem:[#allocation24_spill] sm:$0xff]  ;;  %v3611_v25 = vpop.permute.xlu0 %3610 }
 0x402   : > { %v3643_v47 = vmax.f32 %v3628_v37, 0.0  ;;  %v3275_v4 = vadd.f32 %v3274_v49, %v3060_v42  ;;  %v5997_v30 = vpop.f32.mrf.mxu0  ;;  %v3276_v53 = vpop.f32.mrf.mxu1  ;;  %v3415_v15 = vadd.f32 %v10172_v24, %v3200_v56  ;;  %v10175_v35 = vmax.f32 %v10173_v55, %v10174_v36  ;;  %v10183_v22 = vld [vmem:[#allocation33_spill] sm:$0xff] }
 0x403   : > { %v3646_v6 = vmax.f32 %v3631_v17, 0.0  ;;  %v3630_v31 = vadd.f32 %v3586_v19, %v3525_v3  ;;  %v3528_v63 = vmax.f32 %v10169_v39, %v3513_v28  ;;  %v3512_v61 = vmax.f32 %v3400_v59, %v3475_v18  ;;  %v10186_v3 = vld [vmem:[#allocation23_spill] sm:$0xff]  ;;  %v10187_v28 = vld [vmem:[#allocation32_spill] sm:$0xff]  ;;  %v10189_v18 = vld [vmem:[#allocation58_spill] sm:$0xff] }
 0x404   : > { %3660 = vst [vmem:[%s9335_s15 + $0x28] sm:$0xff] %v3643_v47  ;;  %v3490_v44 = vadd.f32 %v5997_v30, %v3275_v4  ;;  %v3484_v54 = vpop.f32.mrf.mxu0  ;;  %v3279_v20 = vpop.f32.mrf.mxu1  ;;  %v3070_v0 = vadd.f32 %v10179_v50, %v10178_v10  ;;  %v3210_v56 = vadd.f32 %v10181_v13, %v10180_v51  ;;  %v10184_v38 = vmax.f32 %v10182_v40, %v10183_v22 }
 0x405   : > { %3663 = vst [vmem:[%s9335_s15 + $0x40] sm:$0xff] %v3646_v6  ;;  %v3645_v21 = vmax.f32 %v3630_v31, 0.0  ;;  %v3633_v9 = vadd.f32 %v3601_v60, %v3528_v63  ;;  %v3485_v19 = vadd.f32 %v3484_v54, %v3270_v8  ;;  %v3280_v29 = vadd.f32 %v3279_v20, %v3065_v62  ;;  %v3606_v32 = vpop.permute.xlu1 %3605  ;;  %v10191_v8 = vld [vmem:[#allocation34_spill] sm:$0xff] }
 0x406   : > { %v3527_v26 = vmax.f32 %v10175_v35, %v3512_v61  ;;  %v3515_v5 = vmax.f32 %v3415_v15, %v3490_v44  ;;  %v6000_v16 = vpop.f32.mrf.mxu0  ;;  %v3281_v37 = vpop.f32.mrf.mxu1  ;;  %v3420_v58 = vadd.f32 %v10185_v48, %v3205_v2  ;;  %v10188_v23 = vmax.f32 %v10186_v3, %v10187_v28 }
 0x407   : > { %3662 = vst [vmem:[%s9335_s15 + $0x38] sm:$0xff] %v3645_v21  ;;  %v3648_v11 = vmax.f32 %v3633_v9, 0.0  ;;  %v3514_v42 = vmax.f32 %v3410_v12, %v3485_v19  ;;  %v3425_v4 = vadd.f32 %v10189_v18, %v3210_v56  ;;  %v10192_v7 = vmax.f32 %v10190_v14, %v10191_v8  ;;  %v10194_v12 = vld [vmem:[#allocation35_spill] sm:$0xff]  ;;  %v3621_v61 = vpop.permute.xlu0 %3620  ;;  %v9555_v14 = vld [vmem:[%s10047_s5 + $0x8] sm:$0xff] (%p1249_p1)  ;;  %v9562_v8 = vld [vmem:[%s10047_s5] sm:$0xff] (%p1249_p1) }
 0x408   : > { %v3632_v27 = vadd.f32 %v3596_v57, %v3527_v26  ;;  %v3530_v49 = vmax.f32 %v10184_v38, %v3515_v5  ;;  %v3494_v47 = vpop.f32.mrf.mxu0  ;;  %v3284_v17 = vpop.f32.mrf.mxu1  ;;  %v10195_v24 = vmax.f32 %v10193_v52, %v10194_v12  ;;  %3852 = vmatprep.mubr.f32.mxu0 (%p1249_p1), %v9555_v14  ;;  %v9604_v12 = vld [vmem:[%s10047_s5 + $0x38] sm:$0xff] (%p1249_p1) }
 0x409   : > { %3665 = vst [vmem:[%s9335_s15 + $0x50] sm:$0xff] %v3648_v11  ;;  %v3529_v46 = vmax.f32 %v10188_v23, %v3514_v42  ;;  %v3495_v62 = vadd.f32 %v3494_v47, %v3280_v29  ;;  %v3285_v41 = vadd.f32 %v3284_v17, %v3070_v0  ;;  %v3616_v63 = vpop.permute.xlu1 %3615 }
 0x40a   : > { %v3647_v57 = vmax.f32 %v3632_v27, 0.0  ;;  %v3635_v1 = vadd.f32 %v3611_v25, %v3530_v49  ;;  %v3286_v59 = vpop.f32.mrf.mxu1 }
 0x40b   : > { %v3634_v30 = vadd.f32 %v3606_v32, %v3529_v46  ;;  %v3516_v53 = vmax.f32 %v3420_v58, %v3495_v62  ;;  %v3500_v60 = vadd.f32 %v6000_v16, %v3285_v41 }
 0x40c   : > { %3664 = vst [vmem:[%s9335_s15 + $0x48] sm:$0xff] %v3647_v57  ;;  %v3650_v6 = vmax.f32 %v3635_v1, 0.0  ;;  %v9526_v1 = vld [vmem:[%s10047_s5 + $0x10] sm:$0xff] (%p1249_p1) }
 0x40d   : > { %v3649_v31 = vmax.f32 %v3634_v30, 0.0  ;;  %v3531_v45 = vmax.f32 %v10192_v7, %v3516_v53  ;;  %v3517_v39 = vmax.f32 %v3425_v4, %v3500_v60  ;;  %v9536_v4 = vld [vmem:[%s10047_s5 + $0x28] sm:$0xff] (%p1249_p1)  ;;  %6027 = vmatprep.mubr.msk.f32.mxu1 (%p1249_p1), %vm3769_vm2, %v9526_v1 }
 0x40e   : > { %3667 = vst [vmem:[%s9335_s15 + $0x60] sm:$0xff] %v3650_v6 }
 0x40f   : > { %3666 = vst [vmem:[%s9335_s15 + $0x58] sm:$0xff] %v3649_v31  ;;  %v3636_v33 = vadd.f32 %v3616_v63, %v3531_v45  ;;  %v3532_v15 = vmax.f32 %v10195_v24, %v3517_v39  ;;  %v9580_v39 = vld [vmem:[%s10047_s5 + $0x20] sm:$0xff] (%p1249_p1) }
 0x411   : > { %v3651_v44 = vmax.f32 %v3636_v33, 0.0  ;;  %v3637_v54 = vadd.f32 %v3621_v61, %v3532_v15  ;;  %1251 = sbr.rel (!%p1249_p1) target bundleno = 333 (0x14d), region = 95  ;;  %v9589_v33 = vld [vmem:[%s10047_s5 + $0x18] sm:$0xff] (%p1249_p1)  ;;  %v9613_v15 = vld [vmem:[%s10047_s5 + $0x30] sm:$0xff] (%p1249_p1) }
 0x413   : > { %3668 = vst [vmem:[%s9335_s15 + $0x68] sm:$0xff] %v3651_v44  ;;  %v3652_v20 = vmax.f32 %v3637_v54, 0.0  ;;  %v9628_v44 = vld [vmem:[%s10047_s5 + $0x50] sm:$0xff] (%p1249_p1)  ;;  %v9633_v54 = vld [vmem:[%s10047_s5 + $0x40] sm:$0xff] (%p1249_p1) }
 0x415   : > { %3669 = vst [vmem:[%s9335_s15 + $0x70] sm:$0xff] %v3652_v20 }
 0x41c   :  { %v9430_v21 = vld [vmem:[#allocation3 + $0xf8] sm:$0xff]  ;;  %v9432_v9 = vld [vmem:[#allocation3 + $0x160] sm:$0xff]  ;;  %v9438_v29 = vld [vmem:[#allocation3 + $0xf0] sm:$0xff] }
 0x41d   :  { %v9434_v19 = vld [vmem:[#allocation3 + $0x78] sm:$0xff]  ;;  %5460 = vmatprep.subr.mxu0 %v9430_v21  ;;  %6001 = vmatprep.subr.mxu1 %v9432_v9  ;;  %v3684_v36 = vld [vmem:[#allocation3 + $0x70] sm:$0xff]  ;;  %v9444_v35 = vld [vmem:[#allocation3 + $0xe8] sm:$0xff] }
 0x41e   :  { %v9440_v55 = vld [vmem:[#allocation3 + $0x158] sm:$0xff]  ;;  %5461 = vmatpush3.msra.mxu0 %v9434_v19  ;;  %6002 = vmatpush3.msra.mxu1 %v9432_v9  ;;  %v9446_v26 = vld [vmem:[#allocation3 + $0x150] sm:$0xff]  ;;  %v3683_v5 = vld [vmem:[#allocation3 + $0x68] sm:$0xff] }
 0x41f   :  { %5462 = vmatprep.subr.mxu0 %v9438_v29  ;;  %6003 = vmatprep.subr.mxu1 %v9440_v55  ;;  %v9451_v16 = vld [vmem:[#allocation3 + $0xe0] sm:$0xff]  ;;  %v9453_v37 = vld [vmem:[#allocation3 + $0x148] sm:$0xff]  ;;  %v9458_v43 = vld [vmem:[#allocation3 + $0xd8] sm:$0xff] }
 0x420   :  { %5463 = vmatpush3.msra.mxu0 %v3684_v36  ;;  %6004 = vmatpush3.msra.mxu1 %v9440_v55  ;;  %v3682_v34 = vld [vmem:[#allocation3 + $0x60] sm:$0xff]  ;;  %v3681_v10 = vld [vmem:[#allocation3 + $0x58] sm:$0xff]  ;;  %v9465_v50 = vld [vmem:[#allocation3 + $0xd0] sm:$0xff] }
 0x421   :  { %5464 = vmatprep.subr.mxu0 %v9444_v35  ;;  %6005 = vmatprep.subr.mxu1 %v9446_v26  ;;  %v9460_v2 = vld [vmem:[#allocation3 + $0x140] sm:$0xff]  ;;  %v9467_v0 = vld [vmem:[#allocation3 + $0x138] sm:$0xff]  ;;  %v3680_v32 = vld [vmem:[#allocation3 + $0x50] sm:$0xff] }
 0x422   :  { %5465 = vmatpush3.msra.mxu0 %v3683_v5  ;;  %6006 = vmatpush3.msra.mxu1 %v9446_v26  ;;  %v9472_v11 = vld [vmem:[#allocation3 + $0xc8] sm:$0xff]  ;;  %v9474_v42 = vld [vmem:[#allocation3 + $0x130] sm:$0xff]  ;;  %v9479_v13 = vld [vmem:[#allocation3 + $0xc0] sm:$0xff] }
 0x423   :  { %5466 = vmatprep.subr.mxu0 %v9451_v16  ;;  %6007 = vmatprep.subr.mxu1 %v9453_v37  ;;  %v3679_v51 = vld [vmem:[#allocation3 + $0x48] sm:$0xff]  ;;  %v3678_v27 = vld [vmem:[#allocation3 + $0x40] sm:$0xff]  ;;  %v9486_v40 = vld [vmem:[#allocation3 + $0xb8] sm:$0xff] }
 0x424   :  { %5467 = vmatpush3.msra.mxu0 %v3682_v34  ;;  %6008 = vmatpush3.msra.mxu1 %v9453_v37  ;;  %v9481_v56 = vld [vmem:[#allocation3 + $0x128] sm:$0xff]  ;;  %v9488_v22 = vld [vmem:[#allocation3 + $0x120] sm:$0xff]  ;;  %v3677_v38 = vld [vmem:[#allocation3 + $0x38] sm:$0xff] }
 0x425   :  { %5468 = vmatprep.subr.mxu0 %v9458_v43  ;;  %6009 = vmatprep.subr.mxu1 %v9460_v2  ;;  %v9493_v49 = vld [vmem:[#allocation3 + $0xb0] sm:$0xff]  ;;  %v9495_v47 = vld [vmem:[#allocation3 + $0x118] sm:$0xff]  ;;  %v9500_v48 = vld [vmem:[#allocation3 + $0xa8] sm:$0xff] }
 0x426   :  { %5469 = vmatpush3.msra.mxu0 %v3681_v10  ;;  %6010 = vmatpush3.msra.mxu1 %v9460_v2  ;;  %v3676_v17 = vld [vmem:[#allocation3 + $0x30] sm:$0xff]  ;;  %v3675_v25 = vld [vmem:[#allocation3 + $0x28] sm:$0xff]  ;;  %v9507_v3 = vld [vmem:[#allocation3 + $0xa0] sm:$0xff] }
 0x427   :  { %5470 = vmatprep.subr.mxu0 %v9465_v50  ;;  %6011 = vmatprep.subr.mxu1 %v9467_v0  ;;  %v9502_v58 = vld [vmem:[#allocation3 + $0x110] sm:$0xff]  ;;  %v9509_v28 = vld [vmem:[#allocation3 + $0x108] sm:$0xff]  ;;  %v3674_v23 = vld [vmem:[#allocation3 + $0x20] sm:$0xff] }
 0x428   :  { %5471 = vmatpush3.msra.mxu0 %v3680_v32  ;;  %6012 = vmatpush3.msra.mxu1 %v9467_v0  ;;  %v9514_v46 = vld [vmem:[#allocation3 + $0x98] sm:$0xff]  ;;  %v9516_v62 = vld [vmem:[#allocation3 + $0x100] sm:$0xff]  ;;  %v9521_v57 = vld [vmem:[#allocation3 + $0x90] sm:$0xff] }
 0x429   :  { %5472 = vmatprep.subr.mxu0 %v9472_v11  ;;  %6013 = vmatprep.subr.mxu1 %v9474_v42  ;;  %v3673_v41 = vld [vmem:[#allocation3 + $0x18] sm:$0xff]  ;;  %v9530_v59 = vld [vmem:[#allocation3 + $0x170] sm:$0xff]  ;;  %v9538_v30 = vld [vmem:[#allocation3 + $0x88] sm:$0xff] }
 0x42a   :  { %5473 = vmatpush3.msra.mxu0 %v3679_v51  ;;  %6014 = vmatpush3.msra.mxu1 %v9474_v42  ;;  %v3672_v18 = vld [vmem:[#allocation3 + $0x10] sm:$0xff]  ;;  %v3671_v53 = vld [vmem:[#allocation3 + $0x8] sm:$0xff]  ;;  %v9546_v6 = vld [vmem:[#allocation3 + $0x80] sm:$0xff] }
 0x42b   :  { %5474 = vmatprep.subr.mxu0 %v9479_v13  ;;  %6015 = vmatprep.subr.mxu1 %v9481_v56  ;;  %v9544_v60 = vld [vmem:[#allocation3 + $0x168] sm:$0xff]  ;;  %v3670_v31 = vld [vmem:[#allocation3] sm:$0xff]  ;;  %v9565_v7 = vld [vmem:[#allocation3 + $0x1d8] sm:$0xff] }
 0x42c   :  { %5475 = vmatpush3.msra.mxu0 %v3678_v27  ;;  %6016 = vmatpush3.msra.mxu1 %v9481_v56  ;;  %v9571_v45 = vld [vmem:[#allocation3 + $0x1d0] sm:$0xff]  ;;  %v9584_v63 = vld [vmem:[#allocation3 + $0x1c8] sm:$0xff]  ;;  %v9595_v52 = vld [vmem:[#allocation3 + $0x1c0] sm:$0xff] }
 0x42d   :  { %5476 = vmatprep.subr.mxu0 %v9486_v40  ;;  %6017 = vmatprep.subr.mxu1 %v9488_v22  ;;  %v9608_v24 = vld [vmem:[#allocation3 + $0x1b8] sm:$0xff]  ;;  %v9619_v61 = vld [vmem:[#allocation3 + $0x1b0] sm:$0xff]  ;;  %v9637_v20 = vld [vmem:[#allocation3 + $0x1a8] sm:$0xff] }
 0x42e   :  { %5477 = vmatpush3.msra.mxu0 %v3677_v38  ;;  %6018 = vmatpush3.msra.mxu1 %v9488_v22  ;;  %v9644_v36 = vld [vmem:[%s10047_s5 + $0x48] sm:$0xff]  ;;  %v9656_v5 = vld [vmem:[#allocation3 + $0x1a0] sm:$0xff]  ;;  %v9681_v10 = vld [vmem:[#allocation3 + $0x190] sm:$0xff] }
 0x42f   :  { %5478 = vmatprep.subr.mxu0 %v9493_v49  ;;  %6019 = vmatprep.subr.mxu1 %v9495_v47  ;;  %v9670_v34 = vld [vmem:[#allocation3 + $0x198] sm:$0xff]  ;;  %v9695_v32 = vld [vmem:[%s10047_s5 + $0x70] sm:$0xff]  ;;  %v9706_v51 = vld [vmem:[%s10047_s5 + $0x78] sm:$0xff] }
 0x430   :  { %5479 = vmatpush3.msra.mxu0 %v3676_v17  ;;  %6020 = vmatpush3.msra.mxu1 %v9495_v47  ;;  %v9718_v27 = vld [vmem:[#allocation3 + $0x180] sm:$0xff]  ;;  %v4340_v38 = vld [vmem:[#allocation3 + $0x1e8] sm:$0xff] }
 0x431   :  { %5480 = vmatprep.subr.mxu0 %v9500_v48  ;;  %6021 = vmatprep.subr.mxu1 %v9502_v58  ;;  %v4339_v17 = vld [vmem:[#allocation3 + $0x1e0] sm:$0xff] }
 0x432   :  { %5481 = vmatpush3.msra.mxu0 %v3675_v25  ;;  %6022 = vmatpush3.msra.mxu1 %v9502_v58  ;;  %v4057_v25 = vld [vmem:[%s10048_s6 + $0x20] sm:$0xff] }
 0x433   :  { %5482 = vmatprep.subr.mxu0 %v9507_v3  ;;  %6023 = vmatprep.subr.mxu1 %v9509_v28 }
 0x434   :  { %5483 = vmatpush3.msra.mxu0 %v3674_v23  ;;  %6024 = vmatpush3.msra.mxu1 %v9509_v28  ;;  %v4058_v23 = vld [vmem:[%s10048_s6 + $0x28] sm:$0xff] }
 0x435   :  { %5484 = vmatprep.subr.mxu0 %v9514_v46  ;;  %6025 = vmatprep.subr.mxu1 %v9516_v62 }
 0x436   :  { %5485 = vmatpush3.msra.mxu0 %v3673_v41  ;;  %6026 = vmatpush3.msra.mxu1 %v9516_v62  ;;  %v4660_v41 = vld [vmem:[%s10050_s8 + $0x20] sm:$0xff] }
 0x437   :  { %5486 = vmatprep.subr.mxu0 %v9521_v57  ;;  %5529 = vmatprep.subr.mxu1 %v9530_v59 }
 0x438   :  { %5487 = vmatpush3.msra.mxu0 %v3672_v18  ;;  %6028 = vmatmul.mubr.msk.f32.vlgmr.msra.gmra.mxu1 %vm3769_vm2, %v9536_v4  ;;  %v4656_v18 = vld [vmem:[%s10050_s8] sm:$0xff] }
 0x439   :  { %5488 = vmatprep.subr.mxu0 %v9538_v30  ;;  %5530 = vmatpush3.msra.mxu1 %v9438_v29 }
 0x43a   :  { %5489 = vmatpush3.msra.mxu0 %v3671_v53  ;;  %5531 = vmatprep.subr.mxu1 %v9544_v60 }
 0x43b   :  { %5490 = vmatprep.subr.mxu0 %v9546_v6  ;;  %5532 = vmatpush3.msra.mxu1 %v9444_v35  ;;  %v9649_v35 = vld [vmem:[%s10047_s5 + $0x58] sm:$0xff] }
 0x43c   :  { %5491 = vmatpush3.msra.mxu0 %v3670_v31  ;;  %5533 = vmatprep.subr.mxu1 %v9432_v9 }
 0x43d   :  { %5534 = vmatpush3.msra.mxu1 %v9451_v16  ;;  %3853 = vmatmul.mubr.f32.vlgmr.msra.gmra.mxu0 %v9562_v8  ;;  %v9666_v16 = vld [vmem:[%s10047_s5 + $0x68] sm:$0xff] }
 0x43e   :  { %5535 = vmatprep.subr.mxu1 %v9440_v55  ;;  %6036 = vmatprep.subr.mxu0 %v9565_v7 }
 0x43f   :  { %5536 = vmatpush3.msra.mxu1 %v9458_v43  ;;  %6037 = vmatpush3.msra.mxu0 %v9565_v7  ;;  %v9675_v43 = vld [vmem:[%s10047_s5 + $0x60] sm:$0xff] }
 0x440   :  { %5537 = vmatprep.subr.mxu1 %v9446_v26  ;;  %6038 = vmatprep.subr.mxu0 %v9571_v45 }
 0x441   :  { %5538 = vmatpush3.msra.mxu1 %v9465_v50  ;;  %6039 = vmatpush3.msra.mxu0 %v9571_v45  ;;  %v9690_v50 = vld [vmem:[%s10047_s5 + $0x80] sm:$0xff] }
 0x442   :  { %3857 = vmatprep.mubr.f32.mxu0 %v9580_v39  ;;  %5539 = vmatprep.subr.mxu1 %v9453_v37 }
 0x443   :  { %6040 = vmatprep.subr.mxu0 %v9584_v63  ;;  %3858 = vmatmul.mubr.f32.gmra.mxu0 %v9589_v33 }
 0x444   :  { %5540 = vmatpush3.msra.mxu1 %v9472_v11  ;;  %6041 = vmatpush3.msra.mxu0 %v9584_v63  ;;  %v9699_v11 = vld [vmem:[#allocation3 + $0x188] sm:$0xff] }
 0x445   :  { %5541 = vmatprep.subr.mxu1 %v9460_v2  ;;  %6042 = vmatprep.subr.mxu0 %v9595_v52 }
 0x446   :  { %5542 = vmatpush3.msra.mxu1 %v9479_v13  ;;  %6043 = vmatpush3.msra.mxu0 %v9595_v52  ;;  %v9711_v13 = vld [vmem:[%s10047_s5 + $0x88] sm:$0xff] }
 0x447   :  { %3862 = vmatprep.mubr.f32.mxu0 %v9604_v12  ;;  %5543 = vmatprep.subr.mxu1 %v9467_v0 }
 0x448   :  { %6044 = vmatprep.subr.mxu0 %v9608_v24  ;;  %3863 = vmatmul.mubr.f32.gmra.mxu0 %v9613_v15 }
 0x449   :  { %5544 = vmatpush3.msra.mxu1 %v9486_v40  ;;  %6045 = vmatpush3.msra.mxu0 %v9608_v24  ;;  %v9725_v40 = vld [vmem:[#allocation3 + $0x178] sm:$0xff] }
 0x44a   :  { %5545 = vmatprep.subr.mxu1 %v9474_v42  ;;  %6046 = vmatprep.subr.mxu0 %v9619_v61 }
 0x44b   :  { %5546 = vmatpush3.msra.mxu1 %v9493_v49  ;;  %6047 = vmatpush3.msra.mxu0 %v9619_v61  ;;  %v4353_v49 = vld [vmem:[#allocation3 + $0x250] sm:$0xff] }
 0x44c   :  { %3867 = vmatprep.mubr.f32.mxu0 %v9628_v44  ;;  %6030 = vmatprep.mubr.msk.f32.mxu1 %vm3769_vm2, %v9633_v54 }
 0x44d   :  { %5547 = vmatprep.subr.mxu1 %v9481_v56  ;;  %6048 = vmatprep.subr.mxu0 %v9637_v20 }
 0x44e   :  { %3868 = vmatmul.mubr.f32.gmra.mxu0 %v9644_v36  ;;  %6031 = vmatmul.mubr.msk.f32.gmra.mxu1 %vm3769_vm2, %v9649_v35 }
 0x44f   :  { %5548 = vmatpush3.msra.mxu1 %v9500_v48  ;;  %6049 = vmatpush3.msra.mxu0 %v9637_v20  ;;  %v4351_v48 = vld [vmem:[#allocation3 + $0x240] sm:$0xff] }
 0x450   :  { %5549 = vmatprep.subr.mxu1 %v9488_v22  ;;  %6050 = vmatprep.subr.mxu0 %v9656_v5 }
 0x451   :  { %5550 = vmatpush3.msra.mxu1 %v9507_v3  ;;  %6051 = vmatpush3.msra.mxu0 %v9656_v5  ;;  %v4344_v3 = vld [vmem:[#allocation3 + $0x208] sm:$0xff] }
 0x452   :  { %3872 = vmatprep.mubr.f32.mxu0 %v9666_v16  ;;  %5551 = vmatprep.subr.mxu1 %v9495_v47 }
 0x453   :  { %6052 = vmatprep.subr.mxu0 %v9670_v34  ;;  %3873 = vmatmul.mubr.f32.gmra.mxu0 %v9675_v43 }
 0x454   :  { %5552 = vmatpush3.msra.mxu1 %v9514_v46  ;;  %6053 = vmatpush3.msra.mxu0 %v9670_v34  ;;  %v4342_v46 = vld [vmem:[#allocation3 + $0x1f8] sm:$0xff] }
 0x455   :  { %5553 = vmatprep.subr.mxu1 %v9502_v58  ;;  %6054 = vmatprep.subr.mxu0 %v9681_v10 }
 0x456   :  { %5554 = vmatpush3.msra.mxu1 %v9521_v57  ;;  %6055 = vmatpush3.msra.mxu0 %v9681_v10  ;;  %v4800_v57 = vld [vmem:[%s10052_s10] sm:$0xff] }
 0x457   :  { %3877 = vmatprep.mubr.f32.mxu0 %v9690_v50  ;;  %6033 = vmatprep.mubr.msk.f32.mxu1 %vm3769_vm2, %v9695_v32 }
 0x458   :  { %5555 = vmatprep.subr.mxu1 %v9509_v28  ;;  %6056 = vmatprep.subr.mxu0 %v9699_v11 }
 0x459   :  { %3878 = vmatmul.mubr.f32.gmra.mxu0 %v9706_v51  ;;  %6034 = vmatmul.mubr.msk.f32.gmra.mxu1 %vm3769_vm2, %v9711_v13 }
 0x45a   :  { %5556 = vmatpush3.msra.mxu1 %v9538_v30  ;;  %6057 = vmatpush3.msra.mxu0 %v9699_v11  ;;  %v10071_v30 = vmov 0.0  }
 0x45b   :  { %5557 = vmatprep.subr.mxu1 %v9516_v62  ;;  %6058 = vmatprep.subr.mxu0 %v9718_v27 }
 0x45c   :  { %5558 = vmatpush3.msra.mxu1 %v9546_v6  ;;  %6059 = vmatpush3.msra.mxu0 %v9718_v27 }
 0x45d   :  { %5559 = vmatprep.subr.mxu1 %v9430_v21  ;;  %6060 = vmatprep.subr.mxu0 %v9725_v40 }
 0x45e   :  { %5560 = vmatpush3.msra.mxu1 %v9434_v19  ;;  %4171 = vmatprep.mubr.f32.mxu1 %v9555_v14  ;;  %v4352_v19 = vld [vmem:[#allocation3 + $0x248] sm:$0xff] }
 0x45f   :  { %6061 = vmatpush3.msra.mxu0 %v9725_v40  ;;  %6062 = vmatprep.mubr.msk.f32.mxu0 %vm3769_vm2, %v9526_v1 }
 0x460   :  { %4172 = vmatmul.mubr.f32.vlgmr.msra.gmra.mxu1 %v9562_v8  ;;  %6063 = vmatmul.mubr.msk.f32.vlgmr.msra.gmra.mxu0 %vm3769_vm2, %v9536_v4 }
 0x461   :  { %5598 = vmatprep.subr.mxu0 %v4340_v38  ;;  %4176 = vmatprep.mubr.f32.mxu1 %v9580_v39 }
 0x462   :  { %5599 = vmatpush3.msra.mxu0 %v9544_v60  ;;  %6071 = vmatprep.subr.mxu1 %v4353_v49 }
 0x463   :  { %5600 = vmatprep.subr.mxu0 %v4339_v17  ;;  %6072 = vmatpush3.msra.mxu1 %v4353_v49 }
 0x464   :  { %5601 = vmatpush3.msra.mxu0 %v9432_v9  ;;  %4177 = vmatmul.mubr.f32.gmra.mxu1 %v9589_v33  ;;  %v4350_v9 = vld [vmem:[#allocation3 + $0x238] sm:$0xff] }
 0x465   :  { %5602 = vmatprep.subr.mxu0 %v9565_v7  ;;  %4181 = vmatprep.mubr.f32.mxu1 %v9604_v12 }
 0x466   :  { %5603 = vmatpush3.msra.mxu0 %v9440_v55  ;;  %6073 = vmatprep.subr.mxu1 %v4352_v19  ;;  %v4349_v55 = vld [vmem:[#allocation3 + $0x230] sm:$0xff] }
 0x467   :  { %5604 = vmatprep.subr.mxu0 %v9571_v45  ;;  %6074 = vmatpush3.msra.mxu1 %v4352_v19 }
 0x468   :  { %5605 = vmatpush3.msra.mxu0 %v9446_v26  ;;  %4182 = vmatmul.mubr.f32.gmra.mxu1 %v9613_v15  ;;  %v6384_v26 = vmov 0  }
 0x469   :  { %5606 = vmatprep.subr.mxu0 %v9584_v63  ;;  %4186 = vmatprep.mubr.f32.mxu1 %v9628_v44  ;;  %v4629_v63 = vld [vmem:[%s10049_s7 + $0x8] sm:$0xff] }
 0x46a   :  { %5607 = vmatpush3.msra.mxu0 %v9453_v37  ;;  %6075 = vmatprep.subr.mxu1 %v4351_v48  ;;  %v9765_v37 = vld [vmem:[%s10048_s6 + $0x8] sm:$0xff] }
 0x46b   :  { %5608 = vmatprep.subr.mxu0 %v9595_v52  ;;  %6076 = vmatpush3.msra.mxu1 %v4351_v48 }
 0x46c   :  { %5609 = vmatpush3.msra.mxu0 %v9460_v2  ;;  %4187 = vmatmul.mubr.f32.gmra.mxu1 %v9644_v36  ;;  %v4348_v2 = vld [vmem:[#allocation3 + $0x228] sm:$0xff] }
 0x46d   :  { %5610 = vmatprep.subr.mxu0 %v9608_v24  ;;  %6077 = vmatprep.subr.mxu1 %v4350_v9 }
 0x46e   :  { %5611 = vmatpush3.msra.mxu0 %v9467_v0  ;;  %4191 = vmatprep.mubr.f32.mxu1 %v9666_v16  ;;  %v4347_v0 = vld [vmem:[#allocation3 + $0x220] sm:$0xff] }
 0x46f   :  { %5612 = vmatprep.subr.mxu0 %v9619_v61  ;;  %6078 = vmatpush3.msra.mxu1 %v4350_v9 }
 0x470   :  { %5613 = vmatpush3.msra.mxu0 %v9474_v42  ;;  %6364 = vset.pattern.permute.xlu1 %v6384_v26  ;;  %v9781_v42 = vld [vmem:[%s10048_s6] sm:$0xff] }
 0x471   :  { %5614 = vmatprep.subr.mxu0 %v9637_v20  ;;  %4192 = vmatmul.mubr.f32.gmra.mxu1 %v9675_v43 }
 0x472   :  { %5615 = vmatpush3.msra.mxu0 %v9481_v56  ;;  %6079 = vmatprep.subr.mxu1 %v4349_v55  ;;  %v9790_v56 = vld [vmem:[%s10048_s6 + $0x18] sm:$0xff] }
 0x473   :  { %5616 = vmatprep.subr.mxu0 %v9656_v5  ;;  %4385 = vperm.xlu1 %6364, %v9765_v37  }
 0x474   :  { %5617 = vmatpush3.msra.mxu0 %v9488_v22  ;;  %6080 = vmatpush3.msra.mxu1 %v4349_v55  ;;  %v4346_v22 = vld [vmem:[#allocation3 + $0x218] sm:$0xff] }
 0x475   :  { %5618 = vmatprep.subr.mxu0 %v9670_v34  ;;  %6081 = vmatprep.subr.mxu1 %v4348_v2 }
 0x476   :  { %4196 = vmatprep.mubr.f32.mxu1 %v9690_v50  ;;  %6065 = vmatprep.mubr.msk.f32.mxu0 %vm3769_vm2, %v9633_v54 }
 0x477   :  { %5619 = vmatpush3.msra.mxu0 %v9495_v47  ;;  %6082 = vmatpush3.msra.mxu1 %v4348_v2  ;;  %v4345_v47 = vld [vmem:[#allocation3 + $0x210] sm:$0xff] }
 0x478   :  { %4197 = vmatmul.mubr.f32.gmra.mxu1 %v9706_v51  ;;  %6066 = vmatmul.mubr.msk.f32.gmra.mxu0 %vm3769_vm2, %v9649_v35 }
 0x479   :  { %5620 = vmatprep.subr.mxu0 %v9681_v10  ;;  %6083 = vmatprep.subr.mxu1 %v4347_v0 }
 0x47a   :  { %4380 = vperm.xlu1 %6364, %v9781_v42   ;;  %6363 = vset.pattern.permute.xlu0 %v6384_v26 }
 0x47b   :  { %5621 = vmatpush3.msra.mxu0 %v9502_v58  ;;  %6084 = vmatpush3.msra.mxu1 %v4347_v0  ;;  %v4374_v58 = vld [vmem:[%s10048_s6 + $0x10] sm:$0xff] }
 0x47c   :  { %4395 = vperm.xlu0 %6363, %v9790_v56   ;;  %5622 = vmatprep.subr.mxu0 %v9699_v11 }
 0x47d   :  { %6085 = vmatprep.subr.mxu1 %v4346_v22  ;;  %6068 = vmatprep.mubr.msk.f32.mxu0 %vm3769_vm2, %v9695_v32 }
 0x47e   :  { %5623 = vmatpush3.msra.mxu0 %v9509_v28  ;;  %6086 = vmatpush3.msra.mxu1 %v4346_v22  ;;  %v4343_v28 = vld [vmem:[#allocation3 + $0x200] sm:$0xff] }
 0x47f   :  { %6069 = vmatmul.mubr.msk.f32.gmra.mxu0 %vm3769_vm2, %v9711_v13  ;;  %5624 = vmatprep.subr.mxu0 %v9718_v27 }
 0x480   :  { %6087 = vmatprep.subr.mxu1 %v4345_v47  ;;  %4081 = vperm.xlu1 %6364, %v4057_v25  }
 0x481   :  { %5625 = vmatpush3.msra.mxu0 %v9516_v62  ;;  %6088 = vmatpush3.msra.mxu1 %v4345_v47  ;;  %v4341_v62 = vld [vmem:[#allocation3 + $0x1f0] sm:$0xff] }
 0x482   :  { %4390 = vperm.xlu0 %6363, %v4374_v58   ;;  %5626 = vmatprep.subr.mxu0 %v9725_v40 }
 0x483   :  { %6089 = vmatprep.subr.mxu1 %v4344_v3  ;;  %5627 = vmatpush3.msra.mxu0 %v9430_v21  ;;  %v4659_v21 = vld [vmem:[%s10050_s8 + $0x18] sm:$0xff] }
 0x484   :  { %6090 = vmatpush3.msra.mxu1 %v4344_v3  ;;  %5628 = vmatprep.subr.mxu0 %v9530_v59  ;;  %v4802_v59 = vld [vmem:[%s10052_s10 + $0x10] sm:$0xf] }
 0x485   :  { %6091 = vmatprep.subr.mxu1 %v4343_v28  ;;  %4071 = vperm.xlu1 %6364, %v4374_v58  }
 0x486   :  { %5629 = vmatpush3.msra.mxu0 %v9438_v29  ;;  %4490 = vmatprep.mubr.f32.mxu0 %v9555_v14  ;;  %v4657_v29 = vld [vmem:[%s10050_s8 + $0x8] sm:$0xff] }
 0x487   :  { %6092 = vmatpush3.msra.mxu1 %v4343_v28  ;;  %4086 = vperm.xlu0 %6363, %v4058_v23  }
 0x488   :  { %4491 = vmatmul.mubr.f32.vlgmr.msra.gmra.mxu0 %v9562_v8  ;;  %6093 = vmatprep.subr.mxu1 %v4342_v46 }
 0x489   :  { %6094 = vmatpush3.msra.mxu1 %v4342_v46  ;;  %4061 = vperm.xlu1 %6364, %v9781_v42  }
 0x48a   :  { %6095 = vmatprep.subr.mxu1 %v4341_v62  ;;  %4495 = vmatprep.mubr.f32.mxu0 %v9580_v39 }
 0x48b   :  { %6096 = vmatpush3.msra.mxu1 %v4341_v62  ;;  %6097 = vmatprep.mubr.msk.f32.mxu1 %vm3769_vm2, %v9526_v1  ;;  %v4658_v1 = vld [vmem:[%s10050_s8 + $0x10] sm:$0xff] }
 0x48c   :  { %4076 = vperm.xlu0 %6363, %v9790_v56   ;;  %4496 = vmatmul.mubr.f32.gmra.mxu0 %v9589_v33 }
 0x48d   :  { %6098 = vmatmul.mubr.msk.f32.vlgmr.msra.gmra.mxu1 %vm3769_vm2, %v9536_v4  ;;  %3761 = vperm.xlu1 %6364, %v4057_v25   ;;  %v4801_v4 = vld [vmem:[%s10052_s10 + $0x8] sm:$0xff] }
 0x48e   :  { %4500 = vmatprep.mubr.f32.mxu0 %v9604_v12  ;;  %6100 = vmatprep.mubr.msk.f32.mxu1 %vm3769_vm2, %v9633_v54 }
 0x48f   :  { %4702 = vmatprep.subr.mxu1 %v10071_v30  ;;  %6106 = vmatprep.subr.mxu0 %v10071_v30 }
 0x490   :  { %4066 = vperm.xlu0 %6363, %v9765_v37   ;;  %4501 = vmatmul.mubr.f32.gmra.mxu0 %v9613_v15 }
 0x491   :  { %3751 = vperm.xlu1 %6364, %v4374_v58   ;;  %4505 = vmatprep.mubr.f32.mxu0 %v9628_v44 }
 0x492   :  { %6101 = vmatmul.mubr.msk.f32.gmra.mxu1 %vm3769_vm2, %v9649_v35 }
 0x493   :  { %6103 = vmatprep.mubr.msk.f32.mxu1 %vm3769_vm2, %v9695_v32 }
 0x494   :  { %3766 = vperm.xlu0 %6363, %v4058_v23   ;;  %4506 = vmatmul.mubr.f32.gmra.mxu0 %v9644_v36 }
 0x495   :  { %3741 = vperm.xlu1 %6364, %v9781_v42   ;;  %4510 = vmatprep.mubr.f32.mxu0 %v9666_v16 }
 0x496   :  { %6104 = vmatmul.mubr.msk.f32.gmra.mxu1 %vm3769_vm2, %v9711_v13 }
 0x497   :  { %5247 = vmatprep.mubr.msk.f32.mxu1 %vm4686_vm3, %v4629_v63 }
 0x498   :  { %3756 = vperm.xlu0 %6363, %v9790_v56   ;;  %4511 = vmatmul.mubr.f32.gmra.mxu0 %v9675_v43 }
 0x499   :  { %4515 = vmatprep.mubr.f32.mxu0 %v9690_v50  ;;  %4400 = vperm.xlu1 %6364, %v4057_v25  }
 0x49c   :  { %3746 = vperm.xlu0 %6363, %v9765_v37   ;;  %4516 = vmatmul.mubr.f32.gmra.mxu0 %v9706_v51 }
 0x49d   :  { %4678 = vperm.xlu1 %6364, %v4659_v21  }
 0x4a0   :  { %4405 = vperm.xlu0 %6363, %v4058_v23  }
 0x4a1   :  { %4668 = vperm.xlu1 %6364, %v4657_v29  }
 0x4a4   :  { %4683 = vperm.xlu0 %6363, %v4660_v41  }
 0x4a5   :  { %4805 = vperm.xlu1 %6364, %v4800_v57  }
 0x4a8   :  { %4673 = vperm.xlu0 %6363, %v4658_v1  }
 0x4a9   :  { %4815 = vperm.xlu1 %6364, %v4802_v59  }
 0x4ac   :  { %4663 = vperm.xlu0 %6363, %v4656_v18  }
 0x4b0   :  { %4810 = vperm.xlu0 %6363, %v4801_v4  }
 0x4ee   :  { %v9872_v53 = vpop.permute.xlu1 %4385 }
 0x4f5   :  { %v9874_v60 = vpop.permute.xlu1 %4380 }
 0x4f7   :  { %v9876_v6 = vpop.permute.xlu0 %4395 }
 0x4f8   :  { %v6029_v16 = vpop.f32.mrf.mxu1 }
 0x4fa   :  { %v3949_v10 = vpop.f32.mrf.mxu1 }
 0x4fb   :  { %v9878_v31 = vpop.permute.xlu1 %4081 }
 0x4fd   :  { %v9880_v14 = vpop.permute.xlu0 %4390  ;;  %v5492_v8 = vpop.f32.mrf.mxu0 }
 0x4ff   :  { %v5493_v7 = vpop.f32.mrf.mxu0 }
 0x500   :  { %v9882_v45 = vpop.permute.xlu1 %4071  ;;  %v5494_v39 = vadd.f32 %v5493_v7, %v5492_v8 }
 0x502   :  { %v9887_v33 = vpop.permute.xlu0 %4086 }
 0x503   :  { %v5495_v52 = vpop.f32.mrf.mxu0 }
 0x504   :  { %v9890_v12 = vpop.permute.xlu1 %4061 }
 0x505   :  { %v5496_v24 = vpop.f32.mrf.mxu0 }
 0x506   :  { %v5497_v15 = vadd.f32 %v5496_v24, %v5495_v52 }
 0x507   :  { %v9892_v61 = vpop.permute.xlu0 %4076 }
 0x508   :  { %v9894_v44 = vpop.permute.xlu1 %3761  ;;  %v5498_v54 = vpop.f32.mrf.mxu0 }
 0x50a   :  { %v5499_v20 = vpop.f32.mrf.mxu0 }
 0x50b   :  { %v9896_v36 = vpop.permute.xlu0 %4066  ;;  %v9898_v35 = vadd.f32 %v5499_v20, %v5498_v54 }
 0x50c   :  { %v9900_v5 = vpop.permute.xlu1 %3751 }
 0x50e   :  { %v9908_v51 = vpop.f32.mrf.mxu1  ;;  %v9916_v17 = vpop.f32.mrf.mxu0 }
 0x50f   :  { %v9902_v34 = vpop.permute.xlu0 %3766  ;;  %10197 = vst [vmem:[#allocation60_spill] sm:$0xff] %v9908_v51 }
 0x510   :  { %v3742_v43 = vpop.permute.xlu1 %3741  ;;  %v9910_v40 = vpop.f32.mrf.mxu1 }
 0x511   :  { %v3855_v50 = vadd.f32 %v5494_v39, %v3742_v43  ;;  %10198 = vst [vmem:[#allocation61_spill] sm:$0xff] %v9910_v40  ;;  %v9920_v48 = vpop.f32.mrf.mxu0 }
 0x513   :  { %v9904_v32 = vpop.permute.xlu0 %3756  ;;  %v9906_v11 = vadd.f32 %v3949_v10, %v3855_v50  ;;  %v9924_v55 = vpop.f32.mrf.mxu0 }
 0x515   :  { %10196 = vst [vmem:[#allocation59_spill] sm:$0xff] %v9906_v11  ;;  %v9926_v37 = vpop.f32.mrf.mxu0 }
 0x517   :  { %v3747_v13 = vpop.permute.xlu0 %3746 }
 0x518   :  { %v3860_v27 = vadd.f32 %v5497_v15, %v3747_v13 }
 0x519   :  { %v9914_v49 = vpop.f32.mrf.mxu1  ;;  %v9928_v0 = vpop.f32.mrf.mxu0 }
 0x51a   :  { %v9912_v38 = vadd.f32 %v6029_v16, %v3860_v27 }
 0x51b   :  { %v9918_v19 = vpop.f32.mrf.mxu1  ;;  %v5508_v56 = vpop.f32.mrf.mxu0 }
 0x51c   :  { %10199 = vst [vmem:[#allocation62_spill] sm:$0xff] %v9912_v38  ;;  %10200 = vst [vmem:[#allocation63_spill] sm:$0xff] %v9918_v19 }
 0x520   :  { %v9922_v9 = vpop.f32.mrf.mxu1  ;;  %v9930_v47 = vpop.f32.mrf.mxu0 }
 0x522   :  { %v5562_v26 = vpop.f32.mrf.mxu1  ;;  %v9932_v58 = vpop.f32.mrf.mxu0 }
 0x524   :  { %v5564_v2 = vpop.f32.mrf.mxu1 }
 0x526   :  { %v5565_v42 = vpop.f32.mrf.mxu1 }
 0x528   :  { %v5567_v22 = vpop.f32.mrf.mxu1 }
 0x52a   :  { %v5568_v25 = vpop.f32.mrf.mxu1 }
 0x52c   :  { %v5570_v3 = vpop.f32.mrf.mxu1 }
 0x52e   :  { %v5571_v23 = vpop.f32.mrf.mxu1 }
 0x531   :  { %v5573_v62 = vpop.f32.mrf.mxu1 }
 0x533   :  { %v5574_v29 = vpop.f32.mrf.mxu1 }
 0x534   :  { %v5575_v38 = vadd.f32 %v5574_v29, %v5573_v62 }
 0x538   :  { %v6067_v28 = vpop.f32.mrf.mxu0  ;;  %v5576_v57 = vpop.f32.mrf.mxu1 }
 0x53a   :  { %v9934_v46 = vpop.f32.mrf.mxu0  ;;  %v5577_v18 = vpop.f32.mrf.mxu1 }
 0x53b   :  { %v5578_v27 = vadd.f32 %v5577_v18, %v5576_v57  ;;  %v10201_v57 = vmov 0.0  }
 0x53c   :  { %6116 = vmatprep.mubr.msk.f32.mxu0 %vm6386_vm4, %v10201_v57 }
 0x53f   :  { %v6070_v21 = vpop.f32.mrf.mxu0 }
 0x541   :  { %v4288_v41 = vpop.f32.mrf.mxu0 }
 0x548   :  { %v5630_v1 = vpop.f32.mrf.mxu0 }
 0x54a   :  { %v5631_v59 = vpop.f32.mrf.mxu0 }
 0x54b   :  { %v5632_v43 = vadd.f32 %v5631_v59, %v5630_v1  ;;  %v5569_v1 = vadd.f32 %v5568_v25, %v5567_v22  ;;  %v4194_v59 = vadd.f32 %v5575_v38, %v9878_v31 }
 0x54c   :  { %v5633_v4 = vpop.f32.mrf.mxu0 }
 0x54d   :  { %v6099_v8 = vpop.f32.mrf.mxu1  ;;  %v4493_v40 = vadd.f32 %v5632_v43, %v9874_v60  ;;  %v10205_v43 = vld [vmem:[#allocation62_spill] sm:$0xff] }
 0x54e   :  { %v5634_v7 = vpop.f32.mrf.mxu0 }
 0x54f   :  { %v4587_v63 = vpop.f32.mrf.mxu1  ;;  %v5635_v20 = vadd.f32 %v5634_v7, %v5633_v4 }
 0x550   :  { %v5636_v39 = vpop.f32.mrf.mxu0 }
 0x551   :  { %v4498_v30 = vadd.f32 %v5635_v20, %v9872_v53  ;;  %v5566_v53 = vadd.f32 %v5565_v42, %v5564_v2 }
 0x552   :  { %v5637_v52 = vpop.f32.mrf.mxu0  ;;  %v6102_v54 = vpop.f32.mrf.mxu1 }
 0x553   :  { %v5638_v24 = vadd.f32 %v5637_v52, %v5636_v39  ;;  %v5572_v39 = vadd.f32 %v5571_v23, %v5570_v3  ;;  %v4199_v52 = vadd.f32 %v5578_v27, %v9887_v33  ;;  %v4593_v4 = vadd.f32 %v6099_v8, %v4498_v30  ;;  %v4406_v8 = vpop.permute.xlu0 %4405 }
 0x554   :  { %v5639_v15 = vpop.f32.mrf.mxu0  ;;  %v4597_v13 = vpop.f32.mrf.mxu1  ;;  %v5563_v30 = vadd.f32 %v5562_v26, %v9922_v9  ;;  %v4184_v33 = vadd.f32 %v5569_v1, %v9882_v45  ;;  %v4179_v38 = vadd.f32 %v5566_v53, %v9896_v36  ;;  %v5506_v9 = vadd.f32 %v9926_v37, %v9924_v55  ;;  %v4631_v1 = vld [vmem:[%s10049_s7 + $0x18] sm:$0xff] }
 0x555   :  { %v4503_v50 = vadd.f32 %v5638_v24, %v9880_v14  ;;  %v4588_v14 = vadd.f32 %v4587_v63, %v4493_v40  ;;  %v4294_v62 = vadd.f32 %v6070_v21, %v4199_v52  ;;  %v4617_v60 = vmax.f32 %v4593_v4, 0.0  ;;  %v4635_v53 = vld [vmem:[%s10049_s7 + $0x38] sm:$0xff] }
 0x556   :  { %v5640_v16 = vpop.f32.mrf.mxu0  ;;  %v5509_v40 = vadd.f32 %v5508_v56, %v9928_v0  ;;  %v4174_v45 = vadd.f32 %v5563_v30, %v9890_v12  ;;  %v4279_v26 = vadd.f32 %v9934_v46, %v4184_v33  ;;  %v5503_v36 = vadd.f32 %v9920_v48, %v9916_v17 }
 0x557   :  { %v5641_v10 = vadd.f32 %v5640_v16, %v5639_v15  ;;  %v4598_v19 = vadd.f32 %v4597_v13, %v4503_v50  ;;  %v4616_v31 = vmax.f32 %v4588_v14, 0.0  ;;  %v4274_v56 = vadd.f32 %v9930_v47, %v4179_v38  ;;  %v4401_v15 = vpop.permute.xlu1 %4400  ;;  %v10206_v13 = vld [vmem:[#allocation59_spill] sm:$0xff] }
 0x558   :  { %v3880_v0 = vadd.f32 %v5509_v40, %v9902_v34  ;;  %v3875_v12 = vadd.f32 %v5506_v9, %v9894_v44  ;;  %v4269_v55 = vadd.f32 %v9932_v58, %v4174_v45  ;;  %v4299_v37 = vmax.f32 %v4279_v26, 0.0  ;;  %v10203_v58 = vld [vmem:[#allocation60_spill] sm:$0xff]  ;;  %v4633_v14 = vld [vmem:[%s10049_s7 + $0x28] sm:$0xff]  ;;  %v4684_v40 = vpop.permute.xlu0 %4683 }
 0x559   :  { %v4508_v11 = vadd.f32 %v5641_v10, %v9876_v6  ;;  %v4618_v24 = vmax.f32 %v4598_v19, 0.0  ;;  %v4189_v6 = vadd.f32 %v5572_v39, %v9892_v61  ;;  %v4302_v19 = vmax.f32 %v4294_v62, 0.0  ;;  %v4637_v62 = vld [vmem:[%s10049_s7 + $0x48] sm:$0xff] }
 0x55a   :  { %v3870_v3 = vadd.f32 %v5503_v36, %v9904_v32  ;;  %v3975_v17 = vadd.f32 %v9914_v49, %v3880_v0  ;;  %v4298_v34 = vmax.f32 %v4274_v56, 0.0  ;;  %v3865_v47 = vadd.f32 %v9898_v35, %v9900_v5  ;;  %v10204_v49 = vld [vmem:[#allocation61_spill] sm:$0xff]  ;;  %v6105_v35 = vpop.f32.mrf.mxu1 }
 0x55b   :  { %v4603_v51 = vadd.f32 %v6102_v54, %v4508_v11  ;;  %v5642_v11 = vpop.f32.mrf.mxu0  ;;  %v4284_v61 = vadd.f32 %v6067_v28, %v4189_v6  ;;  %v10202_v28 = vld [vmem:[#allocation63_spill] sm:$0xff]  ;;  %v4297_v23 = vmax.f32 %v4269_v55, 0.0  ;;  %v3979_v10 = vmax.f32 %v10205_v43, 0.0  ;;  %v4634_v6 = vld [vmem:[%s10049_s7 + $0x30] sm:$0xff] }
 0x55c   :  { %v3970_v44 = vadd.f32 %v10202_v28, %v3875_v12  ;;  %v3965_v46 = vadd.f32 %v10203_v58, %v3870_v3  ;;  %v3983_v21 = vmax.f32 %v3975_v17, 0.0  ;;  %v3960_v29 = vadd.f32 %v10204_v49, %v3865_v47  ;;  %v4607_v16 = vpop.f32.mrf.mxu1  ;;  %v4674_v9 = vpop.permute.xlu0 %4673  ;;  %v4798_v47 = vld [vmem:[%s10051_s9 + $0x8] sm:$0xff]  ;;  %v4799_v28 = vld [vmem:[%s10051_s9 + $0x10] sm:$0xf] }
 0x55d   :  { %v4619_v7 = vmax.f32 %v4603_v51, 0.0  ;;  %v4289_v51 = vadd.f32 %v4288_v41, %v4194_v59  ;;  %v5643_v2 = vpop.f32.mrf.mxu0  ;;  %v4300_v22 = vmax.f32 %v4284_v61, 0.0  ;;  %v3978_v27 = vmax.f32 %v10206_v13, 0.0  ;;  %v4630_v59 = vld [vmem:[%s10049_s7 + $0x10] sm:$0xff] }
 0x55e   :  { %v3982_v41 = vmax.f32 %v3970_v44, 0.0  ;;  %v5644_v18 = vadd.f32 %v5643_v2, %v5642_v11  ;;  %v3981_v5 = vmax.f32 %v3965_v46, 0.0  ;;  %v3980_v54 = vmax.f32 %v3960_v29, 0.0 }
 0x55f   :  { %4703 = vmatpush1.msra.mxu1 %v4619_v7  ;;  %v4301_v42 = vmax.f32 %v4289_v51, 0.0  ;;  %v5645_v25 = vpop.f32.mrf.mxu0  ;;  %v4628_v7 = vld [vmem:[%s10049_s7] sm:$0xff] }
 0x560   :  { %4704 = vmatprep.subr.mxu1 %v10201_v57  ;;  %v4513_v20 = vadd.f32 %v5644_v18, %v4401_v15  ;;  %v4664_v55 = vpop.permute.xlu0 %4663 }
 0x561   :  { %4705 = vmatpush1.msra.mxu1 %v4618_v24  ;;  %v5646_v48 = vpop.f32.mrf.mxu0  ;;  %v4632_v24 = vld [vmem:[%s10049_s7 + $0x20] sm:$0xff] }
 0x562   :  { %4706 = vmatprep.subr.mxu1 %v10201_v57  ;;  %v5647_v32 = vadd.f32 %v5646_v48, %v5645_v25  ;;  %v4608_v39 = vadd.f32 %v4607_v16, %v4513_v20  ;;  %v4797_v48 = vld [vmem:[%s10051_s9] sm:$0xff] }
 0x563   :  { %4707 = vmatpush1.msra.mxu1 %v4617_v60  ;;  %v4636_v60 = vld [vmem:[%s10049_s7 + $0x40] sm:$0xff] }
 0x564   :  { %4708 = vmatprep.subr.mxu1 %v10201_v57  ;;  %v4518_v63 = vadd.f32 %v5647_v32, %v4406_v8  ;;  %v4620_v4 = vmax.f32 %v4608_v39, 0.0  ;;  %v4811_v32 = vpop.permute.xlu0 %4810 }
 0x565   :  { %4709 = vmatpush1.msra.mxu1 %v4616_v31 }
 0x566   :  { %4710 = vmatprep.subr.mxu1 %v10201_v57  ;;  %v4613_v50 = vadd.f32 %v6105_v35, %v4518_v63 }
 0x567   :  { %4711 = vmatpush1.msra.mxu1 %v4302_v19  ;;  %v4679_v19 = vpop.permute.xlu1 %4678 }
 0x568   :  { %4712 = vmatprep.subr.mxu1 %v10201_v57  ;;  %v4621_v52 = vmax.f32 %v4613_v50, 0.0 }
 0x569   :  { %4713 = vmatpush1.msra.mxu1 %v4301_v42 }
 0x56a   :  { %4714 = vmatprep.subr.mxu1 %v10201_v57 }
 0x56b   :  { %4715 = vmatpush1.msra.mxu1 %v4300_v22  ;;  %v4669_v22 = vpop.permute.xlu1 %4668 }
 0x56c   :  { %4716 = vmatprep.subr.mxu1 %v10201_v57 }
 0x56d   :  { %4717 = vmatpush1.msra.mxu1 %v4299_v37 }
 0x56e   :  { %4718 = vmatprep.subr.mxu1 %v10201_v57 }
 0x56f   :  { %4719 = vmatpush1.msra.mxu1 %v4298_v34  ;;  %v4806_v44 = vpop.permute.xlu1 %4805 }
 0x570   :  { %4720 = vmatprep.subr.mxu1 %v10201_v57 }
 0x571   :  { %4721 = vmatpush1.msra.mxu1 %v4297_v23 }
 0x572   :  { %4722 = vmatprep.subr.mxu1 %v10201_v57 }
 0x573   :  { %4723 = vmatpush1.msra.mxu1 %v3983_v21 }
 0x574   :  { %4724 = vmatprep.subr.mxu1 %v10201_v57 }
 0x575   :  { %4725 = vmatpush1.msra.mxu1 %v3982_v41 }
 0x576   :  { %4726 = vmatprep.subr.mxu1 %v10201_v57 }
 0x577   :  { %4727 = vmatpush1.msra.mxu1 %v3981_v5 }
 0x578   :  { %4728 = vmatprep.subr.mxu1 %v10201_v57 }
 0x579   :  { %4729 = vmatpush1.msra.mxu1 %v3980_v54 }
 0x57a   :  { %4730 = vmatprep.subr.mxu1 %v10201_v57 }
 0x57b   :  { %4731 = vmatpush1.msra.mxu1 %v3979_v10 }
 0x57c   :  { %4732 = vmatprep.subr.mxu1 %v10201_v57 }
 0x57d   :  { %4733 = vmatpush1.msra.mxu1 %v3978_v27 }
 0x57e   :  { %4762 = vmatprep.subr.mxu1 %v10201_v57 }
 0x57f   :  { %4763 = vmatpush2.msra.mxu1 %v4621_v52 }
 0x580   :  { %4764 = vmatprep.subr.mxu1 %v10201_v57 }
 0x581   :  { %4765 = vmatpush2.msra.mxu1 %v4620_v4 }
 0x582   :  { %4767 = vmatmul.mubr.f32.vlgmr.msra.gmra.mxu1 %v4628_v7 }
 0x583   :  { %5248 = vmatprep.mubr.msk.f32.mxu1 %vm4686_vm3, %v4631_v1 }
 0x586   :  { %4772 = vmatmul.mubr.f32.gmra.mxu1 %v4630_v59 }
 0x587   :  { %5249 = vmatprep.mubr.msk.f32.mxu1 %vm4686_vm3, %v4633_v14 }
 0x58a   :  { %4777 = vmatmul.mubr.f32.gmra.mxu1 %v4632_v24 }
 0x58b   :  { %5250 = vmatprep.mubr.msk.f32.mxu1 %vm4686_vm3, %v4635_v53 }
 0x58e   :  { %4782 = vmatmul.mubr.f32.gmra.mxu1 %v4634_v6 }
 0x58f   :  { %5251 = vmatprep.mubr.msk.f32.mxu1 %vm4686_vm3, %v4637_v62 }
 0x592   :  { %4787 = vmatmul.mubr.f32.gmra.mxu1 %v4636_v60 }
 0x642   :  { %v4768_v11 = vpop.f32.mrf.mxu1 }
 0x643   :  { %v4769_v37 = vadd.f32 %v4768_v11, %v4664_v55 }
 0x644   :  { %v4770_v30 = vpop.f32.mrf.mxu1 }
 0x645   :  { %v4792_v34 = vmax.f32 %v4769_v37, 0.0 }
 0x646   :  { %v4773_v33 = vpop.f32.mrf.mxu1 }
 0x647   :  { %v4774_v25 = vadd.f32 %v4773_v33, %v4669_v22 }
 0x648   :  { %v4775_v51 = vpop.f32.mrf.mxu1 }
 0x649   :  { %v4793_v17 = vmax.f32 %v4774_v25, 0.0 }
 0x64a   :  { %v4778_v31 = vpop.f32.mrf.mxu1 }
 0x64b   :  { %v4779_v0 = vadd.f32 %v4778_v31, %v4674_v9 }
 0x64c   :  { %v4780_v38 = vpop.f32.mrf.mxu1 }
 0x64d   :  { %v4794_v3 = vmax.f32 %v4779_v0, 0.0 }
 0x64e   :  { %v4783_v61 = vpop.f32.mrf.mxu1 }
 0x64f   :  { %v4784_v26 = vadd.f32 %v4783_v61, %v4679_v19 }
 0x650   :  { %v4785_v2 = vpop.f32.mrf.mxu1 }
 0x651   :  { %v4795_v12 = vmax.f32 %v4784_v26, 0.0 }
 0x652   :  { %v4788_v45 = vpop.f32.mrf.mxu1 }
 0x653   :  { %v4789_v42 = vadd.f32 %v4788_v45, %v4684_v40 }
 0x654   :  { %v4790_v36 = vpop.f32.mrf.mxu1 }
 0x655   :  { %v4796_v56 = vmax.f32 %v4789_v42, 0.0 }
 0x657   :  { %6107 = vmatpush3.msra.mxu0 %v4796_v56 }
 0x658   :  { %6108 = vmatprep.subr.mxu0 %v10201_v57 }
 0x659   :  { %6109 = vmatpush3.msra.mxu0 %v4795_v12 }
 0x65a   :  { %6110 = vmatprep.subr.mxu0 %v10201_v57 }
 0x65b   :  { %6111 = vmatpush3.msra.mxu0 %v4794_v3 }
 0x65c   :  { %6112 = vmatprep.subr.mxu0 %v10201_v57 }
 0x65d   :  { %6113 = vmatpush3.msra.mxu0 %v4793_v17 }
 0x65e   :  { %6114 = vmatprep.subr.mxu0 %v10201_v57 }
 0x65f   :  { %6115 = vmatpush3.msra.mxu0 %v4792_v34 }
 0x660   :  { %6117 = vmatmul.mubr.msk.f32.vlgmr.msra.gmra.mxu0 %vm4818_vm5, %v4797_v48 }
 0x661   :  { %6119 = vmatprep.mubr.msk.f32.mxu0 %vm6386_vm4, %v10201_v57 }
 0x664   :  { %6120 = vmatmul.mubr.msk.f32.gmra.mxu0 %vm4818_vm5, %v4798_v47 }
 0x665   :  { %6122 = vmatprep.mubr.msk.f32.mxu0 %vm6386_vm4, %v10201_v57  ;;  %v4816_v57 = vpop.permute.xlu1 %4815 }
 0x668   :  { %6123 = vmatmul.mubr.msk.f32.gmra.mxu0 %vm4818_vm5, %v4799_v28 }
 0x720   :  { %v4894_v23 = vpop.f32.mrf.mxu0 }
 0x721   :  { %v4895_v58 = vadd.f32 %v4894_v23, %v4806_v44 }
 0x722   :  { %v6118_v46 = vpop.f32.mrf.mxu0 }
 0x723   :  { %v4908_v21 = vmax.f32 %v4895_v58, 0.0 }
 0x724   :  { %v4899_v49 = vpop.f32.mrf.mxu0 }
 0x725   :  { %4911 = vst [vmem:[%s10053_s11] sm:$0xff] %v4908_v21  ;;  %v4900_v29 = vadd.f32 %v4899_v49, %v4811_v32 }
 0x726   :  { %v6121_v41 = vpop.f32.mrf.mxu0 }
 0x727   :  { %v4909_v18 = vmax.f32 %v4900_v29, 0.0 }
 0x728   :  { %v4904_v8 = vpop.f32.mrf.mxu0 }
 0x729   :  { %4912 = vst [vmem:[%s10053_s11 + $0x8] sm:$0xff] %v4909_v18  ;;  %v4905_v35 = vadd.f32 %v4904_v8, %v4816_v57 }
 0x72a   :  { %v6124_v5 = vpop.f32.mrf.mxu0 }
 0x72b   :  { %v4910_v63 = vmax.f32 %v4905_v35, 0.0 }
 0x72d   :  { %4913 = vst [vmem:[%s10053_s11 + $0x10] sm:$0xf] %v4910_v63 }

</bundles_post_ra>
